<compile_context>
chip_gen: v7x
topology: tpu7x:2x2x1
jax: 0.10.0
libtpu: 0.0.40
codegen_flags: <defaults>
</compile_context>

<pallas_src>
import functools
import math

import numpy as np
import jax
import jax.numpy as jnp
from jax.experimental import pallas as pl
from jax.experimental.pallas import tpu as pltpu

# dtype for MXU (matmul) operands; accumulation is always float32.
MXU_DTYPE = jnp.bfloat16
LN_EPS = 1e-5
VMEM_LIMIT_BYTES = 64 * 1024 * 1024


# ----------------------------------------------------------------------------
# In-kernel helpers
# ----------------------------------------------------------------------------
def _mm(a, b):
    """MXU matmul: low-precision operands, f32 accumulation."""
    return jnp.dot(a.astype(MXU_DTYPE), b.astype(MXU_DTYPE),
                   preferred_element_type=jnp.float32)


def _mm_nt(a, b):
    """a @ b.T via dot_general (contract last dims) — no explicit transpose."""
    return jax.lax.dot_general(a.astype(MXU_DTYPE), b.astype(MXU_DTYPE),
                               (((1,), (1,)), ((), ())),
                               preferred_element_type=jnp.float32)


def _add_ln(x, y, g, b):
    z = x + y
    mu = jnp.mean(z, axis=-1, keepdims=True)
    var = jnp.mean((z - mu) ** 2, axis=-1, keepdims=True)
    return (z - mu) * jax.lax.rsqrt(var + LN_EPS) * g + b


def _ffn(x, w1, b1, w2, b2):
    h = jnp.maximum(_mm(x, w1) + b1, 0.0)            # (L, d_ff) stays in VMEM/vregs
    return _mm(h, w2) + b2


def _mha(x_q, x_kv, caw_ref, cab_ref, base, bias, head_masks):
    """Multi-head cross-attention for one batch element.

    caw_ref[base+0..3] = folded (d,d) Wq (scale folded), Wk, Wv, Wo.
    cab_ref[base+0..3] = matching (1,d) biases.
    Full-width projections; per-head scores via a (1,d) lane mask on K/V
    (equivalent to head slicing, no in-kernel reshape/transpose); head outputs
    accumulate into a lane-dense (Lq, d) slab feeding one out_proj matmul.
    """
    q = _mm(x_q, caw_ref[base + 0]) + cab_ref[base + 0]    # (Lq, d)
    k = _mm(x_kv, caw_ref[base + 1]) + cab_ref[base + 1]   # (Lk, d)
    v = _mm(x_kv, caw_ref[base + 2]) + cab_ref[base + 2]   # (Lk, d)
    out = None
    for mh in head_masks:                                  # static loop, nh iters
        k_h = k * mh                                       # zero outside head cols
        v_h = v * mh
        s = _mm_nt(q, k_h)                                 # (Lq, Lk) per-head scores
        if bias is not None:
            s = s + bias                                   # additive mask (-1e30)
        s = s - jnp.max(s, axis=-1, keepdims=True)
        p = jnp.exp(s)
        p = p * pl.reciprocal(jnp.sum(p, axis=-1, keepdims=True), approx=True)
        o = _mm(p, v_h)                                    # only head-h cols nonzero
        out = o if out is None else out + o                # concat-by-accumulation
    return _mm(out, caw_ref[base + 3]) + cab_ref[base + 3]


# ----------------------------------------------------------------------------
# Fused forward kernel: embed+LN -> num_blocks x CrossAttentionBlock -> project
# ----------------------------------------------------------------------------
def _encoder_kernel(tok_ref, pe_ref, prm_ref, orig_ref, mask_ref,
                    embw_ref, embp_ref, caw_ref, cab_ref, lnp_ref,
                    fw1_ref, fb1_ref, fw2_ref, fb2_ref,
                    projw_ref, projb_ref,
                    feat_ref, prm_out_ref,
                    *, num_heads, num_blocks):
    pe = pe_ref[0]                                    # (L, d)
    prompts = prm_ref[0]                              # (P, d)
    orig = orig_ref[0]                                # (P, d)
    bias = mask_ref[0] * jnp.float32(-1e30)           # (P, L) additive CA1 mask

    d = pe.shape[-1]
    hd = d // num_heads
    col = jax.lax.broadcasted_iota(jnp.int32, (1, d), 1)
    head_masks = [((col >= h * hd) & (col < (h + 1) * hd)).astype(jnp.float32)
                  for h in range(num_heads)]

    # image_feature_embedding -> + pe -> LayerNorm (ImageEncoder prologue)
    emb = _mm(tok_ref[0], embw_ref[...]) + embp_ref[0]
    images = _add_ln(emb, pe, embp_ref[1], embp_ref[2])

    for i in range(num_blocks):                       # static unrolled block loop
        cb, lb, fb = 8 * i, 8 * i, 2 * i
        # res_connection3: images = LN(images + CrossAttention2(images, prompts))
        a = _mha(images, prompts, caw_ref, cab_ref, cb, None, head_masks)
        images = _add_ln(images, a, lnp_ref[lb + 0], lnp_ref[lb + 1])
        # res_connection4: images = LN(images + FFN2(images) [+ pe])
        f = _ffn(images, fw1_ref[fb], fb1_ref[fb], fw2_ref[fb], fb2_ref[fb])
        if i != num_blocks - 1:                       # add_pos
            f = f + pe
        images = _add_ln(images, f, lnp_ref[lb + 2], lnp_ref[lb + 3])
        # res_connection1: prompts = LN(prompts + CrossAttention1(prompts, images, mask))
        a = _mha(prompts, images, caw_ref, cab_ref, cb + 4, bias, head_masks)
        prompts = _add_ln(prompts, a, lnp_ref[lb + 4], lnp_ref[lb + 5])
        # res_connection2: prompts = LN(prompts + FFN(prompts)); then + original
        f = _ffn(prompts, fw1_ref[fb + 1], fb1_ref[fb + 1],
                 fw2_ref[fb + 1], fb2_ref[fb + 1])
        prompts = _add_ln(prompts, f, lnp_ref[lb + 6], lnp_ref[lb + 7])
        prompts = prompts + orig

    # embedding_to_feature
    feat_ref[0] = _mm(images, projw_ref[...]) + projb_ref[...]
    prm_out_ref[0] = prompts


# ----------------------------------------------------------------------------
# BlockSpecs / feature probe for single-buffered weight specs
# ----------------------------------------------------------------------------
_BUFFERED1 = None


def _buffered_one_ok():
    """Probe whether pipeline_mode=pl.Buffered(1) is supported on this JAX/TPU."""
    global _BUFFERED1
    if _BUFFERED1 is not None:
        return _BUFFERED1
    try:
        w_spec = pl.BlockSpec((8, 128), lambda i: (0, 0),
                              pipeline_mode=pl.Buffered(1))

        def k(w_ref, o_ref):
            o_ref[...] = w_ref[...] + 1.0

        y = pl.pallas_call(
            k,
            out_shape=jax.ShapeDtypeStruct((8, 128), jnp.float32),
            grid=(2,),
            in_specs=[w_spec],
            out_specs=pl.BlockSpec((8, 128), lambda i: (0, 0)),
        )(jnp.zeros((8, 128), jnp.float32))
        _BUFFERED1 = bool(jax.block_until_ready(y)[0, 0] == 1.0)
    except Exception:
        _BUFFERED1 = False
    return _BUFFERED1


def _batch_spec(shape):
    n = len(shape)
    return pl.BlockSpec((1,) + tuple(shape), lambda b, _n=n: (b,) + (0,) * _n)


def _weight_spec(shape):
    n = len(shape)
    idx = lambda b, _n=n: (0,) * _n
    if _buffered_one_ok():
        # constant index_map across the grid -> double-buffering is pure VMEM waste
        return pl.BlockSpec(tuple(shape), idx, pipeline_mode=pl.Buffered(1))
    return pl.BlockSpec(tuple(shape), idx)


# ----------------------------------------------------------------------------
# Host-side weight packing: fold w_q/w_k/w_v with in_proj (+ scale), stack all
# blocks into a handful of slabs, pre-cast matmul operands to MXU dtype.
# ----------------------------------------------------------------------------
def _fold_ca_mats(ca, num_heads):
    d = ca["wq"].shape[0]
    hd = d // num_heads
    scale = 1.0 / math.sqrt(hd)
    wq = (ca["wq"] @ ca["in_q"]["w"]) * scale
    bq = ca["in_q"]["b"] * scale
    wk = ca["wk"] @ ca["in_k"]["w"]
    bk = ca["in_k"]["b"]
    wv = ca["wv"] @ ca["in_v"]["w"]
    bv = ca["in_v"]["b"]
    ws = jnp.stack([wq, wk, wv, ca["out"]["w"]])                  # (4, d, d)
    bs = jnp.stack([bq, bk, bv, ca["out"]["b"]])[:, None, :]      # (4, 1, d)
    return ws, bs


def _pack_weights(params, num_heads):
    caw, cab, lnp, fw1, fb1, fw2, fb2 = [], [], [], [], [], [], []
    for bp in params["blocks"]:
        w2, b2 = _fold_ca_mats(bp["ca2"], num_heads)
        w1, b1 = _fold_ca_mats(bp["ca1"], num_heads)
        caw.append(jnp.concatenate([w2, w1]))                      # (8, d, d)
        cab.append(jnp.concatenate([b2, b1]))                      # (8, 1, d)
        lnp.append(jnp.stack([bp["ln3"]["g"], bp["ln3"]["b"],
                              bp["ln4"]["g"], bp["ln4"]["b"],
                              bp["ln1"]["g"], bp["ln1"]["b"],
                              bp["ln2"]["g"], bp["ln2"]["b"]])[:, None, :])
        fw1.append(jnp.stack([bp["ffn2"]["l1"]["w"], bp["ffn"]["l1"]["w"]]))
        fb1.append(jnp.stack([bp["ffn2"]["l1"]["b"], bp["ffn"]["l1"]["b"]])[:, None, :])
        fw2.append(jnp.stack([bp["ffn2"]["l2"]["w"], bp["ffn"]["l2"]["w"]]))
        fb2.append(jnp.stack([bp["ffn2"]["l2"]["b"], bp["ffn"]["l2"]["b"]])[:, None, :])
    return {
        "emb_w": params["img_emb"]["w"].astype(MXU_DTYPE),         # (D, d)
        "emb_p": jnp.stack([params["img_emb"]["b"], params["ln"]["g"],
                            params["ln"]["b"]])[:, None, :],       # (3, 1, d)
        "caw": jnp.concatenate(caw).astype(MXU_DTYPE),             # (nb*8, d, d)
        "cab": jnp.concatenate(cab),                               # (nb*8, 1, d)
        "lnp": jnp.concatenate(lnp),                               # (nb*8, 1, d)
        "fw1": jnp.concatenate(fw1).astype(MXU_DTYPE),             # (nb*2, d, dff)
        "fb1": jnp.concatenate(fb1),                               # (nb*2, 1, dff)
        "fw2": jnp.concatenate(fw2).astype(MXU_DTYPE),             # (nb*2, dff, d)
        "fb2": jnp.concatenate(fb2),                               # (nb*2, 1, d)
        "proj_w": params["emb_to_feat"]["w"].astype(MXU_DTYPE),    # (d, D)
        "proj_b": params["emb_to_feat"]["b"][None, :],             # (1, D)
    }


_WEIGHT_ORDER = ("emb_w", "emb_p", "caw", "cab", "lnp",
                 "fw1", "fb1", "fw2", "fb2", "proj_w", "proj_b")


def fused_encoder_forward(masked_tokens, masked_pe, prompts, original_prompts,
                          mask_f, packed, num_heads, num_blocks):
    B, L, D = masked_tokens.shape
    d = masked_pe.shape[-1]
    P = prompts.shape[1]
    assert d % num_heads == 0

    weights = [packed[name] for name in _WEIGHT_ORDER]
    kern = functools.partial(_encoder_kernel, num_heads=num_heads,
                             num_blocks=num_blocks)

    in_specs = [_batch_spec((L, D)), _batch_spec((L, d)), _batch_spec((P, d)),
                _batch_spec((P, d)), _batch_spec((P, L))]
    in_specs += [_weight_spec(w.shape) for w in weights]

    return pl.pallas_call(
        kern,
        out_shape=(jax.ShapeDtypeStruct((B, L, D), jnp.float32),
                   jax.ShapeDtypeStruct((B, P, d), jnp.float32)),
        grid=(B,),
        in_specs=in_specs,
        out_specs=(pl.BlockSpec((1, L, D), lambda b: (b, 0, 0)),
                   pl.BlockSpec((1, P, d), lambda b: (b, 0, 0))),
        compiler_params=pltpu.CompilerParams(
            dimension_semantics=("parallel",),
            vmem_limit_bytes=VMEM_LIMIT_BYTES),
    )(masked_tokens, masked_pe, prompts, original_prompts, mask_f, *weights)


# ----------------------------------------------------------------------------
# Positional embedding grid (SAM-style PositionEmbeddingRandom)
# ----------------------------------------------------------------------------
def pos_emb_grid(gauss, H, W):
    y = (jnp.arange(H, dtype=jnp.float32) + 0.5) / H
    x = (jnp.arange(W, dtype=jnp.float32) + 0.5) / W
    coords = jnp.stack([jnp.broadcast_to(x[None, :], (H, W)),
                        jnp.broadcast_to(y[:, None], (H, W))], axis=-1)
    coords = 2.0 * coords - 1.0
    proj = 2.0 * jnp.pi * (coords @ gauss)                   # (H, W, d_model//2)
    return jnp.concatenate([jnp.sin(proj), jnp.cos(proj)], axis=-1)


# ----------------------------------------------------------------------------
# Device-side forward (jitted): gather -> fused kernel -> scatter
# ----------------------------------------------------------------------------
@functools.partial(jax.jit, static_argnames=("num_heads",))
def _device_forward(params, images_nhwc, prompts, original_prompts,
                    gather_idx, scatter_idx, valid, mask_f, *, num_heads):
    B, H, W, D = images_nhwc.shape
    d_model = params["img_emb"]["w"].shape[1]
    num_blocks = len(params["blocks"])

    packed = _pack_weights(params, num_heads)

    pe = pos_emb_grid(params["pe_gauss"], H, W).reshape(1, H * W, d_model)
    pe_flat = jnp.broadcast_to(pe, (B, H * W, d_model))
    imgs_flat = images_nhwc.reshape(B, H * W, D)

    bidx = jnp.arange(B)[:, None]
    valid_j = valid[:, :, None]
    masked_tokens = imgs_flat[bidx, gather_idx] * valid_j    # (B, L, D) zero-padded
    masked_pe = pe_flat[bidx, gather_idx] * valid_j          # (B, L, d_model)

    out_feats, prompts_out = fused_encoder_forward(
        masked_tokens, masked_pe, prompts, original_prompts, mask_f,
        packed, num_heads, num_blocks)

    # on-device masked_scatter: padded tokens carry an OOB index and are dropped.
    images_out_flat = imgs_flat.at[bidx, scatter_idx].set(out_feats, mode="drop")
    images_out = jnp.transpose(images_out_flat.reshape(B, H, W, D), (0, 3, 1, 2))
    return images_out, prompts_out


# ----------------------------------------------------------------------------
# maskedImageEncoder.forward
# ----------------------------------------------------------------------------
def masked_image_encoder_forward(params, images_input, prompts, original_prompts,
                                 points, num_heads, radius):
    _buffered_one_ok()   # resolve feature probe outside of jit tracing
    B, D, H, W = images_input.shape
    images_nhwc = jnp.transpose(images_input, (0, 2, 3, 1))

    # --- data-dependent glue (host-side, mirrors the torch python loops) -----
    points_np = np.asarray(points, dtype=np.float64) / (512.0 / H)
    num_points = points_np.shape[1]
    L = num_points * (radius + 1) ** 2
    r = radius // 2

    point_map = np.zeros((B, H, W), dtype=bool)
    for b in range(B):
        for pidx in range(num_points):
            i = int(points_np[b, pidx, 0])
            j = int(points_np[b, pidx, 1])
            i_min = max(0, i - r); j_min = max(0, j - r)
            i_max = min(H, i + r); j_max = min(W, j + r)
            point_map[b, i_min:i_max + 1, j_min:j_max + 1] = True

    gather_idx = np.full((B, L), H * W - 1, dtype=np.int32)   # padded -> in-bounds dummy
    scatter_idx = np.full((B, L), H * W, dtype=np.int32)      # padded -> OOB (dropped)
    valid = np.zeros((B, L), dtype=np.float32)
    mask_bpl = np.ones((B, num_points, L), dtype=bool)        # True = masked out
    for b in range(B):
        rows, cols = np.nonzero(point_map[b])                 # row-major == masked_select
        cnt = rows.shape[0]
        flat = (rows * W + cols).astype(np.int32)
        gather_idx[b, :cnt] = flat
        scatter_idx[b, :cnt] = flat
        valid[b, :cnt] = 1.0
        dist = np.maximum(np.abs(rows[:, None] - points_np[b][None, :, 0]),
                          np.abs(cols[:, None] - points_np[b][None, :, 1]))
        mask_bpl[b, :, :cnt] = (dist > r).T

    attention_mask = np.repeat(mask_bpl, num_heads, axis=0)   # (B*nh, P, L)
    mask_f = mask_bpl.astype(np.float32)                      # 0/1; bias built in-kernel

    images_out, prompts_out = _device_forward(
        params, images_nhwc, prompts, original_prompts,
        jnp.asarray(gather_idx), jnp.asarray(scatter_idx),
        jnp.asarray(valid), jnp.asarray(mask_f), num_heads=num_heads)

    attn_mask_out = jnp.asarray(attention_mask)
    # torch returns (images, images, prompts, attention_mask) when mask is None
    return images_out, images_out, prompts_out, attn_mask_out


# ----------------------------------------------------------------------------
# Deterministic parameter init (synthetic, not a checkpoint); weights stored
# (in, out)-oriented so y = x @ w + b.
# ----------------------------------------------------------------------------
def init_params(key, d_model, d_image_in, num_blocks, d_ff):
    keys = iter(jax.random.split(key, 2048))

    def nrm(shape, scale=0.05):
        return jax.random.normal(next(keys), shape, jnp.float32) * scale

    def lin(din, dout):
        return {"w": nrm((din, dout)), "b": nrm((dout,))}

    def ca():
        return {"wq": nrm((d_model, d_model)), "wk": nrm((d_model, d_model)),
                "wv": nrm((d_model, d_model)),
                "in_q": lin(d_model, d_model), "in_k": lin(d_model, d_model),
                "in_v": lin(d_model, d_model), "out": lin(d_model, d_model)}

    def ln():
        return {"g": jnp.ones((d_model,), jnp.float32),
                "b": jnp.zeros((d_model,), jnp.float32)}

    def ffnp():
        return {"l1": lin(d_model, d_ff), "l2": lin(d_ff, d_model)}

    blocks = []
    for _ in range(num_blocks):
        blocks.append({"ca1": ca(), "ca2": ca(), "ffn": ffnp(), "ffn2": ffnp(),
                       "ln1": ln(), "ln2": ln(), "ln3": ln(), "ln4": ln()})
    return {
        "pe_gauss": jax.random.normal(next(keys), (2, d_model // 2), jnp.float32),
        "img_emb": lin(d_image_in, d_model),
        "emb_to_feat": lin(d_model, d_image_in),
        "ln": {"g": jnp.ones((d_model,), jnp.float32),
               "b": jnp.zeros((d_model,), jnp.float32)},
        "blocks": blocks,
    }


if __name__ == "__main__":
    # small shapes consistent with the module's forward
    B, D, H, W = 2, 48, 16, 16          # images_input: NCHW, D == d_image_in
    d_model, num_heads = 32, 4
    num_blocks, radius = 2, 2
    num_points = 2
    d_ff = 4 * d_model

    key = jax.random.PRNGKey(0)
    kp, kx, kpr, kop = jax.random.split(key, 4)
    params = init_params(kp, d_model, D, num_blocks, d_ff)

    images_input = jax.random.normal(kx, (B, D, H, W), jnp.float32)
    prompts = jax.random.normal(kpr, (B, num_points, d_model), jnp.float32)
    original_prompts = jax.random.normal(kop, (B, num_points, d_model), jnp.float32)
    # click points in 512-scale coordinates (forward divides by 512/H)
    points = jnp.asarray([[[100.0, 200.0], [300.0, 50.0]],
                          [[400.0, 400.0], [10.0, 10.0]]], dtype=jnp.float32)

    out = masked_image_encoder_forward(params, images_input, prompts,
                                       original_prompts, points, num_heads, radius)
    jax.block_until_ready(out[0])
    jax.block_until_ready(out[2])
    jax.block_until_ready(out[3])
    assert out[0].shape == (B, D, H, W)
    assert out[2].shape == (B, num_points, d_model)
    assert out[3].shape == (num_heads * B, num_points, num_points * (radius + 1) ** 2)
    assert bool(jnp.all(jnp.isfinite(out[0]))) and bool(jnp.all(jnp.isfinite(out[2])))
    print("KERNEL_OK")
</pallas_src>

<mosaic_0001>
module attributes {stable_mosaic.version = 11 : i64} {
  func.func @k(%arg0: i32, %arg1: memref<8x128xf32, #tpu.memory_space<vmem>>, %arg2: memref<8x128xf32, #tpu.memory_space<vmem>>) attributes {dimension_semantics = [#tpu.dimension_semantics<arbitrary>], iteration_bounds = array<i64: 2>, scalar_prefetch = 0 : i64, scratch_operands = 0 : i64, tpu.core_type = #tpu.core_type<tc>, window_params = [{pipeline_mode = #tpu.pipeline_mode<synchronous>, transform_indices = @transform_0, window_bounds = array<i64: 8, 128>}, {pipeline_mode = #tpu.pipeline_mode<synchronous>, transform_indices = @transform_1, window_bounds = array<i64: 8, 128>}]} {
    %c0 = arith.constant 0 : index
    %c0_0 = arith.constant 0 : index
    %0 = vector.load %arg1[%c0, %c0_0] : memref<8x128xf32, #tpu.memory_space<vmem>>, vector<8x128xf32>
    %cst = arith.constant 1.000000e+00 : f32
    %1 = vector.broadcast %cst : f32 to vector<8x128xf32>
    %2 = arith.addf %0, %1 : vector<8x128xf32>
    %c0_1 = arith.constant 0 : index
    %c0_2 = arith.constant 0 : index
    %3 = vector.load %arg2[%c0_1, %c0_2] : memref<8x128xf32, #tpu.memory_space<vmem>>, vector<8x128xf32>
    tpu.vector_store %arg2[%c0_1, %c0_2], %2 {strides = array<i32>} : memref<8x128xf32, #tpu.memory_space<vmem>>, vector<8x128xf32>,
    return
  }
  func.func @transform_0(%arg0: i32) -> (i32, i32) {
    %c0_i32 = arith.constant 0 : i32
    %c0_i32_0 = arith.constant 0 : i32
    %c0_i32_1 = arith.constant 0 : i32
    return %c0_i32, %c0_i32_0 : i32, i32
  }
  func.func @transform_1(%arg0: i32) -> (i32, i32) {
    %c0_i32 = arith.constant 0 : i32
    %c0_i32_0 = arith.constant 0 : i32
    %c0_i32_1 = arith.constant 0 : i32
    return %c0_i32, %c0_i32_0 : i32, i32
  }
}

module attributes {stable_mosaic.version = 11 : i64} {
  func.func @_encoder_kernel(%arg0: i32, %arg1: memref<1x18x48xf32, #tpu.memory_space<vmem>>, %arg2: memref<1x18x32xf32, #tpu.memory_space<vmem>>, %arg3: memref<1x2x32xf32, #tpu.memory_space<vmem>>, %arg4: memref<1x2x32xf32, #tpu.memory_space<vmem>>, %arg5: memref<1x2x18xf32, #tpu.memory_space<vmem>>, %arg6: memref<48x32xbf16, #tpu.memory_space<vmem>>, %arg7: memref<3x1x32xf32, #tpu.memory_space<vmem>>, %arg8: memref<16x32x32xbf16, #tpu.memory_space<vmem>>, %arg9: memref<16x1x32xf32, #tpu.memory_space<vmem>>, %arg10: memref<16x1x32xf32, #tpu.memory_space<vmem>>, %arg11: memref<4x32x128xbf16, #tpu.memory_space<vmem>>, %arg12: memref<4x1x128xf32, #tpu.memory_space<vmem>>, %arg13: memref<4x128x32xbf16, #tpu.memory_space<vmem>>, %arg14: memref<4x1x32xf32, #tpu.memory_space<vmem>>, %arg15: memref<32x48xbf16, #tpu.memory_space<vmem>>, %arg16: memref<1x48xf32, #tpu.memory_space<vmem>>, %arg17: memref<1x18x48xf32, #tpu.memory_space<vmem>>, %arg18: memref<1x2x32xf32, #tpu.memory_space<vmem>>) attributes {dimension_semantics = [#tpu.dimension_semantics<parallel>], iteration_bounds = array<i64: 2>, scalar_prefetch = 0 : i64, scratch_operands = 0 : i64, tpu.core_type = #tpu.core_type<tc>, window_params = [{transform_indices = @transform_0, window_bounds = array<i64: 1, 18, 48>}, {transform_indices = @transform_1, window_bounds = array<i64: 1, 18, 32>}, {transform_indices = @transform_2, window_bounds = array<i64: 1, 2, 32>}, {transform_indices = @transform_3, window_bounds = array<i64: 1, 2, 32>}, {transform_indices = @transform_4, window_bounds = array<i64: 1, 2, 18>}, {pipeline_mode = #tpu.pipeline_mode<synchronous>, transform_indices = @transform_5, window_bounds = array<i64: 48, 32>}, {pipeline_mode = #tpu.pipeline_mode<synchronous>, transform_indices = @transform_6, window_bounds = array<i64: 3, 1, 32>}, {pipeline_mode = #tpu.pipeline_mode<synchronous>, transform_indices = @transform_7, window_bounds = array<i64: 16, 32, 32>}, {pipeline_mode = #tpu.pipeline_mode<synchronous>, transform_indices = @transform_8, window_bounds = array<i64: 16, 1, 32>}, {pipeline_mode = #tpu.pipeline_mode<synchronous>, transform_indices = @transform_9, window_bounds = array<i64: 16, 1, 32>}, {pipeline_mode = #tpu.pipeline_mode<synchronous>, transform_indices = @transform_10, window_bounds = array<i64: 4, 32, 128>}, {pipeline_mode = #tpu.pipeline_mode<synchronous>, transform_indices = @transform_11, window_bounds = array<i64: 4, 1, 128>}, {pipeline_mode = #tpu.pipeline_mode<synchronous>, transform_indices = @transform_12, window_bounds = array<i64: 4, 128, 32>}, {pipeline_mode = #tpu.pipeline_mode<synchronous>, transform_indices = @transform_13, window_bounds = array<i64: 4, 1, 32>}, {pipeline_mode = #tpu.pipeline_mode<synchronous>, transform_indices = @transform_14, window_bounds = array<i64: 32, 48>}, {pipeline_mode = #tpu.pipeline_mode<synchronous>, transform_indices = @transform_15, window_bounds = array<i64: 1, 48>}, {transform_indices = @transform_16, window_bounds = array<i64: 1, 18, 48>}, {transform_indices = @transform_17, window_bounds = array<i64: 1, 2, 32>}]} {
    %c0 = arith.constant 0 : index
    %c0_0 = arith.constant 0 : index
    %c0_1 = arith.constant 0 : index
    %0 = vector.load %arg2[%c0, %c0_0, %c0_1] : memref<1x18x32xf32, #tpu.memory_space<vmem>>, vector<1x18x32xf32>
    %1 = vector.shape_cast %0 : vector<1x18x32xf32> to vector<18x32xf32>
    %c0_2 = arith.constant 0 : index
    %c0_3 = arith.constant 0 : index
    %c0_4 = arith.constant 0 : index
    %2 = vector.load %arg3[%c0_2, %c0_3, %c0_4] : memref<1x2x32xf32, #tpu.memory_space<vmem>>, vector<1x2x32xf32>
    %3 = vector.shape_cast %2 : vector<1x2x32xf32> to vector<2x32xf32>
    %c0_5 = arith.constant 0 : index
    %c0_6 = arith.constant 0 : index
    %c0_7 = arith.constant 0 : index
    %4 = vector.load %arg4[%c0_5, %c0_6, %c0_7] : memref<1x2x32xf32, #tpu.memory_space<vmem>>, vector<1x2x32xf32>
    %5 = vector.shape_cast %4 : vector<1x2x32xf32> to vector<2x32xf32>
    %c0_8 = arith.constant 0 : index
    %c0_9 = arith.constant 0 : index
    %c0_10 = arith.constant 0 : index
    %6 = vector.load %arg5[%c0_8, %c0_9, %c0_10] : memref<1x2x18xf32, #tpu.memory_space<vmem>>, vector<1x2x18xf32>
    %7 = vector.shape_cast %6 : vector<1x2x18xf32> to vector<2x18xf32>
    %cst = arith.constant -1.000000e+30 : f32
    %8 = vector.broadcast %cst : f32 to vector<2x18xf32>
    %9 = arith.mulf %7, %8 : vector<2x18xf32>
    %10 = tpu.iota {dimensions = array<i32: 1>} : vector<1x32xi32>
    %c0_i32 = arith.constant 0 : i32
    %11 = vector.broadcast %c0_i32 : i32 to vector<1x32xi32>
    %12 = arith.cmpi sge, %10, %11 : vector<1x32xi32>
    %c8_i32 = arith.constant 8 : i32
    %13 = vector.broadcast %c8_i32 : i32 to vector<1x32xi32>
    %14 = arith.cmpi slt, %10, %13 : vector<1x32xi32>
    %15 = arith.andi %12, %14 : vector<1x32xi1>
    %16 = arith.extui %15 : vector<1x32xi1> to vector<1x32xi32>
    %17 = arith.sitofp %16 : vector<1x32xi32> to vector<1x32xf32>
    %c8_i32_11 = arith.constant 8 : i32
    %18 = vector.broadcast %c8_i32_11 : i32 to vector<1x32xi32>
    %19 = arith.cmpi sge, %10, %18 : vector<1x32xi32>
    %c16_i32 = arith.constant 16 : i32
    %20 = vector.broadcast %c16_i32 : i32 to vector<1x32xi32>
    %21 = arith.cmpi slt, %10, %20 : vector<1x32xi32>
    %22 = arith.andi %19, %21 : vector<1x32xi1>
    %23 = arith.extui %22 : vector<1x32xi1> to vector<1x32xi32>
    %24 = arith.sitofp %23 : vector<1x32xi32> to vector<1x32xf32>
    %c16_i32_12 = arith.constant 16 : i32
    %25 = vector.broadcast %c16_i32_12 : i32 to vector<1x32xi32>
    %26 = arith.cmpi sge, %10, %25 : vector<1x32xi32>
    %c24_i32 = arith.constant 24 : i32
    %27 = vector.broadcast %c24_i32 : i32 to vector<1x32xi32>
    %28 = arith.cmpi slt, %10, %27 : vector<1x32xi32>
    %29 = arith.andi %26, %28 : vector<1x32xi1>
    %30 = arith.extui %29 : vector<1x32xi1> to vector<1x32xi32>
    %31 = arith.sitofp %30 : vector<1x32xi32> to vector<1x32xf32>
    %c24_i32_13 = arith.constant 24 : i32
    %32 = vector.broadcast %c24_i32_13 : i32 to vector<1x32xi32>
    %33 = arith.cmpi sge, %10, %32 : vector<1x32xi32>
    %c32_i32 = arith.constant 32 : i32
    %34 = vector.broadcast %c32_i32 : i32 to vector<1x32xi32>
    %35 = arith.cmpi slt, %10, %34 : vector<1x32xi32>
    %36 = arith.andi %33, %35 : vector<1x32xi1>
    %37 = arith.extui %36 : vector<1x32xi1> to vector<1x32xi32>
    %38 = arith.sitofp %37 : vector<1x32xi32> to vector<1x32xf32>
    %c0_14 = arith.constant 0 : index
    %c0_15 = arith.constant 0 : index
    %c0_16 = arith.constant 0 : index
    %39 = vector.load %arg1[%c0_14, %c0_15, %c0_16] : memref<1x18x48xf32, #tpu.memory_space<vmem>>, vector<1x18x48xf32>
    %40 = vector.shape_cast %39 : vector<1x18x48xf32> to vector<18x48xf32>
    %c0_17 = arith.constant 0 : index
    %c0_18 = arith.constant 0 : index
    %41 = vector.load %arg6[%c0_17, %c0_18] : memref<48x32xbf16, #tpu.memory_space<vmem>>, vector<48x32xbf16>
    %42 = arith.truncf %40 : vector<18x48xf32> to vector<18x48xbf16>
    %cst_19 = arith.constant dense<0.000000e+00> : vector<18x32xf32>
    %43 = tpu.matmul %42, %41, %cst_19 {dimension_numbers = #tpu.dot_dimension_numbers<[1], [0], [0], [1], [0, 0, 1, 1], [], []>} : vector<18x48xbf16>, vector<48x32xbf16>, vector<18x32xf32> -> vector<18x32xf32>
    %c0_20 = arith.constant 0 : index
    %c0_21 = arith.constant 0 : index
    %c0_22 = arith.constant 0 : index
    %44 = vector.load %arg7[%c0_20, %c0_21, %c0_22] : memref<3x1x32xf32, #tpu.memory_space<vmem>>, vector<1x1x32xf32>
    %45 = vector.shape_cast %44 : vector<1x1x32xf32> to vector<1x32xf32>
    %46 = vector.broadcast %45 : vector<1x32xf32> to vector<18x32xf32>
    %47 = arith.addf %43, %46 : vector<18x32xf32>
    %c1 = arith.constant 1 : index
    %c0_23 = arith.constant 0 : index
    %c0_24 = arith.constant 0 : index
    %48 = vector.load %arg7[%c1, %c0_23, %c0_24] : memref<3x1x32xf32, #tpu.memory_space<vmem>>, vector<1x1x32xf32>
    %49 = vector.shape_cast %48 : vector<1x1x32xf32> to vector<1x32xf32>
    %c2 = arith.constant 2 : index
    %c0_25 = arith.constant 0 : index
    %c0_26 = arith.constant 0 : index
    %50 = vector.load %arg7[%c2, %c0_25, %c0_26] : memref<3x1x32xf32, #tpu.memory_space<vmem>>, vector<1x1x32xf32>
    %51 = vector.shape_cast %50 : vector<1x1x32xf32> to vector<1x32xf32>
    %52 = arith.addf %47, %1 : vector<18x32xf32>
    %cst_27 = arith.constant dense<0.000000e+00> : vector<18xf32>
    %53 = vector.multi_reduction <add>, %52, %cst_27 [1] : vector<18x32xf32> to vector<18xf32>
    %54 = vector.shape_cast %53 : vector<18xf32> to vector<18x1xf32>
    %cst_28 = arith.constant 3.200000e+01 : f32
    %55 = vector.broadcast %cst_28 : f32 to vector<18x1xf32>
    %56 = arith.divf %54, %55 : vector<18x1xf32>
    %57 = vector.broadcast %56 : vector<18x1xf32> to vector<18x32xf32>
    %58 = arith.subf %52, %57 : vector<18x32xf32>
    %59 = arith.mulf %58, %58 : vector<18x32xf32>
    %cst_29 = arith.constant dense<0.000000e+00> : vector<18xf32>
    %60 = vector.multi_reduction <add>, %59, %cst_29 [1] : vector<18x32xf32> to vector<18xf32>
    %61 = vector.shape_cast %60 : vector<18xf32> to vector<18x1xf32>
    %cst_30 = arith.constant 3.200000e+01 : f32
    %62 = vector.broadcast %cst_30 : f32 to vector<18x1xf32>
    %63 = arith.divf %61, %62 : vector<18x1xf32>
    %64 = vector.broadcast %56 : vector<18x1xf32> to vector<18x32xf32>
    %65 = arith.subf %52, %64 : vector<18x32xf32>
    %cst_31 = arith.constant 9.99999974E-6 : f32
    %66 = vector.broadcast %cst_31 : f32 to vector<18x1xf32>
    %67 = arith.addf %63, %66 : vector<18x1xf32>
    %68 = math.rsqrt %67 : vector<18x1xf32>
    %69 = vector.broadcast %68 : vector<18x1xf32> to vector<18x32xf32>
    %70 = arith.mulf %65, %69 : vector<18x32xf32>
    %71 = vector.broadcast %49 : vector<1x32xf32> to vector<18x32xf32>
    %72 = arith.mulf %70, %71 : vector<18x32xf32>
    %73 = vector.broadcast %51 : vector<1x32xf32> to vector<18x32xf32>
    %74 = arith.addf %72, %73 : vector<18x32xf32>
    %c0_32 = arith.constant 0 : index
    %c0_33 = arith.constant 0 : index
    %c0_34 = arith.constant 0 : index
    %75 = vector.load %arg8[%c0_32, %c0_33, %c0_34] : memref<16x32x32xbf16, #tpu.memory_space<vmem>>, vector<1x32x32xbf16>
    %76 = vector.shape_cast %75 : vector<1x32x32xbf16> to vector<32x32xbf16>
    %77 = arith.truncf %74 : vector<18x32xf32> to vector<18x32xbf16>
    %cst_35 = arith.constant dense<0.000000e+00> : vector<18x32xf32>
    %78 = tpu.matmul %77, %76, %cst_35 {dimension_numbers = #tpu.dot_dimension_numbers<[1], [0], [0], [1], [0, 0, 1, 1], [], []>} : vector<18x32xbf16>, vector<32x32xbf16>, vector<18x32xf32> -> vector<18x32xf32>
    %c0_36 = arith.constant 0 : index
    %c0_37 = arith.constant 0 : index
    %c0_38 = arith.constant 0 : index
    %79 = vector.load %arg9[%c0_36, %c0_37, %c0_38] : memref<16x1x32xf32, #tpu.memory_space<vmem>>, vector<1x1x32xf32>
    %80 = vector.shape_cast %79 : vector<1x1x32xf32> to vector<1x32xf32>
    %81 = vector.broadcast %80 : vector<1x32xf32> to vector<18x32xf32>
    %82 = arith.addf %78, %81 : vector<18x32xf32>
    %c1_39 = arith.constant 1 : index
    %c0_40 = arith.constant 0 : index
    %c0_41 = arith.constant 0 : index
    %83 = vector.load %arg8[%c1_39, %c0_40, %c0_41] : memref<16x32x32xbf16, #tpu.memory_space<vmem>>, vector<1x32x32xbf16>
    %84 = vector.shape_cast %83 : vector<1x32x32xbf16> to vector<32x32xbf16>
    %85 = arith.truncf %3 : vector<2x32xf32> to vector<2x32xbf16>
    %cst_42 = arith.constant dense<0.000000e+00> : vector<2x32xf32>
    %86 = tpu.matmul %85, %84, %cst_42 {dimension_numbers = #tpu.dot_dimension_numbers<[1], [0], [0], [1], [0, 0, 1, 1], [], []>} : vector<2x32xbf16>, vector<32x32xbf16>, vector<2x32xf32> -> vector<2x32xf32>
    %c1_43 = arith.constant 1 : index
    %c0_44 = arith.constant 0 : index
    %c0_45 = arith.constant 0 : index
    %87 = vector.load %arg9[%c1_43, %c0_44, %c0_45] : memref<16x1x32xf32, #tpu.memory_space<vmem>>, vector<1x1x32xf32>
    %88 = vector.shape_cast %87 : vector<1x1x32xf32> to vector<1x32xf32>
    %89 = vector.broadcast %88 : vector<1x32xf32> to vector<2x32xf32>
    %90 = arith.addf %86, %89 : vector<2x32xf32>
    %c2_46 = arith.constant 2 : index
    %c0_47 = arith.constant 0 : index
    %c0_48 = arith.constant 0 : index
    %91 = vector.load %arg8[%c2_46, %c0_47, %c0_48] : memref<16x32x32xbf16, #tpu.memory_space<vmem>>, vector<1x32x32xbf16>
    %92 = vector.shape_cast %91 : vector<1x32x32xbf16> to vector<32x32xbf16>
    %93 = arith.truncf %3 : vector<2x32xf32> to vector<2x32xbf16>
    %cst_49 = arith.constant dense<0.000000e+00> : vector<2x32xf32>
    %94 = tpu.matmul %93, %92, %cst_49 {dimension_numbers = #tpu.dot_dimension_numbers<[1], [0], [0], [1], [0, 0, 1, 1], [], []>} : vector<2x32xbf16>, vector<32x32xbf16>, vector<2x32xf32> -> vector<2x32xf32>
    %c2_50 = arith.constant 2 : index
    %c0_51 = arith.constant 0 : index
    %c0_52 = arith.constant 0 : index
    %95 = vector.load %arg9[%c2_50, %c0_51, %c0_52] : memref<16x1x32xf32, #tpu.memory_space<vmem>>, vector<1x1x32xf32>
    %96 = vector.shape_cast %95 : vector<1x1x32xf32> to vector<1x32xf32>
    %97 = vector.broadcast %96 : vector<1x32xf32> to vector<2x32xf32>
    %98 = arith.addf %94, %97 : vector<2x32xf32>
    %99 = vector.broadcast %17 : vector<1x32xf32> to vector<2x32xf32>
    %100 = arith.mulf %90, %99 : vector<2x32xf32>
    %101 = vector.broadcast %17 : vector<1x32xf32> to vector<2x32xf32>
    %102 = arith.mulf %98, %101 : vector<2x32xf32>
    %103 = arith.truncf %82 : vector<18x32xf32> to vector<18x32xbf16>
    %104 = arith.truncf %100 : vector<2x32xf32> to vector<2x32xbf16>
    %cst_53 = arith.constant dense<0.000000e+00> : vector<18x2xf32>
    %105 = tpu.matmul %103, %104, %cst_53 {dimension_numbers = #tpu.dot_dimension_numbers<[1], [1], [0], [0], [0, 0, 1, 0], [], []>} : vector<18x32xbf16>, vector<2x32xbf16>, vector<18x2xf32> -> vector<18x2xf32>
    %cst_54 = arith.constant dense<0xFF800000> : vector<18xf32>
    %106 = vector.multi_reduction <maximumf>, %105, %cst_54 [1] : vector<18x2xf32> to vector<18xf32>
    %107 = vector.shape_cast %106 : vector<18xf32> to vector<18x1xf32>
    %108 = vector.broadcast %107 : vector<18x1xf32> to vector<18x2xf32>
    %109 = arith.subf %105, %108 : vector<18x2xf32>
    %110 = math.exp %109 : vector<18x2xf32>
    %cst_55 = arith.constant dense<0.000000e+00> : vector<18xf32>
    %111 = vector.multi_reduction <add>, %110, %cst_55 [1] : vector<18x2xf32> to vector<18xf32>
    %112 = vector.shape_cast %111 : vector<18xf32> to vector<18x1xf32>
    %113 = tpu.reciprocal %112 {approx = true} : vector<18x1xf32> -> vector<18x1xf32>
    %114 = vector.broadcast %113 : vector<18x1xf32> to vector<18x2xf32>
    %115 = arith.mulf %110, %114 : vector<18x2xf32>
    %116 = arith.truncf %115 : vector<18x2xf32> to vector<18x2xbf16>
    %117 = arith.truncf %102 : vector<2x32xf32> to vector<2x32xbf16>
    %cst_56 = arith.constant dense<0.000000e+00> : vector<18x32xf32>
    %118 = tpu.matmul %116, %117, %cst_56 {dimension_numbers = #tpu.dot_dimension_numbers<[1], [0], [0], [1], [0, 0, 1, 1], [], []>} : vector<18x2xbf16>, vector<2x32xbf16>, vector<18x32xf32> -> vector<18x32xf32>
    %119 = vector.broadcast %24 : vector<1x32xf32> to vector<2x32xf32>
    %120 = arith.mulf %90, %119 : vector<2x32xf32>
    %121 = vector.broadcast %24 : vector<1x32xf32> to vector<2x32xf32>
    %122 = arith.mulf %98, %121 : vector<2x32xf32>
    %123 = arith.truncf %82 : vector<18x32xf32> to vector<18x32xbf16>
    %124 = arith.truncf %120 : vector<2x32xf32> to vector<2x32xbf16>
    %cst_57 = arith.constant dense<0.000000e+00> : vector<18x2xf32>
    %125 = tpu.matmul %123, %124, %cst_57 {dimension_numbers = #tpu.dot_dimension_numbers<[1], [1], [0], [0], [0, 0, 1, 0], [], []>} : vector<18x32xbf16>, vector<2x32xbf16>, vector<18x2xf32> -> vector<18x2xf32>
    %cst_58 = arith.constant dense<0xFF800000> : vector<18xf32>
    %126 = vector.multi_reduction <maximumf>, %125, %cst_58 [1] : vector<18x2xf32> to vector<18xf32>
    %127 = vector.shape_cast %126 : vector<18xf32> to vector<18x1xf32>
    %128 = vector.broadcast %127 : vector<18x1xf32> to vector<18x2xf32>
    %129 = arith.subf %125, %128 : vector<18x2xf32>
    %130 = math.exp %129 : vector<18x2xf32>
    %cst_59 = arith.constant dense<0.000000e+00> : vector<18xf32>
    %131 = vector.multi_reduction <add>, %130, %cst_59 [1] : vector<18x2xf32> to vector<18xf32>
    %132 = vector.shape_cast %131 : vector<18xf32> to vector<18x1xf32>
    %133 = tpu.reciprocal %132 {approx = true} : vector<18x1xf32> -> vector<18x1xf32>
    %134 = vector.broadcast %133 : vector<18x1xf32> to vector<18x2xf32>
    %135 = arith.mulf %130, %134 : vector<18x2xf32>
    %136 = arith.truncf %135 : vector<18x2xf32> to vector<18x2xbf16>
    %137 = arith.truncf %122 : vector<2x32xf32> to vector<2x32xbf16>
    %cst_60 = arith.constant dense<0.000000e+00> : vector<18x32xf32>
    %138 = tpu.matmul %136, %137, %cst_60 {dimension_numbers = #tpu.dot_dimension_numbers<[1], [0], [0], [1], [0, 0, 1, 1], [], []>} : vector<18x2xbf16>, vector<2x32xbf16>, vector<18x32xf32> -> vector<18x32xf32>
    %139 = arith.addf %118, %138 : vector<18x32xf32>
    %140 = vector.broadcast %31 : vector<1x32xf32> to vector<2x32xf32>
    %141 = arith.mulf %90, %140 : vector<2x32xf32>
    %142 = vector.broadcast %31 : vector<1x32xf32> to vector<2x32xf32>
    %143 = arith.mulf %98, %142 : vector<2x32xf32>
    %144 = arith.truncf %82 : vector<18x32xf32> to vector<18x32xbf16>
    %145 = arith.truncf %141 : vector<2x32xf32> to vector<2x32xbf16>
    %cst_61 = arith.constant dense<0.000000e+00> : vector<18x2xf32>
    %146 = tpu.matmul %144, %145, %cst_61 {dimension_numbers = #tpu.dot_dimension_numbers<[1], [1], [0], [0], [0, 0, 1, 0], [], []>} : vector<18x32xbf16>, vector<2x32xbf16>, vector<18x2xf32> -> vector<18x2xf32>
    %cst_62 = arith.constant dense<0xFF800000> : vector<18xf32>
    %147 = vector.multi_reduction <maximumf>, %146, %cst_62 [1] : vector<18x2xf32> to vector<18xf32>
    %148 = vector.shape_cast %147 : vector<18xf32> to vector<18x1xf32>
    %149 = vector.broadcast %148 : vector<18x1xf32> to vector<18x2xf32>
    %150 = arith.subf %146, %149 : vector<18x2xf32>
    %151 = math.exp %150 : vector<18x2xf32>
    %cst_63 = arith.constant dense<0.000000e+00> : vector<18xf32>
    %152 = vector.multi_reduction <add>, %151, %cst_63 [1] : vector<18x2xf32> to vector<18xf32>
    %153 = vector.shape_cast %152 : vector<18xf32> to vector<18x1xf32>
    %154 = tpu.reciprocal %153 {approx = true} : vector<18x1xf32> -> vector<18x1xf32>
    %155 = vector.broadcast %154 : vector<18x1xf32> to vector<18x2xf32>
    %156 = arith.mulf %151, %155 : vector<18x2xf32>
    %157 = arith.truncf %156 : vector<18x2xf32> to vector<18x2xbf16>
    %158 = arith.truncf %143 : vector<2x32xf32> to vector<2x32xbf16>
    %cst_64 = arith.constant dense<0.000000e+00> : vector<18x32xf32>
    %159 = tpu.matmul %157, %158, %cst_64 {dimension_numbers = #tpu.dot_dimension_numbers<[1], [0], [0], [1], [0, 0, 1, 1], [], []>} : vector<18x2xbf16>, vector<2x32xbf16>, vector<18x32xf32> -> vector<18x32xf32>
    %160 = arith.addf %139, %159 : vector<18x32xf32>
    %161 = vector.broadcast %38 : vector<1x32xf32> to vector<2x32xf32>
    %162 = arith.mulf %90, %161 : vector<2x32xf32>
    %163 = vector.broadcast %38 : vector<1x32xf32> to vector<2x32xf32>
    %164 = arith.mulf %98, %163 : vector<2x32xf32>
    %165 = arith.truncf %82 : vector<18x32xf32> to vector<18x32xbf16>
    %166 = arith.truncf %162 : vector<2x32xf32> to vector<2x32xbf16>
    %cst_65 = arith.constant dense<0.000000e+00> : vector<18x2xf32>
    %167 = tpu.matmul %165, %166, %cst_65 {dimension_numbers = #tpu.dot_dimension_numbers<[1], [1], [0], [0], [0, 0, 1, 0], [], []>} : vector<18x32xbf16>, vector<2x32xbf16>, vector<18x2xf32> -> vector<18x2xf32>
    %cst_66 = arith.constant dense<0xFF800000> : vector<18xf32>
    %168 = vector.multi_reduction <maximumf>, %167, %cst_66 [1] : vector<18x2xf32> to vector<18xf32>
    %169 = vector.shape_cast %168 : vector<18xf32> to vector<18x1xf32>
    %170 = vector.broadcast %169 : vector<18x1xf32> to vector<18x2xf32>
    %171 = arith.subf %167, %170 : vector<18x2xf32>
    %172 = math.exp %171 : vector<18x2xf32>
    %cst_67 = arith.constant dense<0.000000e+00> : vector<18xf32>
    %173 = vector.multi_reduction <add>, %172, %cst_67 [1] : vector<18x2xf32> to vector<18xf32>
    %174 = vector.shape_cast %173 : vector<18xf32> to vector<18x1xf32>
    %175 = tpu.reciprocal %174 {approx = true} : vector<18x1xf32> -> vector<18x1xf32>
    %176 = vector.broadcast %175 : vector<18x1xf32> to vector<18x2xf32>
    %177 = arith.mulf %172, %176 : vector<18x2xf32>
    %178 = arith.truncf %177 : vector<18x2xf32> to vector<18x2xbf16>
    %179 = arith.truncf %164 : vector<2x32xf32> to vector<2x32xbf16>
    %cst_68 = arith.constant dense<0.000000e+00> : vector<18x32xf32>
    %180 = tpu.matmul %178, %179, %cst_68 {dimension_numbers = #tpu.dot_dimension_numbers<[1], [0], [0], [1], [0, 0, 1, 1], [], []>} : vector<18x2xbf16>, vector<2x32xbf16>, vector<18x32xf32> -> vector<18x32xf32>
    %181 = arith.addf %160, %180 : vector<18x32xf32>
    %c3 = arith.constant 3 : index
    %c0_69 = arith.constant 0 : index
    %c0_70 = arith.constant 0 : index
    %182 = vector.load %arg8[%c3, %c0_69, %c0_70] : memref<16x32x32xbf16, #tpu.memory_space<vmem>>, vector<1x32x32xbf16>
    %183 = vector.shape_cast %182 : vector<1x32x32xbf16> to vector<32x32xbf16>
    %184 = arith.truncf %181 : vector<18x32xf32> to vector<18x32xbf16>
    %cst_71 = arith.constant dense<0.000000e+00> : vector<18x32xf32>
    %185 = tpu.matmul %184, %183, %cst_71 {dimension_numbers = #tpu.dot_dimension_numbers<[1], [0], [0], [1], [0, 0, 1, 1], [], []>} : vector<18x32xbf16>, vector<32x32xbf16>, vector<18x32xf32> -> vector<18x32xf32>
    %c3_72 = arith.constant 3 : index
    %c0_73 = arith.constant 0 : index
    %c0_74 = arith.constant 0 : index
    %186 = vector.load %arg9[%c3_72, %c0_73, %c0_74] : memref<16x1x32xf32, #tpu.memory_space<vmem>>, vector<1x1x32xf32>
    %187 = vector.shape_cast %186 : vector<1x1x32xf32> to vector<1x32xf32>
    %188 = vector.broadcast %187 : vector<1x32xf32> to vector<18x32xf32>
    %189 = arith.addf %185, %188 : vector<18x32xf32>
    %c0_75 = arith.constant 0 : index
    %c0_76 = arith.constant 0 : index
    %c0_77 = arith.constant 0 : index
    %190 = vector.load %arg10[%c0_75, %c0_76, %c0_77] : memref<16x1x32xf32, #tpu.memory_space<vmem>>, vector<1x1x32xf32>
    %191 = vector.shape_cast %190 : vector<1x1x32xf32> to vector<1x32xf32>
    %c1_78 = arith.constant 1 : index
    %c0_79 = arith.constant 0 : index
    %c0_80 = arith.constant 0 : index
    %192 = vector.load %arg10[%c1_78, %c0_79, %c0_80] : memref<16x1x32xf32, #tpu.memory_space<vmem>>, vector<1x1x32xf32>
    %193 = vector.shape_cast %192 : vector<1x1x32xf32> to vector<1x32xf32>
    %194 = arith.addf %74, %189 : vector<18x32xf32>
    %cst_81 = arith.constant dense<0.000000e+00> : vector<18xf32>
    %195 = vector.multi_reduction <add>, %194, %cst_81 [1] : vector<18x32xf32> to vector<18xf32>
    %196 = vector.shape_cast %195 : vector<18xf32> to vector<18x1xf32>
    %cst_82 = arith.constant 3.200000e+01 : f32
    %197 = vector.broadcast %cst_82 : f32 to vector<18x1xf32>
    %198 = arith.divf %196, %197 : vector<18x1xf32>
    %199 = vector.broadcast %198 : vector<18x1xf32> to vector<18x32xf32>
    %200 = arith.subf %194, %199 : vector<18x32xf32>
    %201 = arith.mulf %200, %200 : vector<18x32xf32>
    %cst_83 = arith.constant dense<0.000000e+00> : vector<18xf32>
    %202 = vector.multi_reduction <add>, %201, %cst_83 [1] : vector<18x32xf32> to vector<18xf32>
    %203 = vector.shape_cast %202 : vector<18xf32> to vector<18x1xf32>
    %cst_84 = arith.constant 3.200000e+01 : f32
    %204 = vector.broadcast %cst_84 : f32 to vector<18x1xf32>
    %205 = arith.divf %203, %204 : vector<18x1xf32>
    %206 = vector.broadcast %198 : vector<18x1xf32> to vector<18x32xf32>
    %207 = arith.subf %194, %206 : vector<18x32xf32>
    %cst_85 = arith.constant 9.99999974E-6 : f32
    %208 = vector.broadcast %cst_85 : f32 to vector<18x1xf32>
    %209 = arith.addf %205, %208 : vector<18x1xf32>
    %210 = math.rsqrt %209 : vector<18x1xf32>
    %211 = vector.broadcast %210 : vector<18x1xf32> to vector<18x32xf32>
    %212 = arith.mulf %207, %211 : vector<18x32xf32>
    %213 = vector.broadcast %191 : vector<1x32xf32> to vector<18x32xf32>
    %214 = arith.mulf %212, %213 : vector<18x32xf32>
    %215 = vector.broadcast %193 : vector<1x32xf32> to vector<18x32xf32>
    %216 = arith.addf %214, %215 : vector<18x32xf32>
    %c0_86 = arith.constant 0 : index
    %c0_87 = arith.constant 0 : index
    %c0_88 = arith.constant 0 : index
    %217 = vector.load %arg11[%c0_86, %c0_87, %c0_88] : memref<4x32x128xbf16, #tpu.memory_space<vmem>>, vector<1x32x128xbf16>
    %218 = vector.shape_cast %217 : vector<1x32x128xbf16> to vector<32x128xbf16>
    %c0_89 = arith.constant 0 : index
    %c0_90 = arith.constant 0 : index
    %c0_91 = arith.constant 0 : index
    %219 = vector.load %arg12[%c0_89, %c0_90, %c0_91] : memref<4x1x128xf32, #tpu.memory_space<vmem>>, vector<1x1x128xf32>
    %220 = vector.shape_cast %219 : vector<1x1x128xf32> to vector<1x128xf32>
    %c0_92 = arith.constant 0 : index
    %c0_93 = arith.constant 0 : index
    %c0_94 = arith.constant 0 : index
    %221 = vector.load %arg13[%c0_92, %c0_93, %c0_94] : memref<4x128x32xbf16, #tpu.memory_space<vmem>>, vector<1x128x32xbf16>
    %222 = vector.shape_cast %221 : vector<1x128x32xbf16> to vector<128x32xbf16>
    %c0_95 = arith.constant 0 : index
    %c0_96 = arith.constant 0 : index
    %c0_97 = arith.constant 0 : index
    %223 = vector.load %arg14[%c0_95, %c0_96, %c0_97] : memref<4x1x32xf32, #tpu.memory_space<vmem>>, vector<1x1x32xf32>
    %224 = vector.shape_cast %223 : vector<1x1x32xf32> to vector<1x32xf32>
    %225 = arith.truncf %216 : vector<18x32xf32> to vector<18x32xbf16>
    %cst_98 = arith.constant dense<0.000000e+00> : vector<18x128xf32>
    %226 = tpu.matmul %225, %218, %cst_98 {dimension_numbers = #tpu.dot_dimension_numbers<[1], [0], [0], [1], [0, 0, 1, 1], [], []>} : vector<18x32xbf16>, vector<32x128xbf16>, vector<18x128xf32> -> vector<18x128xf32>
    %227 = vector.broadcast %220 : vector<1x128xf32> to vector<18x128xf32>
    %228 = arith.addf %226, %227 : vector<18x128xf32>
    %cst_99 = arith.constant 0.000000e+00 : f32
    %229 = vector.broadcast %cst_99 : f32 to vector<18x128xf32>
    %230 = arith.maximumf %228, %229 : vector<18x128xf32>
    %231 = arith.truncf %230 : vector<18x128xf32> to vector<18x128xbf16>
    %cst_100 = arith.constant dense<0.000000e+00> : vector<18x32xf32>
    %232 = tpu.matmul %231, %222, %cst_100 {dimension_numbers = #tpu.dot_dimension_numbers<[1], [0], [0], [1], [0, 0, 1, 1], [], []>} : vector<18x128xbf16>, vector<128x32xbf16>, vector<18x32xf32> -> vector<18x32xf32>
    %233 = vector.broadcast %224 : vector<1x32xf32> to vector<18x32xf32>
    %234 = arith.addf %232, %233 : vector<18x32xf32>
    %235 = arith.addf %234, %1 : vector<18x32xf32>
    %c2_101 = arith.constant 2 : index
    %c0_102 = arith.constant 0 : index
    %c0_103 = arith.constant 0 : index
    %236 = vector.load %arg10[%c2_101, %c0_102, %c0_103] : memref<16x1x32xf32, #tpu.memory_space<vmem>>, vector<1x1x32xf32>
    %237 = vector.shape_cast %236 : vector<1x1x32xf32> to vector<1x32xf32>
    %c3_104 = arith.constant 3 : index
    %c0_105 = arith.constant 0 : index
    %c0_106 = arith.constant 0 : index
    %238 = vector.load %arg10[%c3_104, %c0_105, %c0_106] : memref<16x1x32xf32, #tpu.memory_space<vmem>>, vector<1x1x32xf32>
    %239 = vector.shape_cast %238 : vector<1x1x32xf32> to vector<1x32xf32>
    %240 = arith.addf %216, %235 : vector<18x32xf32>
    %cst_107 = arith.constant dense<0.000000e+00> : vector<18xf32>
    %241 = vector.multi_reduction <add>, %240, %cst_107 [1] : vector<18x32xf32> to vector<18xf32>
    %242 = vector.shape_cast %241 : vector<18xf32> to vector<18x1xf32>
    %cst_108 = arith.constant 3.200000e+01 : f32
    %243 = vector.broadcast %cst_108 : f32 to vector<18x1xf32>
    %244 = arith.divf %242, %243 : vector<18x1xf32>
    %245 = vector.broadcast %244 : vector<18x1xf32> to vector<18x32xf32>
    %246 = arith.subf %240, %245 : vector<18x32xf32>
    %247 = arith.mulf %246, %246 : vector<18x32xf32>
    %cst_109 = arith.constant dense<0.000000e+00> : vector<18xf32>
    %248 = vector.multi_reduction <add>, %247, %cst_109 [1] : vector<18x32xf32> to vector<18xf32>
    %249 = vector.shape_cast %248 : vector<18xf32> to vector<18x1xf32>
    %cst_110 = arith.constant 3.200000e+01 : f32
    %250 = vector.broadcast %cst_110 : f32 to vector<18x1xf32>
    %251 = arith.divf %249, %250 : vector<18x1xf32>
    %252 = vector.broadcast %244 : vector<18x1xf32> to vector<18x32xf32>
    %253 = arith.subf %240, %252 : vector<18x32xf32>
    %cst_111 = arith.constant 9.99999974E-6 : f32
    %254 = vector.broadcast %cst_111 : f32 to vector<18x1xf32>
    %255 = arith.addf %251, %254 : vector<18x1xf32>
    %256 = math.rsqrt %255 : vector<18x1xf32>
    %257 = vector.broadcast %256 : vector<18x1xf32> to vector<18x32xf32>
    %258 = arith.mulf %253, %257 : vector<18x32xf32>
    %259 = vector.broadcast %237 : vector<1x32xf32> to vector<18x32xf32>
    %260 = arith.mulf %258, %259 : vector<18x32xf32>
    %261 = vector.broadcast %239 : vector<1x32xf32> to vector<18x32xf32>
    %262 = arith.addf %260, %261 : vector<18x32xf32>
    %c4 = arith.constant 4 : index
    %c0_112 = arith.constant 0 : index
    %c0_113 = arith.constant 0 : index
    %263 = vector.load %arg8[%c4, %c0_112, %c0_113] : memref<16x32x32xbf16, #tpu.memory_space<vmem>>, vector<1x32x32xbf16>
    %264 = vector.shape_cast %263 : vector<1x32x32xbf16> to vector<32x32xbf16>
    %265 = arith.truncf %3 : vector<2x32xf32> to vector<2x32xbf16>
    %cst_114 = arith.constant dense<0.000000e+00> : vector<2x32xf32>
    %266 = tpu.matmul %265, %264, %cst_114 {dimension_numbers = #tpu.dot_dimension_numbers<[1], [0], [0], [1], [0, 0, 1, 1], [], []>} : vector<2x32xbf16>, vector<32x32xbf16>, vector<2x32xf32> -> vector<2x32xf32>
    %c4_115 = arith.constant 4 : index
    %c0_116 = arith.constant 0 : index
    %c0_117 = arith.constant 0 : index
    %267 = vector.load %arg9[%c4_115, %c0_116, %c0_117] : memref<16x1x32xf32, #tpu.memory_space<vmem>>, vector<1x1x32xf32>
    %268 = vector.shape_cast %267 : vector<1x1x32xf32> to vector<1x32xf32>
    %269 = vector.broadcast %268 : vector<1x32xf32> to vector<2x32xf32>
    %270 = arith.addf %266, %269 : vector<2x32xf32>
    %c5 = arith.constant 5 : index
    %c0_118 = arith.constant 0 : index
    %c0_119 = arith.constant 0 : index
    %271 = vector.load %arg8[%c5, %c0_118, %c0_119] : memref<16x32x32xbf16, #tpu.memory_space<vmem>>, vector<1x32x32xbf16>
    %272 = vector.shape_cast %271 : vector<1x32x32xbf16> to vector<32x32xbf16>
    %273 = arith.truncf %262 : vector<18x32xf32> to vector<18x32xbf16>
    %cst_120 = arith.constant dense<0.000000e+00> : vector<18x32xf32>
    %274 = tpu.matmul %273, %272, %cst_120 {dimension_numbers = #tpu.dot_dimension_numbers<[1], [0], [0], [1], [0, 0, 1, 1], [], []>} : vector<18x32xbf16>, vector<32x32xbf16>, vector<18x32xf32> -> vector<18x32xf32>
    %c5_121 = arith.constant 5 : index
    %c0_122 = arith.constant 0 : index
    %c0_123 = arith.constant 0 : index
    %275 = vector.load %arg9[%c5_121, %c0_122, %c0_123] : memref<16x1x32xf32, #tpu.memory_space<vmem>>, vector<1x1x32xf32>
    %276 = vector.shape_cast %275 : vector<1x1x32xf32> to vector<1x32xf32>
    %277 = vector.broadcast %276 : vector<1x32xf32> to vector<18x32xf32>
    %278 = arith.addf %274, %277 : vector<18x32xf32>
    %c6 = arith.constant 6 : index
    %c0_124 = arith.constant 0 : index
    %c0_125 = arith.constant 0 : index
    %279 = vector.load %arg8[%c6, %c0_124, %c0_125] : memref<16x32x32xbf16, #tpu.memory_space<vmem>>, vector<1x32x32xbf16>
    %280 = vector.shape_cast %279 : vector<1x32x32xbf16> to vector<32x32xbf16>
    %281 = arith.truncf %262 : vector<18x32xf32> to vector<18x32xbf16>
    %cst_126 = arith.constant dense<0.000000e+00> : vector<18x32xf32>
    %282 = tpu.matmul %281, %280, %cst_126 {dimension_numbers = #tpu.dot_dimension_numbers<[1], [0], [0], [1], [0, 0, 1, 1], [], []>} : vector<18x32xbf16>, vector<32x32xbf16>, vector<18x32xf32> -> vector<18x32xf32>
    %c6_127 = arith.constant 6 : index
    %c0_128 = arith.constant 0 : index
    %c0_129 = arith.constant 0 : index
    %283 = vector.load %arg9[%c6_127, %c0_128, %c0_129] : memref<16x1x32xf32, #tpu.memory_space<vmem>>, vector<1x1x32xf32>
    %284 = vector.shape_cast %283 : vector<1x1x32xf32> to vector<1x32xf32>
    %285 = vector.broadcast %284 : vector<1x32xf32> to vector<18x32xf32>
    %286 = arith.addf %282, %285 : vector<18x32xf32>
    %287 = vector.broadcast %17 : vector<1x32xf32> to vector<18x32xf32>
    %288 = arith.mulf %278, %287 : vector<18x32xf32>
    %289 = vector.broadcast %17 : vector<1x32xf32> to vector<18x32xf32>
    %290 = arith.mulf %286, %289 : vector<18x32xf32>
    %291 = arith.truncf %270 : vector<2x32xf32> to vector<2x32xbf16>
    %292 = arith.truncf %288 : vector<18x32xf32> to vector<18x32xbf16>
    %cst_130 = arith.constant dense<0.000000e+00> : vector<2x18xf32>
    %293 = tpu.matmul %291, %292, %cst_130 {dimension_numbers = #tpu.dot_dimension_numbers<[1], [1], [0], [0], [0, 0, 1, 0], [], []>} : vector<2x32xbf16>, vector<18x32xbf16>, vector<2x18xf32> -> vector<2x18xf32>
    %294 = arith.addf %293, %9 : vector<2x18xf32>
    %cst_131 = arith.constant dense<0xFF800000> : vector<2xf32>
    %295 = vector.multi_reduction <maximumf>, %294, %cst_131 [1] : vector<2x18xf32> to vector<2xf32>
    %296 = vector.shape_cast %295 : vector<2xf32> to vector<2x1xf32>
    %297 = vector.broadcast %296 : vector<2x1xf32> to vector<2x18xf32>
    %298 = arith.subf %294, %297 : vector<2x18xf32>
    %299 = math.exp %298 : vector<2x18xf32>
    %cst_132 = arith.constant dense<0.000000e+00> : vector<2xf32>
    %300 = vector.multi_reduction <add>, %299, %cst_132 [1] : vector<2x18xf32> to vector<2xf32>
    %301 = vector.shape_cast %300 : vector<2xf32> to vector<2x1xf32>
    %302 = tpu.reciprocal %301 {approx = true} : vector<2x1xf32> -> vector<2x1xf32>
    %303 = vector.broadcast %302 : vector<2x1xf32> to vector<2x18xf32>
    %304 = arith.mulf %299, %303 : vector<2x18xf32>
    %305 = arith.truncf %304 : vector<2x18xf32> to vector<2x18xbf16>
    %306 = arith.truncf %290 : vector<18x32xf32> to vector<18x32xbf16>
    %cst_133 = arith.constant dense<0.000000e+00> : vector<2x32xf32>
    %307 = tpu.matmul %305, %306, %cst_133 {dimension_numbers = #tpu.dot_dimension_numbers<[1], [0], [0], [1], [0, 0, 1, 1], [], []>} : vector<2x18xbf16>, vector<18x32xbf16>, vector<2x32xf32> -> vector<2x32xf32>
    %308 = vector.broadcast %24 : vector<1x32xf32> to vector<18x32xf32>
    %309 = arith.mulf %278, %308 : vector<18x32xf32>
    %310 = vector.broadcast %24 : vector<1x32xf32> to vector<18x32xf32>
    %311 = arith.mulf %286, %310 : vector<18x32xf32>
    %312 = arith.truncf %270 : vector<2x32xf32> to vector<2x32xbf16>
    %313 = arith.truncf %309 : vector<18x32xf32> to vector<18x32xbf16>
    %cst_134 = arith.constant dense<0.000000e+00> : vector<2x18xf32>
    %314 = tpu.matmul %312, %313, %cst_134 {dimension_numbers = #tpu.dot_dimension_numbers<[1], [1], [0], [0], [0, 0, 1, 0], [], []>} : vector<2x32xbf16>, vector<18x32xbf16>, vector<2x18xf32> -> vector<2x18xf32>
    %315 = arith.addf %314, %9 : vector<2x18xf32>
    %cst_135 = arith.constant dense<0xFF800000> : vector<2xf32>
    %316 = vector.multi_reduction <maximumf>, %315, %cst_135 [1] : vector<2x18xf32> to vector<2xf32>
    %317 = vector.shape_cast %316 : vector<2xf32> to vector<2x1xf32>
    %318 = vector.broadcast %317 : vector<2x1xf32> to vector<2x18xf32>
    %319 = arith.subf %315, %318 : vector<2x18xf32>
    %320 = math.exp %319 : vector<2x18xf32>
    %cst_136 = arith.constant dense<0.000000e+00> : vector<2xf32>
    %321 = vector.multi_reduction <add>, %320, %cst_136 [1] : vector<2x18xf32> to vector<2xf32>
    %322 = vector.shape_cast %321 : vector<2xf32> to vector<2x1xf32>
    %323 = tpu.reciprocal %322 {approx = true} : vector<2x1xf32> -> vector<2x1xf32>
    %324 = vector.broadcast %323 : vector<2x1xf32> to vector<2x18xf32>
    %325 = arith.mulf %320, %324 : vector<2x18xf32>
    %326 = arith.truncf %325 : vector<2x18xf32> to vector<2x18xbf16>
    %327 = arith.truncf %311 : vector<18x32xf32> to vector<18x32xbf16>
    %cst_137 = arith.constant dense<0.000000e+00> : vector<2x32xf32>
    %328 = tpu.matmul %326, %327, %cst_137 {dimension_numbers = #tpu.dot_dimension_numbers<[1], [0], [0], [1], [0, 0, 1, 1], [], []>} : vector<2x18xbf16>, vector<18x32xbf16>, vector<2x32xf32> -> vector<2x32xf32>
    %329 = arith.addf %307, %328 : vector<2x32xf32>
    %330 = vector.broadcast %31 : vector<1x32xf32> to vector<18x32xf32>
    %331 = arith.mulf %278, %330 : vector<18x32xf32>
    %332 = vector.broadcast %31 : vector<1x32xf32> to vector<18x32xf32>
    %333 = arith.mulf %286, %332 : vector<18x32xf32>
    %334 = arith.truncf %270 : vector<2x32xf32> to vector<2x32xbf16>
    %335 = arith.truncf %331 : vector<18x32xf32> to vector<18x32xbf16>
    %cst_138 = arith.constant dense<0.000000e+00> : vector<2x18xf32>
    %336 = tpu.matmul %334, %335, %cst_138 {dimension_numbers = #tpu.dot_dimension_numbers<[1], [1], [0], [0], [0, 0, 1, 0], [], []>} : vector<2x32xbf16>, vector<18x32xbf16>, vector<2x18xf32> -> vector<2x18xf32>
    %337 = arith.addf %336, %9 : vector<2x18xf32>
    %cst_139 = arith.constant dense<0xFF800000> : vector<2xf32>
    %338 = vector.multi_reduction <maximumf>, %337, %cst_139 [1] : vector<2x18xf32> to vector<2xf32>
    %339 = vector.shape_cast %338 : vector<2xf32> to vector<2x1xf32>
    %340 = vector.broadcast %339 : vector<2x1xf32> to vector<2x18xf32>
    %341 = arith.subf %337, %340 : vector<2x18xf32>
    %342 = math.exp %341 : vector<2x18xf32>
    %cst_140 = arith.constant dense<0.000000e+00> : vector<2xf32>
    %343 = vector.multi_reduction <add>, %342, %cst_140 [1] : vector<2x18xf32> to vector<2xf32>
    %344 = vector.shape_cast %343 : vector<2xf32> to vector<2x1xf32>
    %345 = tpu.reciprocal %344 {approx = true} : vector<2x1xf32> -> vector<2x1xf32>
    %346 = vector.broadcast %345 : vector<2x1xf32> to vector<2x18xf32>
    %347 = arith.mulf %342, %346 : vector<2x18xf32>
    %348 = arith.truncf %347 : vector<2x18xf32> to vector<2x18xbf16>
    %349 = arith.truncf %333 : vector<18x32xf32> to vector<18x32xbf16>
    %cst_141 = arith.constant dense<0.000000e+00> : vector<2x32xf32>
    %350 = tpu.matmul %348, %349, %cst_141 {dimension_numbers = #tpu.dot_dimension_numbers<[1], [0], [0], [1], [0, 0, 1, 1], [], []>} : vector<2x18xbf16>, vector<18x32xbf16>, vector<2x32xf32> -> vector<2x32xf32>
    %351 = arith.addf %329, %350 : vector<2x32xf32>
    %352 = vector.broadcast %38 : vector<1x32xf32> to vector<18x32xf32>
    %353 = arith.mulf %278, %352 : vector<18x32xf32>
    %354 = vector.broadcast %38 : vector<1x32xf32> to vector<18x32xf32>
    %355 = arith.mulf %286, %354 : vector<18x32xf32>
    %356 = arith.truncf %270 : vector<2x32xf32> to vector<2x32xbf16>
    %357 = arith.truncf %353 : vector<18x32xf32> to vector<18x32xbf16>
    %cst_142 = arith.constant dense<0.000000e+00> : vector<2x18xf32>
    %358 = tpu.matmul %356, %357, %cst_142 {dimension_numbers = #tpu.dot_dimension_numbers<[1], [1], [0], [0], [0, 0, 1, 0], [], []>} : vector<2x32xbf16>, vector<18x32xbf16>, vector<2x18xf32> -> vector<2x18xf32>
    %359 = arith.addf %358, %9 : vector<2x18xf32>
    %cst_143 = arith.constant dense<0xFF800000> : vector<2xf32>
    %360 = vector.multi_reduction <maximumf>, %359, %cst_143 [1] : vector<2x18xf32> to vector<2xf32>
    %361 = vector.shape_cast %360 : vector<2xf32> to vector<2x1xf32>
    %362 = vector.broadcast %361 : vector<2x1xf32> to vector<2x18xf32>
    %363 = arith.subf %359, %362 : vector<2x18xf32>
    %364 = math.exp %363 : vector<2x18xf32>
    %cst_144 = arith.constant dense<0.000000e+00> : vector<2xf32>
    %365 = vector.multi_reduction <add>, %364, %cst_144 [1] : vector<2x18xf32> to vector<2xf32>
    %366 = vector.shape_cast %365 : vector<2xf32> to vector<2x1xf32>
    %367 = tpu.reciprocal %366 {approx = true} : vector<2x1xf32> -> vector<2x1xf32>
    %368 = vector.broadcast %367 : vector<2x1xf32> to vector<2x18xf32>
    %369 = arith.mulf %364, %368 : vector<2x18xf32>
    %370 = arith.truncf %369 : vector<2x18xf32> to vector<2x18xbf16>
    %371 = arith.truncf %355 : vector<18x32xf32> to vector<18x32xbf16>
    %cst_145 = arith.constant dense<0.000000e+00> : vector<2x32xf32>
    %372 = tpu.matmul %370, %371, %cst_145 {dimension_numbers = #tpu.dot_dimension_numbers<[1], [0], [0], [1], [0, 0, 1, 1], [], []>} : vector<2x18xbf16>, vector<18x32xbf16>, vector<2x32xf32> -> vector<2x32xf32>
    %373 = arith.addf %351, %372 : vector<2x32xf32>
    %c7 = arith.constant 7 : index
    %c0_146 = arith.constant 0 : index
    %c0_147 = arith.constant 0 : index
    %374 = vector.load %arg8[%c7, %c0_146, %c0_147] : memref<16x32x32xbf16, #tpu.memory_space<vmem>>, vector<1x32x32xbf16>
    %375 = vector.shape_cast %374 : vector<1x32x32xbf16> to vector<32x32xbf16>
    %376 = arith.truncf %373 : vector<2x32xf32> to vector<2x32xbf16>
    %cst_148 = arith.constant dense<0.000000e+00> : vector<2x32xf32>
    %377 = tpu.matmul %376, %375, %cst_148 {dimension_numbers = #tpu.dot_dimension_numbers<[1], [0], [0], [1], [0, 0, 1, 1], [], []>} : vector<2x32xbf16>, vector<32x32xbf16>, vector<2x32xf32> -> vector<2x32xf32>
    %c7_149 = arith.constant 7 : index
    %c0_150 = arith.constant 0 : index
    %c0_151 = arith.constant 0 : index
    %378 = vector.load %arg9[%c7_149, %c0_150, %c0_151] : memref<16x1x32xf32, #tpu.memory_space<vmem>>, vector<1x1x32xf32>
    %379 = vector.shape_cast %378 : vector<1x1x32xf32> to vector<1x32xf32>
    %380 = vector.broadcast %379 : vector<1x32xf32> to vector<2x32xf32>
    %381 = arith.addf %377, %380 : vector<2x32xf32>
    %c4_152 = arith.constant 4 : index
    %c0_153 = arith.constant 0 : index
    %c0_154 = arith.constant 0 : index
    %382 = vector.load %arg10[%c4_152, %c0_153, %c0_154] : memref<16x1x32xf32, #tpu.memory_space<vmem>>, vector<1x1x32xf32>
    %383 = vector.shape_cast %382 : vector<1x1x32xf32> to vector<1x32xf32>
    %c5_155 = arith.constant 5 : index
    %c0_156 = arith.constant 0 : index
    %c0_157 = arith.constant 0 : index
    %384 = vector.load %arg10[%c5_155, %c0_156, %c0_157] : memref<16x1x32xf32, #tpu.memory_space<vmem>>, vector<1x1x32xf32>
    %385 = vector.shape_cast %384 : vector<1x1x32xf32> to vector<1x32xf32>
    %386 = arith.addf %3, %381 : vector<2x32xf32>
    %cst_158 = arith.constant dense<0.000000e+00> : vector<2xf32>
    %387 = vector.multi_reduction <add>, %386, %cst_158 [1] : vector<2x32xf32> to vector<2xf32>
    %388 = vector.shape_cast %387 : vector<2xf32> to vector<2x1xf32>
    %cst_159 = arith.constant 3.200000e+01 : f32
    %389 = vector.broadcast %cst_159 : f32 to vector<2x1xf32>
    %390 = arith.divf %388, %389 : vector<2x1xf32>
    %391 = vector.broadcast %390 : vector<2x1xf32> to vector<2x32xf32>
    %392 = arith.subf %386, %391 : vector<2x32xf32>
    %393 = arith.mulf %392, %392 : vector<2x32xf32>
    %cst_160 = arith.constant dense<0.000000e+00> : vector<2xf32>
    %394 = vector.multi_reduction <add>, %393, %cst_160 [1] : vector<2x32xf32> to vector<2xf32>
    %395 = vector.shape_cast %394 : vector<2xf32> to vector<2x1xf32>
    %cst_161 = arith.constant 3.200000e+01 : f32
    %396 = vector.broadcast %cst_161 : f32 to vector<2x1xf32>
    %397 = arith.divf %395, %396 : vector<2x1xf32>
    %398 = vector.broadcast %390 : vector<2x1xf32> to vector<2x32xf32>
    %399 = arith.subf %386, %398 : vector<2x32xf32>
    %cst_162 = arith.constant 9.99999974E-6 : f32
    %400 = vector.broadcast %cst_162 : f32 to vector<2x1xf32>
    %401 = arith.addf %397, %400 : vector<2x1xf32>
    %402 = math.rsqrt %401 : vector<2x1xf32>
    %403 = vector.broadcast %402 : vector<2x1xf32> to vector<2x32xf32>
    %404 = arith.mulf %399, %403 : vector<2x32xf32>
    %405 = vector.broadcast %383 : vector<1x32xf32> to vector<2x32xf32>
    %406 = arith.mulf %404, %405 : vector<2x32xf32>
    %407 = vector.broadcast %385 : vector<1x32xf32> to vector<2x32xf32>
    %408 = arith.addf %406, %407 : vector<2x32xf32>
    %c1_163 = arith.constant 1 : index
    %c0_164 = arith.constant 0 : index
    %c0_165 = arith.constant 0 : index
    %409 = vector.load %arg11[%c1_163, %c0_164, %c0_165] : memref<4x32x128xbf16, #tpu.memory_space<vmem>>, vector<1x32x128xbf16>
    %410 = vector.shape_cast %409 : vector<1x32x128xbf16> to vector<32x128xbf16>
    %c1_166 = arith.constant 1 : index
    %c0_167 = arith.constant 0 : index
    %c0_168 = arith.constant 0 : index
    %411 = vector.load %arg12[%c1_166, %c0_167, %c0_168] : memref<4x1x128xf32, #tpu.memory_space<vmem>>, vector<1x1x128xf32>
    %412 = vector.shape_cast %411 : vector<1x1x128xf32> to vector<1x128xf32>
    %c1_169 = arith.constant 1 : index
    %c0_170 = arith.constant 0 : index
    %c0_171 = arith.constant 0 : index
    %413 = vector.load %arg13[%c1_169, %c0_170, %c0_171] : memref<4x128x32xbf16, #tpu.memory_space<vmem>>, vector<1x128x32xbf16>
    %414 = vector.shape_cast %413 : vector<1x128x32xbf16> to vector<128x32xbf16>
    %c1_172 = arith.constant 1 : index
    %c0_173 = arith.constant 0 : index
    %c0_174 = arith.constant 0 : index
    %415 = vector.load %arg14[%c1_172, %c0_173, %c0_174] : memref<4x1x32xf32, #tpu.memory_space<vmem>>, vector<1x1x32xf32>
    %416 = vector.shape_cast %415 : vector<1x1x32xf32> to vector<1x32xf32>
    %417 = arith.truncf %408 : vector<2x32xf32> to vector<2x32xbf16>
    %cst_175 = arith.constant dense<0.000000e+00> : vector<2x128xf32>
    %418 = tpu.matmul %417, %410, %cst_175 {dimension_numbers = #tpu.dot_dimension_numbers<[1], [0], [0], [1], [0, 0, 1, 1], [], []>} : vector<2x32xbf16>, vector<32x128xbf16>, vector<2x128xf32> -> vector<2x128xf32>
    %419 = vector.broadcast %412 : vector<1x128xf32> to vector<2x128xf32>
    %420 = arith.addf %418, %419 : vector<2x128xf32>
    %cst_176 = arith.constant 0.000000e+00 : f32
    %421 = vector.broadcast %cst_176 : f32 to vector<2x128xf32>
    %422 = arith.maximumf %420, %421 : vector<2x128xf32>
    %423 = arith.truncf %422 : vector<2x128xf32> to vector<2x128xbf16>
    %cst_177 = arith.constant dense<0.000000e+00> : vector<2x32xf32>
    %424 = tpu.matmul %423, %414, %cst_177 {dimension_numbers = #tpu.dot_dimension_numbers<[1], [0], [0], [1], [0, 0, 1, 1], [], []>} : vector<2x128xbf16>, vector<128x32xbf16>, vector<2x32xf32> -> vector<2x32xf32>
    %425 = vector.broadcast %416 : vector<1x32xf32> to vector<2x32xf32>
    %426 = arith.addf %424, %425 : vector<2x32xf32>
    %c6_178 = arith.constant 6 : index
    %c0_179 = arith.constant 0 : index
    %c0_180 = arith.constant 0 : index
    %427 = vector.load %arg10[%c6_178, %c0_179, %c0_180] : memref<16x1x32xf32, #tpu.memory_space<vmem>>, vector<1x1x32xf32>
    %428 = vector.shape_cast %427 : vector<1x1x32xf32> to vector<1x32xf32>
    %c7_181 = arith.constant 7 : index
    %c0_182 = arith.constant 0 : index
    %c0_183 = arith.constant 0 : index
    %429 = vector.load %arg10[%c7_181, %c0_182, %c0_183] : memref<16x1x32xf32, #tpu.memory_space<vmem>>, vector<1x1x32xf32>
    %430 = vector.shape_cast %429 : vector<1x1x32xf32> to vector<1x32xf32>
    %431 = arith.addf %408, %426 : vector<2x32xf32>
    %cst_184 = arith.constant dense<0.000000e+00> : vector<2xf32>
    %432 = vector.multi_reduction <add>, %431, %cst_184 [1] : vector<2x32xf32> to vector<2xf32>
    %433 = vector.shape_cast %432 : vector<2xf32> to vector<2x1xf32>
    %cst_185 = arith.constant 3.200000e+01 : f32
    %434 = vector.broadcast %cst_185 : f32 to vector<2x1xf32>
    %435 = arith.divf %433, %434 : vector<2x1xf32>
    %436 = vector.broadcast %435 : vector<2x1xf32> to vector<2x32xf32>
    %437 = arith.subf %431, %436 : vector<2x32xf32>
    %438 = arith.mulf %437, %437 : vector<2x32xf32>
    %cst_186 = arith.constant dense<0.000000e+00> : vector<2xf32>
    %439 = vector.multi_reduction <add>, %438, %cst_186 [1] : vector<2x32xf32> to vector<2xf32>
    %440 = vector.shape_cast %439 : vector<2xf32> to vector<2x1xf32>
    %cst_187 = arith.constant 3.200000e+01 : f32
    %441 = vector.broadcast %cst_187 : f32 to vector<2x1xf32>
    %442 = arith.divf %440, %441 : vector<2x1xf32>
    %443 = vector.broadcast %435 : vector<2x1xf32> to vector<2x32xf32>
    %444 = arith.subf %431, %443 : vector<2x32xf32>
    %cst_188 = arith.constant 9.99999974E-6 : f32
    %445 = vector.broadcast %cst_188 : f32 to vector<2x1xf32>
    %446 = arith.addf %442, %445 : vector<2x1xf32>
    %447 = math.rsqrt %446 : vector<2x1xf32>
    %448 = vector.broadcast %447 : vector<2x1xf32> to vector<2x32xf32>
    %449 = arith.mulf %444, %448 : vector<2x32xf32>
    %450 = vector.broadcast %428 : vector<1x32xf32> to vector<2x32xf32>
    %451 = arith.mulf %449, %450 : vector<2x32xf32>
    %452 = vector.broadcast %430 : vector<1x32xf32> to vector<2x32xf32>
    %453 = arith.addf %451, %452 : vector<2x32xf32>
    %454 = arith.addf %453, %5 : vector<2x32xf32>
    %c8 = arith.constant 8 : index
    %c0_189 = arith.constant 0 : index
    %c0_190 = arith.constant 0 : index
    %455 = vector.load %arg8[%c8, %c0_189, %c0_190] : memref<16x32x32xbf16, #tpu.memory_space<vmem>>, vector<1x32x32xbf16>
    %456 = vector.shape_cast %455 : vector<1x32x32xbf16> to vector<32x32xbf16>
    %457 = arith.truncf %262 : vector<18x32xf32> to vector<18x32xbf16>
    %cst_191 = arith.constant dense<0.000000e+00> : vector<18x32xf32>
    %458 = tpu.matmul %457, %456, %cst_191 {dimension_numbers = #tpu.dot_dimension_numbers<[1], [0], [0], [1], [0, 0, 1, 1], [], []>} : vector<18x32xbf16>, vector<32x32xbf16>, vector<18x32xf32> -> vector<18x32xf32>
    %c8_192 = arith.constant 8 : index
    %c0_193 = arith.constant 0 : index
    %c0_194 = arith.constant 0 : index
    %459 = vector.load %arg9[%c8_192, %c0_193, %c0_194] : memref<16x1x32xf32, #tpu.memory_space<vmem>>, vector<1x1x32xf32>
    %460 = vector.shape_cast %459 : vector<1x1x32xf32> to vector<1x32xf32>
    %461 = vector.broadcast %460 : vector<1x32xf32> to vector<18x32xf32>
    %462 = arith.addf %458, %461 : vector<18x32xf32>
    %c9 = arith.constant 9 : index
    %c0_195 = arith.constant 0 : index
    %c0_196 = arith.constant 0 : index
    %463 = vector.load %arg8[%c9, %c0_195, %c0_196] : memref<16x32x32xbf16, #tpu.memory_space<vmem>>, vector<1x32x32xbf16>
    %464 = vector.shape_cast %463 : vector<1x32x32xbf16> to vector<32x32xbf16>
    %465 = arith.truncf %454 : vector<2x32xf32> to vector<2x32xbf16>
    %cst_197 = arith.constant dense<0.000000e+00> : vector<2x32xf32>
    %466 = tpu.matmul %465, %464, %cst_197 {dimension_numbers = #tpu.dot_dimension_numbers<[1], [0], [0], [1], [0, 0, 1, 1], [], []>} : vector<2x32xbf16>, vector<32x32xbf16>, vector<2x32xf32> -> vector<2x32xf32>
    %c9_198 = arith.constant 9 : index
    %c0_199 = arith.constant 0 : index
    %c0_200 = arith.constant 0 : index
    %467 = vector.load %arg9[%c9_198, %c0_199, %c0_200] : memref<16x1x32xf32, #tpu.memory_space<vmem>>, vector<1x1x32xf32>
    %468 = vector.shape_cast %467 : vector<1x1x32xf32> to vector<1x32xf32>
    %469 = vector.broadcast %468 : vector<1x32xf32> to vector<2x32xf32>
    %470 = arith.addf %466, %469 : vector<2x32xf32>
    %c10 = arith.constant 10 : index
    %c0_201 = arith.constant 0 : index
    %c0_202 = arith.constant 0 : index
    %471 = vector.load %arg8[%c10, %c0_201, %c0_202] : memref<16x32x32xbf16, #tpu.memory_space<vmem>>, vector<1x32x32xbf16>
    %472 = vector.shape_cast %471 : vector<1x32x32xbf16> to vector<32x32xbf16>
    %473 = arith.truncf %454 : vector<2x32xf32> to vector<2x32xbf16>
    %cst_203 = arith.constant dense<0.000000e+00> : vector<2x32xf32>
    %474 = tpu.matmul %473, %472, %cst_203 {dimension_numbers = #tpu.dot_dimension_numbers<[1], [0], [0], [1], [0, 0, 1, 1], [], []>} : vector<2x32xbf16>, vector<32x32xbf16>, vector<2x32xf32> -> vector<2x32xf32>
    %c10_204 = arith.constant 10 : index
    %c0_205 = arith.constant 0 : index
    %c0_206 = arith.constant 0 : index
    %475 = vector.load %arg9[%c10_204, %c0_205, %c0_206] : memref<16x1x32xf32, #tpu.memory_space<vmem>>, vector<1x1x32xf32>
    %476 = vector.shape_cast %475 : vector<1x1x32xf32> to vector<1x32xf32>
    %477 = vector.broadcast %476 : vector<1x32xf32> to vector<2x32xf32>
    %478 = arith.addf %474, %477 : vector<2x32xf32>
    %479 = vector.broadcast %17 : vector<1x32xf32> to vector<2x32xf32>
    %480 = arith.mulf %470, %479 : vector<2x32xf32>
    %481 = vector.broadcast %17 : vector<1x32xf32> to vector<2x32xf32>
    %482 = arith.mulf %478, %481 : vector<2x32xf32>
    %483 = arith.truncf %462 : vector<18x32xf32> to vector<18x32xbf16>
    %484 = arith.truncf %480 : vector<2x32xf32> to vector<2x32xbf16>
    %cst_207 = arith.constant dense<0.000000e+00> : vector<18x2xf32>
    %485 = tpu.matmul %483, %484, %cst_207 {dimension_numbers = #tpu.dot_dimension_numbers<[1], [1], [0], [0], [0, 0, 1, 0], [], []>} : vector<18x32xbf16>, vector<2x32xbf16>, vector<18x2xf32> -> vector<18x2xf32>
    %cst_208 = arith.constant dense<0xFF800000> : vector<18xf32>
    %486 = vector.multi_reduction <maximumf>, %485, %cst_208 [1] : vector<18x2xf32> to vector<18xf32>
    %487 = vector.shape_cast %486 : vector<18xf32> to vector<18x1xf32>
    %488 = vector.broadcast %487 : vector<18x1xf32> to vector<18x2xf32>
    %489 = arith.subf %485, %488 : vector<18x2xf32>
    %490 = math.exp %489 : vector<18x2xf32>
    %cst_209 = arith.constant dense<0.000000e+00> : vector<18xf32>
    %491 = vector.multi_reduction <add>, %490, %cst_209 [1] : vector<18x2xf32> to vector<18xf32>
    %492 = vector.shape_cast %491 : vector<18xf32> to vector<18x1xf32>
    %493 = tpu.reciprocal %492 {approx = true} : vector<18x1xf32> -> vector<18x1xf32>
    %494 = vector.broadcast %493 : vector<18x1xf32> to vector<18x2xf32>
    %495 = arith.mulf %490, %494 : vector<18x2xf32>
    %496 = arith.truncf %495 : vector<18x2xf32> to vector<18x2xbf16>
    %497 = arith.truncf %482 : vector<2x32xf32> to vector<2x32xbf16>
    %cst_210 = arith.constant dense<0.000000e+00> : vector<18x32xf32>
    %498 = tpu.matmul %496, %497, %cst_210 {dimension_numbers = #tpu.dot_dimension_numbers<[1], [0], [0], [1], [0, 0, 1, 1], [], []>} : vector<18x2xbf16>, vector<2x32xbf16>, vector<18x32xf32> -> vector<18x32xf32>
    %499 = vector.broadcast %24 : vector<1x32xf32> to vector<2x32xf32>
    %500 = arith.mulf %470, %499 : vector<2x32xf32>
    %501 = vector.broadcast %24 : vector<1x32xf32> to vector<2x32xf32>
    %502 = arith.mulf %478, %501 : vector<2x32xf32>
    %503 = arith.truncf %462 : vector<18x32xf32> to vector<18x32xbf16>
    %504 = arith.truncf %500 : vector<2x32xf32> to vector<2x32xbf16>
    %cst_211 = arith.constant dense<0.000000e+00> : vector<18x2xf32>
    %505 = tpu.matmul %503, %504, %cst_211 {dimension_numbers = #tpu.dot_dimension_numbers<[1], [1], [0], [0], [0, 0, 1, 0], [], []>} : vector<18x32xbf16>, vector<2x32xbf16>, vector<18x2xf32> -> vector<18x2xf32>
    %cst_212 = arith.constant dense<0xFF800000> : vector<18xf32>
    %506 = vector.multi_reduction <maximumf>, %505, %cst_212 [1] : vector<18x2xf32> to vector<18xf32>
    %507 = vector.shape_cast %506 : vector<18xf32> to vector<18x1xf32>
    %508 = vector.broadcast %507 : vector<18x1xf32> to vector<18x2xf32>
    %509 = arith.subf %505, %508 : vector<18x2xf32>
    %510 = math.exp %509 : vector<18x2xf32>
    %cst_213 = arith.constant dense<0.000000e+00> : vector<18xf32>
    %511 = vector.multi_reduction <add>, %510, %cst_213 [1] : vector<18x2xf32> to vector<18xf32>
    %512 = vector.shape_cast %511 : vector<18xf32> to vector<18x1xf32>
    %513 = tpu.reciprocal %512 {approx = true} : vector<18x1xf32> -> vector<18x1xf32>
    %514 = vector.broadcast %513 : vector<18x1xf32> to vector<18x2xf32>
    %515 = arith.mulf %510, %514 : vector<18x2xf32>
    %516 = arith.truncf %515 : vector<18x2xf32> to vector<18x2xbf16>
    %517 = arith.truncf %502 : vector<2x32xf32> to vector<2x32xbf16>
    %cst_214 = arith.constant dense<0.000000e+00> : vector<18x32xf32>
    %518 = tpu.matmul %516, %517, %cst_214 {dimension_numbers = #tpu.dot_dimension_numbers<[1], [0], [0], [1], [0, 0, 1, 1], [], []>} : vector<18x2xbf16>, vector<2x32xbf16>, vector<18x32xf32> -> vector<18x32xf32>
    %519 = arith.addf %498, %518 : vector<18x32xf32>
    %520 = vector.broadcast %31 : vector<1x32xf32> to vector<2x32xf32>
    %521 = arith.mulf %470, %520 : vector<2x32xf32>
    %522 = vector.broadcast %31 : vector<1x32xf32> to vector<2x32xf32>
    %523 = arith.mulf %478, %522 : vector<2x32xf32>
    %524 = arith.truncf %462 : vector<18x32xf32> to vector<18x32xbf16>
    %525 = arith.truncf %521 : vector<2x32xf32> to vector<2x32xbf16>
    %cst_215 = arith.constant dense<0.000000e+00> : vector<18x2xf32>
    %526 = tpu.matmul %524, %525, %cst_215 {dimension_numbers = #tpu.dot_dimension_numbers<[1], [1], [0], [0], [0, 0, 1, 0], [], []>} : vector<18x32xbf16>, vector<2x32xbf16>, vector<18x2xf32> -> vector<18x2xf32>
    %cst_216 = arith.constant dense<0xFF800000> : vector<18xf32>
    %527 = vector.multi_reduction <maximumf>, %526, %cst_216 [1] : vector<18x2xf32> to vector<18xf32>
    %528 = vector.shape_cast %527 : vector<18xf32> to vector<18x1xf32>
    %529 = vector.broadcast %528 : vector<18x1xf32> to vector<18x2xf32>
    %530 = arith.subf %526, %529 : vector<18x2xf32>
    %531 = math.exp %530 : vector<18x2xf32>
    %cst_217 = arith.constant dense<0.000000e+00> : vector<18xf32>
    %532 = vector.multi_reduction <add>, %531, %cst_217 [1] : vector<18x2xf32> to vector<18xf32>
    %533 = vector.shape_cast %532 : vector<18xf32> to vector<18x1xf32>
    %534 = tpu.reciprocal %533 {approx = true} : vector<18x1xf32> -> vector<18x1xf32>
    %535 = vector.broadcast %534 : vector<18x1xf32> to vector<18x2xf32>
    %536 = arith.mulf %531, %535 : vector<18x2xf32>
    %537 = arith.truncf %536 : vector<18x2xf32> to vector<18x2xbf16>
    %538 = arith.truncf %523 : vector<2x32xf32> to vector<2x32xbf16>
    %cst_218 = arith.constant dense<0.000000e+00> : vector<18x32xf32>
    %539 = tpu.matmul %537, %538, %cst_218 {dimension_numbers = #tpu.dot_dimension_numbers<[1], [0], [0], [1], [0, 0, 1, 1], [], []>} : vector<18x2xbf16>, vector<2x32xbf16>, vector<18x32xf32> -> vector<18x32xf32>
    %540 = arith.addf %519, %539 : vector<18x32xf32>
    %541 = vector.broadcast %38 : vector<1x32xf32> to vector<2x32xf32>
    %542 = arith.mulf %470, %541 : vector<2x32xf32>
    %543 = vector.broadcast %38 : vector<1x32xf32> to vector<2x32xf32>
    %544 = arith.mulf %478, %543 : vector<2x32xf32>
    %545 = arith.truncf %462 : vector<18x32xf32> to vector<18x32xbf16>
    %546 = arith.truncf %542 : vector<2x32xf32> to vector<2x32xbf16>
    %cst_219 = arith.constant dense<0.000000e+00> : vector<18x2xf32>
    %547 = tpu.matmul %545, %546, %cst_219 {dimension_numbers = #tpu.dot_dimension_numbers<[1], [1], [0], [0], [0, 0, 1, 0], [], []>} : vector<18x32xbf16>, vector<2x32xbf16>, vector<18x2xf32> -> vector<18x2xf32>
    %cst_220 = arith.constant dense<0xFF800000> : vector<18xf32>
    %548 = vector.multi_reduction <maximumf>, %547, %cst_220 [1] : vector<18x2xf32> to vector<18xf32>
    %549 = vector.shape_cast %548 : vector<18xf32> to vector<18x1xf32>
    %550 = vector.broadcast %549 : vector<18x1xf32> to vector<18x2xf32>
    %551 = arith.subf %547, %550 : vector<18x2xf32>
    %552 = math.exp %551 : vector<18x2xf32>
    %cst_221 = arith.constant dense<0.000000e+00> : vector<18xf32>
    %553 = vector.multi_reduction <add>, %552, %cst_221 [1] : vector<18x2xf32> to vector<18xf32>
    %554 = vector.shape_cast %553 : vector<18xf32> to vector<18x1xf32>
    %555 = tpu.reciprocal %554 {approx = true} : vector<18x1xf32> -> vector<18x1xf32>
    %556 = vector.broadcast %555 : vector<18x1xf32> to vector<18x2xf32>
    %557 = arith.mulf %552, %556 : vector<18x2xf32>
    %558 = arith.truncf %557 : vector<18x2xf32> to vector<18x2xbf16>
    %559 = arith.truncf %544 : vector<2x32xf32> to vector<2x32xbf16>
    %cst_222 = arith.constant dense<0.000000e+00> : vector<18x32xf32>
    %560 = tpu.matmul %558, %559, %cst_222 {dimension_numbers = #tpu.dot_dimension_numbers<[1], [0], [0], [1], [0, 0, 1, 1], [], []>} : vector<18x2xbf16>, vector<2x32xbf16>, vector<18x32xf32> -> vector<18x32xf32>
    %561 = arith.addf %540, %560 : vector<18x32xf32>
    %c11 = arith.constant 11 : index
    %c0_223 = arith.constant 0 : index
    %c0_224 = arith.constant 0 : index
    %562 = vector.load %arg8[%c11, %c0_223, %c0_224] : memref<16x32x32xbf16, #tpu.memory_space<vmem>>, vector<1x32x32xbf16>
    %563 = vector.shape_cast %562 : vector<1x32x32xbf16> to vector<32x32xbf16>
    %564 = arith.truncf %561 : vector<18x32xf32> to vector<18x32xbf16>
    %cst_225 = arith.constant dense<0.000000e+00> : vector<18x32xf32>
    %565 = tpu.matmul %564, %563, %cst_225 {dimension_numbers = #tpu.dot_dimension_numbers<[1], [0], [0], [1], [0, 0, 1, 1], [], []>} : vector<18x32xbf16>, vector<32x32xbf16>, vector<18x32xf32> -> vector<18x32xf32>
    %c11_226 = arith.constant 11 : index
    %c0_227 = arith.constant 0 : index
    %c0_228 = arith.constant 0 : index
    %566 = vector.load %arg9[%c11_226, %c0_227, %c0_228] : memref<16x1x32xf32, #tpu.memory_space<vmem>>, vector<1x1x32xf32>
    %567 = vector.shape_cast %566 : vector<1x1x32xf32> to vector<1x32xf32>
    %568 = vector.broadcast %567 : vector<1x32xf32> to vector<18x32xf32>
    %569 = arith.addf %565, %568 : vector<18x32xf32>
    %c8_229 = arith.constant 8 : index
    %c0_230 = arith.constant 0 : index
    %c0_231 = arith.constant 0 : index
    %570 = vector.load %arg10[%c8_229, %c0_230, %c0_231] : memref<16x1x32xf32, #tpu.memory_space<vmem>>, vector<1x1x32xf32>
    %571 = vector.shape_cast %570 : vector<1x1x32xf32> to vector<1x32xf32>
    %c9_232 = arith.constant 9 : index
    %c0_233 = arith.constant 0 : index
    %c0_234 = arith.constant 0 : index
    %572 = vector.load %arg10[%c9_232, %c0_233, %c0_234] : memref<16x1x32xf32, #tpu.memory_space<vmem>>, vector<1x1x32xf32>
    %573 = vector.shape_cast %572 : vector<1x1x32xf32> to vector<1x32xf32>
    %574 = arith.addf %262, %569 : vector<18x32xf32>
    %cst_235 = arith.constant dense<0.000000e+00> : vector<18xf32>
    %575 = vector.multi_reduction <add>, %574, %cst_235 [1] : vector<18x32xf32> to vector<18xf32>
    %576 = vector.shape_cast %575 : vector<18xf32> to vector<18x1xf32>
    %cst_236 = arith.constant 3.200000e+01 : f32
    %577 = vector.broadcast %cst_236 : f32 to vector<18x1xf32>
    %578 = arith.divf %576, %577 : vector<18x1xf32>
    %579 = vector.broadcast %578 : vector<18x1xf32> to vector<18x32xf32>
    %580 = arith.subf %574, %579 : vector<18x32xf32>
    %581 = arith.mulf %580, %580 : vector<18x32xf32>
    %cst_237 = arith.constant dense<0.000000e+00> : vector<18xf32>
    %582 = vector.multi_reduction <add>, %581, %cst_237 [1] : vector<18x32xf32> to vector<18xf32>
    %583 = vector.shape_cast %582 : vector<18xf32> to vector<18x1xf32>
    %cst_238 = arith.constant 3.200000e+01 : f32
    %584 = vector.broadcast %cst_238 : f32 to vector<18x1xf32>
    %585 = arith.divf %583, %584 : vector<18x1xf32>
    %586 = vector.broadcast %578 : vector<18x1xf32> to vector<18x32xf32>
    %587 = arith.subf %574, %586 : vector<18x32xf32>
    %cst_239 = arith.constant 9.99999974E-6 : f32
    %588 = vector.broadcast %cst_239 : f32 to vector<18x1xf32>
    %589 = arith.addf %585, %588 : vector<18x1xf32>
    %590 = math.rsqrt %589 : vector<18x1xf32>
    %591 = vector.broadcast %590 : vector<18x1xf32> to vector<18x32xf32>
    %592 = arith.mulf %587, %591 : vector<18x32xf32>
    %593 = vector.broadcast %571 : vector<1x32xf32> to vector<18x32xf32>
    %594 = arith.mulf %592, %593 : vector<18x32xf32>
    %595 = vector.broadcast %573 : vector<1x32xf32> to vector<18x32xf32>
    %596 = arith.addf %594, %595 : vector<18x32xf32>
    %c2_240 = arith.constant 2 : index
    %c0_241 = arith.constant 0 : index
    %c0_242 = arith.constant 0 : index
    %597 = vector.load %arg11[%c2_240, %c0_241, %c0_242] : memref<4x32x128xbf16, #tpu.memory_space<vmem>>, vector<1x32x128xbf16>
    %598 = vector.shape_cast %597 : vector<1x32x128xbf16> to vector<32x128xbf16>
    %c2_243 = arith.constant 2 : index
    %c0_244 = arith.constant 0 : index
    %c0_245 = arith.constant 0 : index
    %599 = vector.load %arg12[%c2_243, %c0_244, %c0_245] : memref<4x1x128xf32, #tpu.memory_space<vmem>>, vector<1x1x128xf32>
    %600 = vector.shape_cast %599 : vector<1x1x128xf32> to vector<1x128xf32>
    %c2_246 = arith.constant 2 : index
    %c0_247 = arith.constant 0 : index
    %c0_248 = arith.constant 0 : index
    %601 = vector.load %arg13[%c2_246, %c0_247, %c0_248] : memref<4x128x32xbf16, #tpu.memory_space<vmem>>, vector<1x128x32xbf16>
    %602 = vector.shape_cast %601 : vector<1x128x32xbf16> to vector<128x32xbf16>
    %c2_249 = arith.constant 2 : index
    %c0_250 = arith.constant 0 : index
    %c0_251 = arith.constant 0 : index
    %603 = vector.load %arg14[%c2_249, %c0_250, %c0_251] : memref<4x1x32xf32, #tpu.memory_space<vmem>>, vector<1x1x32xf32>
    %604 = vector.shape_cast %603 : vector<1x1x32xf32> to vector<1x32xf32>
    %605 = arith.truncf %596 : vector<18x32xf32> to vector<18x32xbf16>
    %cst_252 = arith.constant dense<0.000000e+00> : vector<18x128xf32>
    %606 = tpu.matmul %605, %598, %cst_252 {dimension_numbers = #tpu.dot_dimension_numbers<[1], [0], [0], [1], [0, 0, 1, 1], [], []>} : vector<18x32xbf16>, vector<32x128xbf16>, vector<18x128xf32> -> vector<18x128xf32>
    %607 = vector.broadcast %600 : vector<1x128xf32> to vector<18x128xf32>
    %608 = arith.addf %606, %607 : vector<18x128xf32>
    %cst_253 = arith.constant 0.000000e+00 : f32
    %609 = vector.broadcast %cst_253 : f32 to vector<18x128xf32>
    %610 = arith.maximumf %608, %609 : vector<18x128xf32>
    %611 = arith.truncf %610 : vector<18x128xf32> to vector<18x128xbf16>
    %cst_254 = arith.constant dense<0.000000e+00> : vector<18x32xf32>
    %612 = tpu.matmul %611, %602, %cst_254 {dimension_numbers = #tpu.dot_dimension_numbers<[1], [0], [0], [1], [0, 0, 1, 1], [], []>} : vector<18x128xbf16>, vector<128x32xbf16>, vector<18x32xf32> -> vector<18x32xf32>
    %613 = vector.broadcast %604 : vector<1x32xf32> to vector<18x32xf32>
    %614 = arith.addf %612, %613 : vector<18x32xf32>
    %c10_255 = arith.constant 10 : index
    %c0_256 = arith.constant 0 : index
    %c0_257 = arith.constant 0 : index
    %615 = vector.load %arg10[%c10_255, %c0_256, %c0_257] : memref<16x1x32xf32, #tpu.memory_space<vmem>>, vector<1x1x32xf32>
    %616 = vector.shape_cast %615 : vector<1x1x32xf32> to vector<1x32xf32>
    %c11_258 = arith.constant 11 : index
    %c0_259 = arith.constant 0 : index
    %c0_260 = arith.constant 0 : index
    %617 = vector.load %arg10[%c11_258, %c0_259, %c0_260] : memref<16x1x32xf32, #tpu.memory_space<vmem>>, vector<1x1x32xf32>
    %618 = vector.shape_cast %617 : vector<1x1x32xf32> to vector<1x32xf32>
    %619 = arith.addf %596, %614 : vector<18x32xf32>
    %cst_261 = arith.constant dense<0.000000e+00> : vector<18xf32>
    %620 = vector.multi_reduction <add>, %619, %cst_261 [1] : vector<18x32xf32> to vector<18xf32>
    %621 = vector.shape_cast %620 : vector<18xf32> to vector<18x1xf32>
    %cst_262 = arith.constant 3.200000e+01 : f32
    %622 = vector.broadcast %cst_262 : f32 to vector<18x1xf32>
    %623 = arith.divf %621, %622 : vector<18x1xf32>
    %624 = vector.broadcast %623 : vector<18x1xf32> to vector<18x32xf32>
    %625 = arith.subf %619, %624 : vector<18x32xf32>
    %626 = arith.mulf %625, %625 : vector<18x32xf32>
    %cst_263 = arith.constant dense<0.000000e+00> : vector<18xf32>
    %627 = vector.multi_reduction <add>, %626, %cst_263 [1] : vector<18x32xf32> to vector<18xf32>
    %628 = vector.shape_cast %627 : vector<18xf32> to vector<18x1xf32>
    %cst_264 = arith.constant 3.200000e+01 : f32
    %629 = vector.broadcast %cst_264 : f32 to vector<18x1xf32>
    %630 = arith.divf %628, %629 : vector<18x1xf32>
    %631 = vector.broadcast %623 : vector<18x1xf32> to vector<18x32xf32>
    %632 = arith.subf %619, %631 : vector<18x32xf32>
    %cst_265 = arith.constant 9.99999974E-6 : f32
    %633 = vector.broadcast %cst_265 : f32 to vector<18x1xf32>
    %634 = arith.addf %630, %633 : vector<18x1xf32>
    %635 = math.rsqrt %634 : vector<18x1xf32>
    %636 = vector.broadcast %635 : vector<18x1xf32> to vector<18x32xf32>
    %637 = arith.mulf %632, %636 : vector<18x32xf32>
    %638 = vector.broadcast %616 : vector<1x32xf32> to vector<18x32xf32>
    %639 = arith.mulf %637, %638 : vector<18x32xf32>
    %640 = vector.broadcast %618 : vector<1x32xf32> to vector<18x32xf32>
    %641 = arith.addf %639, %640 : vector<18x32xf32>
    %c12 = arith.constant 12 : index
    %c0_266 = arith.constant 0 : index
    %c0_267 = arith.constant 0 : index
    %642 = vector.load %arg8[%c12, %c0_266, %c0_267] : memref<16x32x32xbf16, #tpu.memory_space<vmem>>, vector<1x32x32xbf16>
    %643 = vector.shape_cast %642 : vector<1x32x32xbf16> to vector<32x32xbf16>
    %644 = arith.truncf %454 : vector<2x32xf32> to vector<2x32xbf16>
    %cst_268 = arith.constant dense<0.000000e+00> : vector<2x32xf32>
    %645 = tpu.matmul %644, %643, %cst_268 {dimension_numbers = #tpu.dot_dimension_numbers<[1], [0], [0], [1], [0, 0, 1, 1], [], []>} : vector<2x32xbf16>, vector<32x32xbf16>, vector<2x32xf32> -> vector<2x32xf32>
    %c12_269 = arith.constant 12 : index
    %c0_270 = arith.constant 0 : index
    %c0_271 = arith.constant 0 : index
    %646 = vector.load %arg9[%c12_269, %c0_270, %c0_271] : memref<16x1x32xf32, #tpu.memory_space<vmem>>, vector<1x1x32xf32>
    %647 = vector.shape_cast %646 : vector<1x1x32xf32> to vector<1x32xf32>
    %648 = vector.broadcast %647 : vector<1x32xf32> to vector<2x32xf32>
    %649 = arith.addf %645, %648 : vector<2x32xf32>
    %c13 = arith.constant 13 : index
    %c0_272 = arith.constant 0 : index
    %c0_273 = arith.constant 0 : index
    %650 = vector.load %arg8[%c13, %c0_272, %c0_273] : memref<16x32x32xbf16, #tpu.memory_space<vmem>>, vector<1x32x32xbf16>
    %651 = vector.shape_cast %650 : vector<1x32x32xbf16> to vector<32x32xbf16>
    %652 = arith.truncf %641 : vector<18x32xf32> to vector<18x32xbf16>
    %cst_274 = arith.constant dense<0.000000e+00> : vector<18x32xf32>
    %653 = tpu.matmul %652, %651, %cst_274 {dimension_numbers = #tpu.dot_dimension_numbers<[1], [0], [0], [1], [0, 0, 1, 1], [], []>} : vector<18x32xbf16>, vector<32x32xbf16>, vector<18x32xf32> -> vector<18x32xf32>
    %c13_275 = arith.constant 13 : index
    %c0_276 = arith.constant 0 : index
    %c0_277 = arith.constant 0 : index
    %654 = vector.load %arg9[%c13_275, %c0_276, %c0_277] : memref<16x1x32xf32, #tpu.memory_space<vmem>>, vector<1x1x32xf32>
    %655 = vector.shape_cast %654 : vector<1x1x32xf32> to vector<1x32xf32>
    %656 = vector.broadcast %655 : vector<1x32xf32> to vector<18x32xf32>
    %657 = arith.addf %653, %656 : vector<18x32xf32>
    %c14 = arith.constant 14 : index
    %c0_278 = arith.constant 0 : index
    %c0_279 = arith.constant 0 : index
    %658 = vector.load %arg8[%c14, %c0_278, %c0_279] : memref<16x32x32xbf16, #tpu.memory_space<vmem>>, vector<1x32x32xbf16>
    %659 = vector.shape_cast %658 : vector<1x32x32xbf16> to vector<32x32xbf16>
    %660 = arith.truncf %641 : vector<18x32xf32> to vector<18x32xbf16>
    %cst_280 = arith.constant dense<0.000000e+00> : vector<18x32xf32>
    %661 = tpu.matmul %660, %659, %cst_280 {dimension_numbers = #tpu.dot_dimension_numbers<[1], [0], [0], [1], [0, 0, 1, 1], [], []>} : vector<18x32xbf16>, vector<32x32xbf16>, vector<18x32xf32> -> vector<18x32xf32>
    %c14_281 = arith.constant 14 : index
    %c0_282 = arith.constant 0 : index
    %c0_283 = arith.constant 0 : index
    %662 = vector.load %arg9[%c14_281, %c0_282, %c0_283] : memref<16x1x32xf32, #tpu.memory_space<vmem>>, vector<1x1x32xf32>
    %663 = vector.shape_cast %662 : vector<1x1x32xf32> to vector<1x32xf32>
    %664 = vector.broadcast %663 : vector<1x32xf32> to vector<18x32xf32>
    %665 = arith.addf %661, %664 : vector<18x32xf32>
    %666 = vector.broadcast %17 : vector<1x32xf32> to vector<18x32xf32>
    %667 = arith.mulf %657, %666 : vector<18x32xf32>
    %668 = vector.broadcast %17 : vector<1x32xf32> to vector<18x32xf32>
    %669 = arith.mulf %665, %668 : vector<18x32xf32>
    %670 = arith.truncf %649 : vector<2x32xf32> to vector<2x32xbf16>
    %671 = arith.truncf %667 : vector<18x32xf32> to vector<18x32xbf16>
    %cst_284 = arith.constant dense<0.000000e+00> : vector<2x18xf32>
    %672 = tpu.matmul %670, %671, %cst_284 {dimension_numbers = #tpu.dot_dimension_numbers<[1], [1], [0], [0], [0, 0, 1, 0], [], []>} : vector<2x32xbf16>, vector<18x32xbf16>, vector<2x18xf32> -> vector<2x18xf32>
    %673 = arith.addf %672, %9 : vector<2x18xf32>
    %cst_285 = arith.constant dense<0xFF800000> : vector<2xf32>
    %674 = vector.multi_reduction <maximumf>, %673, %cst_285 [1] : vector<2x18xf32> to vector<2xf32>
    %675 = vector.shape_cast %674 : vector<2xf32> to vector<2x1xf32>
    %676 = vector.broadcast %675 : vector<2x1xf32> to vector<2x18xf32>
    %677 = arith.subf %673, %676 : vector<2x18xf32>
    %678 = math.exp %677 : vector<2x18xf32>
    %cst_286 = arith.constant dense<0.000000e+00> : vector<2xf32>
    %679 = vector.multi_reduction <add>, %678, %cst_286 [1] : vector<2x18xf32> to vector<2xf32>
    %680 = vector.shape_cast %679 : vector<2xf32> to vector<2x1xf32>
    %681 = tpu.reciprocal %680 {approx = true} : vector<2x1xf32> -> vector<2x1xf32>
    %682 = vector.broadcast %681 : vector<2x1xf32> to vector<2x18xf32>
    %683 = arith.mulf %678, %682 : vector<2x18xf32>
    %684 = arith.truncf %683 : vector<2x18xf32> to vector<2x18xbf16>
    %685 = arith.truncf %669 : vector<18x32xf32> to vector<18x32xbf16>
    %cst_287 = arith.constant dense<0.000000e+00> : vector<2x32xf32>
    %686 = tpu.matmul %684, %685, %cst_287 {dimension_numbers = #tpu.dot_dimension_numbers<[1], [0], [0], [1], [0, 0, 1, 1], [], []>} : vector<2x18xbf16>, vector<18x32xbf16>, vector<2x32xf32> -> vector<2x32xf32>
    %687 = vector.broadcast %24 : vector<1x32xf32> to vector<18x32xf32>
    %688 = arith.mulf %657, %687 : vector<18x32xf32>
    %689 = vector.broadcast %24 : vector<1x32xf32> to vector<18x32xf32>
    %690 = arith.mulf %665, %689 : vector<18x32xf32>
    %691 = arith.truncf %649 : vector<2x32xf32> to vector<2x32xbf16>
    %692 = arith.truncf %688 : vector<18x32xf32> to vector<18x32xbf16>
    %cst_288 = arith.constant dense<0.000000e+00> : vector<2x18xf32>
    %693 = tpu.matmul %691, %692, %cst_288 {dimension_numbers = #tpu.dot_dimension_numbers<[1], [1], [0], [0], [0, 0, 1, 0], [], []>} : vector<2x32xbf16>, vector<18x32xbf16>, vector<2x18xf32> -> vector<2x18xf32>
    %694 = arith.addf %693, %9 : vector<2x18xf32>
    %cst_289 = arith.constant dense<0xFF800000> : vector<2xf32>
    %695 = vector.multi_reduction <maximumf>, %694, %cst_289 [1] : vector<2x18xf32> to vector<2xf32>
    %696 = vector.shape_cast %695 : vector<2xf32> to vector<2x1xf32>
    %697 = vector.broadcast %696 : vector<2x1xf32> to vector<2x18xf32>
    %698 = arith.subf %694, %697 : vector<2x18xf32>
    %699 = math.exp %698 : vector<2x18xf32>
    %cst_290 = arith.constant dense<0.000000e+00> : vector<2xf32>
    %700 = vector.multi_reduction <add>, %699, %cst_290 [1] : vector<2x18xf32> to vector<2xf32>
    %701 = vector.shape_cast %700 : vector<2xf32> to vector<2x1xf32>
    %702 = tpu.reciprocal %701 {approx = true} : vector<2x1xf32> -> vector<2x1xf32>
    %703 = vector.broadcast %702 : vector<2x1xf32> to vector<2x18xf32>
    %704 = arith.mulf %699, %703 : vector<2x18xf32>
    %705 = arith.truncf %704 : vector<2x18xf32> to vector<2x18xbf16>
    %706 = arith.truncf %690 : vector<18x32xf32> to vector<18x32xbf16>
    %cst_291 = arith.constant dense<0.000000e+00> : vector<2x32xf32>
    %707 = tpu.matmul %705, %706, %cst_291 {dimension_numbers = #tpu.dot_dimension_numbers<[1], [0], [0], [1], [0, 0, 1, 1], [], []>} : vector<2x18xbf16>, vector<18x32xbf16>, vector<2x32xf32> -> vector<2x32xf32>
    %708 = arith.addf %686, %707 : vector<2x32xf32>
    %709 = vector.broadcast %31 : vector<1x32xf32> to vector<18x32xf32>
    %710 = arith.mulf %657, %709 : vector<18x32xf32>
    %711 = vector.broadcast %31 : vector<1x32xf32> to vector<18x32xf32>
    %712 = arith.mulf %665, %711 : vector<18x32xf32>
    %713 = arith.truncf %649 : vector<2x32xf32> to vector<2x32xbf16>
    %714 = arith.truncf %710 : vector<18x32xf32> to vector<18x32xbf16>
    %cst_292 = arith.constant dense<0.000000e+00> : vector<2x18xf32>
    %715 = tpu.matmul %713, %714, %cst_292 {dimension_numbers = #tpu.dot_dimension_numbers<[1], [1], [0], [0], [0, 0, 1, 0], [], []>} : vector<2x32xbf16>, vector<18x32xbf16>, vector<2x18xf32> -> vector<2x18xf32>
    %716 = arith.addf %715, %9 : vector<2x18xf32>
    %cst_293 = arith.constant dense<0xFF800000> : vector<2xf32>
    %717 = vector.multi_reduction <maximumf>, %716, %cst_293 [1] : vector<2x18xf32> to vector<2xf32>
    %718 = vector.shape_cast %717 : vector<2xf32> to vector<2x1xf32>
    %719 = vector.broadcast %718 : vector<2x1xf32> to vector<2x18xf32>
    %720 = arith.subf %716, %719 : vector<2x18xf32>
    %721 = math.exp %720 : vector<2x18xf32>
    %cst_294 = arith.constant dense<0.000000e+00> : vector<2xf32>
    %722 = vector.multi_reduction <add>, %721, %cst_294 [1] : vector<2x18xf32> to vector<2xf32>
    %723 = vector.shape_cast %722 : vector<2xf32> to vector<2x1xf32>
    %724 = tpu.reciprocal %723 {approx = true} : vector<2x1xf32> -> vector<2x1xf32>
    %725 = vector.broadcast %724 : vector<2x1xf32> to vector<2x18xf32>
    %726 = arith.mulf %721, %725 : vector<2x18xf32>
    %727 = arith.truncf %726 : vector<2x18xf32> to vector<2x18xbf16>
    %728 = arith.truncf %712 : vector<18x32xf32> to vector<18x32xbf16>
    %cst_295 = arith.constant dense<0.000000e+00> : vector<2x32xf32>
    %729 = tpu.matmul %727, %728, %cst_295 {dimension_numbers = #tpu.dot_dimension_numbers<[1], [0], [0], [1], [0, 0, 1, 1], [], []>} : vector<2x18xbf16>, vector<18x32xbf16>, vector<2x32xf32> -> vector<2x32xf32>
    %730 = arith.addf %708, %729 : vector<2x32xf32>
    %731 = vector.broadcast %38 : vector<1x32xf32> to vector<18x32xf32>
    %732 = arith.mulf %657, %731 : vector<18x32xf32>
    %733 = vector.broadcast %38 : vector<1x32xf32> to vector<18x32xf32>
    %734 = arith.mulf %665, %733 : vector<18x32xf32>
    %735 = arith.truncf %649 : vector<2x32xf32> to vector<2x32xbf16>
    %736 = arith.truncf %732 : vector<18x32xf32> to vector<18x32xbf16>
    %cst_296 = arith.constant dense<0.000000e+00> : vector<2x18xf32>
    %737 = tpu.matmul %735, %736, %cst_296 {dimension_numbers = #tpu.dot_dimension_numbers<[1], [1], [0], [0], [0, 0, 1, 0], [], []>} : vector<2x32xbf16>, vector<18x32xbf16>, vector<2x18xf32> -> vector<2x18xf32>
    %738 = arith.addf %737, %9 : vector<2x18xf32>
    %cst_297 = arith.constant dense<0xFF800000> : vector<2xf32>
    %739 = vector.multi_reduction <maximumf>, %738, %cst_297 [1] : vector<2x18xf32> to vector<2xf32>
    %740 = vector.shape_cast %739 : vector<2xf32> to vector<2x1xf32>
    %741 = vector.broadcast %740 : vector<2x1xf32> to vector<2x18xf32>
    %742 = arith.subf %738, %741 : vector<2x18xf32>
    %743 = math.exp %742 : vector<2x18xf32>
    %cst_298 = arith.constant dense<0.000000e+00> : vector<2xf32>
    %744 = vector.multi_reduction <add>, %743, %cst_298 [1] : vector<2x18xf32> to vector<2xf32>
    %745 = vector.shape_cast %744 : vector<2xf32> to vector<2x1xf32>
    %746 = tpu.reciprocal %745 {approx = true} : vector<2x1xf32> -> vector<2x1xf32>
    %747 = vector.broadcast %746 : vector<2x1xf32> to vector<2x18xf32>
    %748 = arith.mulf %743, %747 : vector<2x18xf32>
    %749 = arith.truncf %748 : vector<2x18xf32> to vector<2x18xbf16>
    %750 = arith.truncf %734 : vector<18x32xf32> to vector<18x32xbf16>
    %cst_299 = arith.constant dense<0.000000e+00> : vector<2x32xf32>
    %751 = tpu.matmul %749, %750, %cst_299 {dimension_numbers = #tpu.dot_dimension_numbers<[1], [0], [0], [1], [0, 0, 1, 1], [], []>} : vector<2x18xbf16>, vector<18x32xbf16>, vector<2x32xf32> -> vector<2x32xf32>
    %752 = arith.addf %730, %751 : vector<2x32xf32>
    %c15 = arith.constant 15 : index
    %c0_300 = arith.constant 0 : index
    %c0_301 = arith.constant 0 : index
    %753 = vector.load %arg8[%c15, %c0_300, %c0_301] : memref<16x32x32xbf16, #tpu.memory_space<vmem>>, vector<1x32x32xbf16>
    %754 = vector.shape_cast %753 : vector<1x32x32xbf16> to vector<32x32xbf16>
    %755 = arith.truncf %752 : vector<2x32xf32> to vector<2x32xbf16>
    %cst_302 = arith.constant dense<0.000000e+00> : vector<2x32xf32>
    %756 = tpu.matmul %755, %754, %cst_302 {dimension_numbers = #tpu.dot_dimension_numbers<[1], [0], [0], [1], [0, 0, 1, 1], [], []>} : vector<2x32xbf16>, vector<32x32xbf16>, vector<2x32xf32> -> vector<2x32xf32>
    %c15_303 = arith.constant 15 : index
    %c0_304 = arith.constant 0 : index
    %c0_305 = arith.constant 0 : index
    %757 = vector.load %arg9[%c15_303, %c0_304, %c0_305] : memref<16x1x32xf32, #tpu.memory_space<vmem>>, vector<1x1x32xf32>
    %758 = vector.shape_cast %757 : vector<1x1x32xf32> to vector<1x32xf32>
    %759 = vector.broadcast %758 : vector<1x32xf32> to vector<2x32xf32>
    %760 = arith.addf %756, %759 : vector<2x32xf32>
    %c12_306 = arith.constant 12 : index
    %c0_307 = arith.constant 0 : index
    %c0_308 = arith.constant 0 : index
    %761 = vector.load %arg10[%c12_306, %c0_307, %c0_308] : memref<16x1x32xf32, #tpu.memory_space<vmem>>, vector<1x1x32xf32>
    %762 = vector.shape_cast %761 : vector<1x1x32xf32> to vector<1x32xf32>
    %c13_309 = arith.constant 13 : index
    %c0_310 = arith.constant 0 : index
    %c0_311 = arith.constant 0 : index
    %763 = vector.load %arg10[%c13_309, %c0_310, %c0_311] : memref<16x1x32xf32, #tpu.memory_space<vmem>>, vector<1x1x32xf32>
    %764 = vector.shape_cast %763 : vector<1x1x32xf32> to vector<1x32xf32>
    %765 = arith.addf %454, %760 : vector<2x32xf32>
    %cst_312 = arith.constant dense<0.000000e+00> : vector<2xf32>
    %766 = vector.multi_reduction <add>, %765, %cst_312 [1] : vector<2x32xf32> to vector<2xf32>
    %767 = vector.shape_cast %766 : vector<2xf32> to vector<2x1xf32>
    %cst_313 = arith.constant 3.200000e+01 : f32
    %768 = vector.broadcast %cst_313 : f32 to vector<2x1xf32>
    %769 = arith.divf %767, %768 : vector<2x1xf32>
    %770 = vector.broadcast %769 : vector<2x1xf32> to vector<2x32xf32>
    %771 = arith.subf %765, %770 : vector<2x32xf32>
    %772 = arith.mulf %771, %771 : vector<2x32xf32>
    %cst_314 = arith.constant dense<0.000000e+00> : vector<2xf32>
    %773 = vector.multi_reduction <add>, %772, %cst_314 [1] : vector<2x32xf32> to vector<2xf32>
    %774 = vector.shape_cast %773 : vector<2xf32> to vector<2x1xf32>
    %cst_315 = arith.constant 3.200000e+01 : f32
    %775 = vector.broadcast %cst_315 : f32 to vector<2x1xf32>
    %776 = arith.divf %774, %775 : vector<2x1xf32>
    %777 = vector.broadcast %769 : vector<2x1xf32> to vector<2x32xf32>
    %778 = arith.subf %765, %777 : vector<2x32xf32>
    %cst_316 = arith.constant 9.99999974E-6 : f32
    %779 = vector.broadcast %cst_316 : f32 to vector<2x1xf32>
    %780 = arith.addf %776, %779 : vector<2x1xf32>
    %781 = math.rsqrt %780 : vector<2x1xf32>
    %782 = vector.broadcast %781 : vector<2x1xf32> to vector<2x32xf32>
    %783 = arith.mulf %778, %782 : vector<2x32xf32>
    %784 = vector.broadcast %762 : vector<1x32xf32> to vector<2x32xf32>
    %785 = arith.mulf %783, %784 : vector<2x32xf32>
    %786 = vector.broadcast %764 : vector<1x32xf32> to vector<2x32xf32>
    %787 = arith.addf %785, %786 : vector<2x32xf32>
    %c3_317 = arith.constant 3 : index
    %c0_318 = arith.constant 0 : index
    %c0_319 = arith.constant 0 : index
    %788 = vector.load %arg11[%c3_317, %c0_318, %c0_319] : memref<4x32x128xbf16, #tpu.memory_space<vmem>>, vector<1x32x128xbf16>
    %789 = vector.shape_cast %788 : vector<1x32x128xbf16> to vector<32x128xbf16>
    %c3_320 = arith.constant 3 : index
    %c0_321 = arith.constant 0 : index
    %c0_322 = arith.constant 0 : index
    %790 = vector.load %arg12[%c3_320, %c0_321, %c0_322] : memref<4x1x128xf32, #tpu.memory_space<vmem>>, vector<1x1x128xf32>
    %791 = vector.shape_cast %790 : vector<1x1x128xf32> to vector<1x128xf32>
    %c3_323 = arith.constant 3 : index
    %c0_324 = arith.constant 0 : index
    %c0_325 = arith.constant 0 : index
    %792 = vector.load %arg13[%c3_323, %c0_324, %c0_325] : memref<4x128x32xbf16, #tpu.memory_space<vmem>>, vector<1x128x32xbf16>
    %793 = vector.shape_cast %792 : vector<1x128x32xbf16> to vector<128x32xbf16>
    %c3_326 = arith.constant 3 : index
    %c0_327 = arith.constant 0 : index
    %c0_328 = arith.constant 0 : index
    %794 = vector.load %arg14[%c3_326, %c0_327, %c0_328] : memref<4x1x32xf32, #tpu.memory_space<vmem>>, vector<1x1x32xf32>
    %795 = vector.shape_cast %794 : vector<1x1x32xf32> to vector<1x32xf32>
    %796 = arith.truncf %787 : vector<2x32xf32> to vector<2x32xbf16>
    %cst_329 = arith.constant dense<0.000000e+00> : vector<2x128xf32>
    %797 = tpu.matmul %796, %789, %cst_329 {dimension_numbers = #tpu.dot_dimension_numbers<[1], [0], [0], [1], [0, 0, 1, 1], [], []>} : vector<2x32xbf16>, vector<32x128xbf16>, vector<2x128xf32> -> vector<2x128xf32>
    %798 = vector.broadcast %791 : vector<1x128xf32> to vector<2x128xf32>
    %799 = arith.addf %797, %798 : vector<2x128xf32>
    %cst_330 = arith.constant 0.000000e+00 : f32
    %800 = vector.broadcast %cst_330 : f32 to vector<2x128xf32>
    %801 = arith.maximumf %799, %800 : vector<2x128xf32>
    %802 = arith.truncf %801 : vector<2x128xf32> to vector<2x128xbf16>
    %cst_331 = arith.constant dense<0.000000e+00> : vector<2x32xf32>
    %803 = tpu.matmul %802, %793, %cst_331 {dimension_numbers = #tpu.dot_dimension_numbers<[1], [0], [0], [1], [0, 0, 1, 1], [], []>} : vector<2x128xbf16>, vector<128x32xbf16>, vector<2x32xf32> -> vector<2x32xf32>
    %804 = vector.broadcast %795 : vector<1x32xf32> to vector<2x32xf32>
    %805 = arith.addf %803, %804 : vector<2x32xf32>
    %c14_332 = arith.constant 14 : index
    %c0_333 = arith.constant 0 : index
    %c0_334 = arith.constant 0 : index
    %806 = vector.load %arg10[%c14_332, %c0_333, %c0_334] : memref<16x1x32xf32, #tpu.memory_space<vmem>>, vector<1x1x32xf32>
    %807 = vector.shape_cast %806 : vector<1x1x32xf32> to vector<1x32xf32>
    %c15_335 = arith.constant 15 : index
    %c0_336 = arith.constant 0 : index
    %c0_337 = arith.constant 0 : index
    %808 = vector.load %arg10[%c15_335, %c0_336, %c0_337] : memref<16x1x32xf32, #tpu.memory_space<vmem>>, vector<1x1x32xf32>
    %809 = vector.shape_cast %808 : vector<1x1x32xf32> to vector<1x32xf32>
    %810 = arith.addf %787, %805 : vector<2x32xf32>
    %cst_338 = arith.constant dense<0.000000e+00> : vector<2xf32>
    %811 = vector.multi_reduction <add>, %810, %cst_338 [1] : vector<2x32xf32> to vector<2xf32>
    %812 = vector.shape_cast %811 : vector<2xf32> to vector<2x1xf32>
    %cst_339 = arith.constant 3.200000e+01 : f32
    %813 = vector.broadcast %cst_339 : f32 to vector<2x1xf32>
    %814 = arith.divf %812, %813 : vector<2x1xf32>
    %815 = vector.broadcast %814 : vector<2x1xf32> to vector<2x32xf32>
    %816 = arith.subf %810, %815 : vector<2x32xf32>
    %817 = arith.mulf %816, %816 : vector<2x32xf32>
    %cst_340 = arith.constant dense<0.000000e+00> : vector<2xf32>
    %818 = vector.multi_reduction <add>, %817, %cst_340 [1] : vector<2x32xf32> to vector<2xf32>
    %819 = vector.shape_cast %818 : vector<2xf32> to vector<2x1xf32>
    %cst_341 = arith.constant 3.200000e+01 : f32
    %820 = vector.broadcast %cst_341 : f32 to vector<2x1xf32>
    %821 = arith.divf %819, %820 : vector<2x1xf32>
    %822 = vector.broadcast %814 : vector<2x1xf32> to vector<2x32xf32>
    %823 = arith.subf %810, %822 : vector<2x32xf32>
    %cst_342 = arith.constant 9.99999974E-6 : f32
    %824 = vector.broadcast %cst_342 : f32 to vector<2x1xf32>
    %825 = arith.addf %821, %824 : vector<2x1xf32>
    %826 = math.rsqrt %825 : vector<2x1xf32>
    %827 = vector.broadcast %826 : vector<2x1xf32> to vector<2x32xf32>
    %828 = arith.mulf %823, %827 : vector<2x32xf32>
    %829 = vector.broadcast %807 : vector<1x32xf32> to vector<2x32xf32>
    %830 = arith.mulf %828, %829 : vector<2x32xf32>
    %831 = vector.broadcast %809 : vector<1x32xf32> to vector<2x32xf32>
    %832 = arith.addf %830, %831 : vector<2x32xf32>
    %833 = arith.addf %832, %5 : vector<2x32xf32>
    %c0_343 = arith.constant 0 : index
    %c0_344 = arith.constant 0 : index
    %834 = vector.load %arg15[%c0_343, %c0_344] : memref<32x48xbf16, #tpu.memory_space<vmem>>, vector<32x48xbf16>
    %835 = arith.truncf %641 : vector<18x32xf32> to vector<18x32xbf16>
    %cst_345 = arith.constant dense<0.000000e+00> : vector<18x48xf32>
    %836 = tpu.matmul %835, %834, %cst_345 {dimension_numbers = #tpu.dot_dimension_numbers<[1], [0], [0], [1], [0, 0, 1, 1], [], []>} : vector<18x32xbf16>, vector<32x48xbf16>, vector<18x48xf32> -> vector<18x48xf32>
    %c0_346 = arith.constant 0 : index
    %c0_347 = arith.constant 0 : index
    %837 = vector.load %arg16[%c0_346, %c0_347] : memref<1x48xf32, #tpu.memory_space<vmem>>, vector<1x48xf32>
    %838 = vector.broadcast %837 : vector<1x48xf32> to vector<18x48xf32>
    %839 = arith.addf %836, %838 : vector<18x48xf32>
    %c0_348 = arith.constant 0 : index
    %c0_349 = arith.constant 0 : index
    %c0_350 = arith.constant 0 : index
    %840 = vector.load %arg17[%c0_348, %c0_349, %c0_350] : memref<1x18x48xf32, #tpu.memory_space<vmem>>, vector<1x18x48xf32>
    %841 = vector.shape_cast %840 : vector<1x18x48xf32> to vector<18x48xf32>
    %842 = vector.shape_cast %839 : vector<18x48xf32> to vector<1x18x48xf32>
    tpu.vector_store %arg17[%c0_348, %c0_349, %c0_350], %842 {strides = array<i32>} : memref<1x18x48xf32, #tpu.memory_space<vmem>>, vector<1x18x48xf32>,
    %c0_351 = arith.constant 0 : index
    %c0_352 = arith.constant 0 : index
    %c0_353 = arith.constant 0 : index
    %843 = vector.load %arg18[%c0_351, %c0_352, %c0_353] : memref<1x2x32xf32, #tpu.memory_space<vmem>>, vector<1x2x32xf32>
    %844 = vector.shape_cast %843 : vector<1x2x32xf32> to vector<2x32xf32>
    %845 = vector.shape_cast %833 : vector<2x32xf32> to vector<1x2x32xf32>
    tpu.vector_store %arg18[%c0_351, %c0_352, %c0_353], %845 {strides = array<i32>} : memref<1x2x32xf32, #tpu.memory_space<vmem>>, vector<1x2x32xf32>,
    return
  }
  func.func @transform_0(%arg0: i32) -> (i32, i32, i32) {
    %c0_i32 = arith.constant 0 : i32
    %c0_i32_0 = arith.constant 0 : i32
    %c0_i32_1 = arith.constant 0 : i32
    return %arg0, %c0_i32, %c0_i32_0 : i32, i32, i32
  }
  func.func @transform_1(%arg0: i32) -> (i32, i32, i32) {
    %c0_i32 = arith.constant 0 : i32
    %c0_i32_0 = arith.constant 0 : i32
    %c0_i32_1 = arith.constant 0 : i32
    return %arg0, %c0_i32, %c0_i32_0 : i32, i32, i32
  }
  func.func @transform_2(%arg0: i32) -> (i32, i32, i32) {
    %c0_i32 = arith.constant 0 : i32
    %c0_i32_0 = arith.constant 0 : i32
    %c0_i32_1 = arith.constant 0 : i32
    return %arg0, %c0_i32, %c0_i32_0 : i32, i32, i32
  }
  func.func @transform_3(%arg0: i32) -> (i32, i32, i32) {
    %c0_i32 = arith.constant 0 : i32
    %c0_i32_0 = arith.constant 0 : i32
    %c0_i32_1 = arith.constant 0 : i32
    return %arg0, %c0_i32, %c0_i32_0 : i32, i32, i32
  }
  func.func @transform_4(%arg0: i32) -> (i32, i32, i32) {
    %c0_i32 = arith.constant 0 : i32
    %c0_i32_0 = arith.constant 0 : i32
    %c0_i32_1 = arith.constant 0 : i32
    return %arg0, %c0_i32, %c0_i32_0 : i32, i32, i32
  }
  func.func @transform_5(%arg0: i32) -> (i32, i32) {
    %c0_i32 = arith.constant 0 : i32
    %c0_i32_0 = arith.constant 0 : i32
    %c0_i32_1 = arith.constant 0 : i32
    return %c0_i32, %c0_i32_0 : i32, i32
  }
  func.func @transform_6(%arg0: i32) -> (i32, i32, i32) {
    %c0_i32 = arith.constant 0 : i32
    %c0_i32_0 = arith.constant 0 : i32
    %c0_i32_1 = arith.constant 0 : i32
    %c0_i32_2 = arith.constant 0 : i32
    return %c0_i32, %c0_i32_0, %c0_i32_1 : i32, i32, i32
  }
  func.func @transform_7(%arg0: i32) -> (i32, i32, i32) {
    %c0_i32 = arith.constant 0 : i32
    %c0_i32_0 = arith.constant 0 : i32
    %c0_i32_1 = arith.constant 0 : i32
    %c0_i32_2 = arith.constant 0 : i32
    return %c0_i32, %c0_i32_0, %c0_i32_1 : i32, i32, i32
  }
  func.func @transform_8(%arg0: i32) -> (i32, i32, i32) {
    %c0_i32 = arith.constant 0 : i32
    %c0_i32_0 = arith.constant 0 : i32
    %c0_i32_1 = arith.constant 0 : i32
    %c0_i32_2 = arith.constant 0 : i32
    return %c0_i32, %c0_i32_0, %c0_i32_1 : i32, i32, i32
  }
  func.func @transform_9(%arg0: i32) -> (i32, i32, i32) {
    %c0_i32 = arith.constant 0 : i32
    %c0_i32_0 = arith.constant 0 : i32
    %c0_i32_1 = arith.constant 0 : i32
    %c0_i32_2 = arith.constant 0 : i32
    return %c0_i32, %c0_i32_0, %c0_i32_1 : i32, i32, i32
  }
  func.func @transform_10(%arg0: i32) -> (i32, i32, i32) {
    %c0_i32 = arith.constant 0 : i32
    %c0_i32_0 = arith.constant 0 : i32
    %c0_i32_1 = arith.constant 0 : i32
    %c0_i32_2 = arith.constant 0 : i32
    return %c0_i32, %c0_i32_0, %c0_i32_1 : i32, i32, i32
  }
  func.func @transform_11(%arg0: i32) -> (i32, i32, i32) {
    %c0_i32 = arith.constant 0 : i32
    %c0_i32_0 = arith.constant 0 : i32
    %c0_i32_1 = arith.constant 0 : i32
    %c0_i32_2 = arith.constant 0 : i32
    return %c0_i32, %c0_i32_0, %c0_i32_1 : i32, i32, i32
  }
  func.func @transform_12(%arg0: i32) -> (i32, i32, i32) {
    %c0_i32 = arith.constant 0 : i32
    %c0_i32_0 = arith.constant 0 : i32
    %c0_i32_1 = arith.constant 0 : i32
    %c0_i32_2 = arith.constant 0 : i32
    return %c0_i32, %c0_i32_0, %c0_i32_1 : i32, i32, i32
  }
  func.func @transform_13(%arg0: i32) -> (i32, i32, i32) {
    %c0_i32 = arith.constant 0 : i32
    %c0_i32_0 = arith.constant 0 : i32
    %c0_i32_1 = arith.constant 0 : i32
    %c0_i32_2 = arith.constant 0 : i32
    return %c0_i32, %c0_i32_0, %c0_i32_1 : i32, i32, i32
  }
  func.func @transform_14(%arg0: i32) -> (i32, i32) {
    %c0_i32 = arith.constant 0 : i32
    %c0_i32_0 = arith.constant 0 : i32
    %c0_i32_1 = arith.constant 0 : i32
    return %c0_i32, %c0_i32_0 : i32, i32
  }
  func.func @transform_15(%arg0: i32) -> (i32, i32) {
    %c0_i32 = arith.constant 0 : i32
    %c0_i32_0 = arith.constant 0 : i32
    %c0_i32_1 = arith.constant 0 : i32
    return %c0_i32, %c0_i32_0 : i32, i32
  }
  func.func @transform_16(%arg0: i32) -> (i32, i32, i32) {
    %c0_i32 = arith.constant 0 : i32
    %c0_i32_0 = arith.constant 0 : i32
    %c0_i32_1 = arith.constant 0 : i32
    return %arg0, %c0_i32, %c0_i32_0 : i32, i32, i32
  }
  func.func @transform_17(%arg0: i32) -> (i32, i32, i32) {
    %c0_i32 = arith.constant 0 : i32
    %c0_i32_0 = arith.constant 0 : i32
    %c0_i32_1 = arith.constant 0 : i32
    return %arg0, %c0_i32, %c0_i32_0 : i32, i32, i32
  }
}

</mosaic_0001>

<bundles_post_ra>
// kernel: tpu_custom_call.1
= control target key start
LH: loop header
LB: loop body
LE: loop exit
PB: predicated region body
PF: predicated region fallthrough
CT: control target
= control target key end

     0   :  { %6 = vsyncpa [#allocation3], 0  ;;  %s341_s0 = inlined_call_operand.hbm [shape: f32[8,128], index: 0, kind: input, shape index: {}]   ;;  %s342_s1 = inlined_call_operand.hbm [shape: f32[8,128], index: 1, kind: output, shape index: {}]  }
   0x1   :  { %7 = vsyncpa [#allocation4], 0  ;;  %s262_s6 = smov 0  }
   0x2 LB: > { %s145_s7 = sadd.s32 4294967295, %s248_s6   ;;  %p146_p0 = scmp.ge.s32.totalorder %s248_s6, 1  ;;  %s248_s6 = sphi %s262_s6, %s13_s6  }
   0x3   : > { %p60_p1 = scmp.lt.s32.totalorder %s248_s6, 3  ;;  %p276_p3 = scmp.eq.s32.totalorder %s145_s7, 0 }
   0x4   : > { %s250_s10 = smov [#allocation2]   ;;  %s180_s15 = scalar_lea.hbm %s341_s0, 128 }
   0x5   : > { %p270_p2 = pnand %p146_p0, %p60_p1  ;;  %s73_s11 = sshll.u32 %s250_s10, 4  ;;  %s74_s11 = int_to_ptr.vmem [resolvable:$true] %s73_s11 }
   0x6   : > { %s347_s9 = scalar_select %p276_p3, 1, 0 }
   0x7   : > { %s346_s8 = scalar_select %p270_p2, 1, 0 }
   0x8   : > { %p162_p4 = pneg %p270_p2  ;;  %p181_p6 = scmp.ne.s32.totalorder %s341_s0, %s180_s15 }
   0x9   : > { %p187_p10 = scmp.lt.u32.totalorder %s180_s15, %s341_s0 }
   0xa   : > { %p284_p5 = pnand %p276_p3, %p162_p4 }
   0xc   : > { %p182_p7 = pneg %p284_p5 }
   0xe   : > { %p183_p8 = pnand %p182_p7, %p181_p6 }
  0x10   : > { %p184_p9 = pneg %p183_p8 }
  0x12   : > { %p189_p11 = pnand %p187_p10, %p184_p9 }
  0x14   : > { %192 = shalt.err (!%p189_p11)
}
  0x15   : > { %s193_s20 = scalar_lea.vmem %s74_s11, 128  ;;  %p201_p1 = scmp.lt.s32.totalorder %s74_s11, %s74_s11 }
  0x16   : > { %p194_p12 = scmp.ne.s32.totalorder %s74_s11, %s193_s20  ;;  %p202_p4 = scmp.lt.s32.totalorder %s193_s20, %s193_s20 }
  0x18   : > { %p196_p13 = pnand %p194_p12, %p182_p7  ;;  %p203_p3 = por %p202_p4, %p201_p1 }
  0x1a   : > { %p197_p0 = pneg %p196_p13 }
  0x1c   : > { %p204_p2 = pnand %p203_p3, %p197_p0 }
  0x1e   : > { %207 = shalt.err (!%p204_p2)
}
  0x1f   : > { %165 = dma.hbm_to_vmem [thread:$0]  (!%p284_p5), %s341_s0, 128, %s74_s11, [#allocation3]  }
  0x20   : > { %p349_p6 = scmp.ne.s32.totalorder %s346_s8, 0 }
  0x21   : > { %p350_p8 = scmp.ne.s32.totalorder (!%p349_p6), %s347_s9, 0 }
  0x22   : > { %86 = sbr.rel (%p349_p6) target bundleno = 67 (0x43), region = 24 }
  0x29   : > { %239 = dma.done.wait (%p350_p8), [#allocation3], 128  }
  0x2a   : > { %241 = vsyncadd (%p350_p8), [#allocation3], 4294967168  ;;  %s251_s23 = smov [#allocation5]   ;;  %v96_v0 = vld [vmem:[#allocation2] sm:$0xff]  ;;  %p312_p2 = scmp.eq.s32.totalorder %s145_s7, 1 }
  0x2b   : > { %s106_s24 = sshll.u32 %s251_s23, 4  ;;  %v97_v1 = vadd.f32 1.0, %v96_v0  ;;  %s107_s24 = int_to_ptr.vmem [resolvable:$true] %s106_s24 }
  0x2c   : > { %s208_s26 = scalar_lea.vmem %s107_s24, 128  ;;  %p215_p9 = scmp.lt.s32.totalorder %s107_s24, %s107_s24 }
  0x2d   : > { %98 = vst [vmem:[#allocation5] sm:$0xff] %v97_v1  ;;  %p209_p3 = scmp.ne.s32.totalorder %s107_s24, %s208_s26  ;;  %p216_p10 = scmp.lt.s32.totalorder %s208_s26, %s208_s26 }
  0x2f   : > { %p210_p5 = pnand %p209_p3, %p312_p2  ;;  %p217_p11 = por %p216_p10, %p215_p9 }
  0x31   : > { %p211_p7 = pneg %p210_p5 }
  0x33   : > { %p218_p12 = pnand %p217_p11, %p211_p7 }
  0x35   : > { %221 = shalt.err (!%p218_p12)
}
  0x36   : > { %s222_s29 = scalar_lea.hbm %s342_s1, 128 }
  0x37   : > { %p223_p13 = scmp.ne.s32.totalorder %s342_s1, %s222_s29  ;;  %p228_p4 = scmp.lt.u32.totalorder %s222_s29, %s342_s1 }
  0x39   : > { %p224_p0 = pnand %p223_p13, %p312_p2 }
  0x3b   : > { %p225_p1 = pneg %p224_p0 }
  0x3d   : > { %p230_p6 = pnand %p228_p4, %p225_p1 }
  0x3f   : > { %233 = shalt.err (!%p230_p6)
}
  0x40   : > { %159 = dma.vmem_to_hbm [thread:$0]  (%p312_p2), %s107_s24, 128, %s342_s1, [#allocation4]  }
  0x41   : > { %243 = dma.done.wait (%p312_p2), [#allocation4], 128  }
  0x42   : > { %245 = vsyncadd (%p312_p2), [#allocation4], 4294967168 }
  0x43 PF: > { %s13_s6 = sadd.s32 1, %s248_s6  }
  0x44   : > { %p10_p8 = scmp.ge.s32.totalorder %s13_s6, 4  }
  0x46   :  { %12 = sbr.rel (!%p10_p8) target bundleno = 2 (0x2), region = 53 }
  0x4d   :  { %119 = vsyncpa [#allocation3], 1 }
  0x4e   :  { %121 = vsyncpa [#allocation3 + $0x1], 1 }
  0x4f   :  { %122 = vsyncpa [#allocation4], 1 }
  0x50   :  { %124 = vsyncpa [#allocation4 + $0x1], 1 }

// kernel: _device_forward.1
= control target key start
LH: loop header
LB: loop body
LE: loop exit
PB: predicated region body
PF: predicated region fallthrough
CT: control target
= control target key end

     0   :  { %s9528_s0 = inlined_call_operand.hbm [shape: f32[2,18,48], index: 0, kind: input, shape index: {}]   ;;  %s9529_s1 = inlined_call_operand.hbm [shape: f32[2,18,32], index: 1, kind: input, shape index: {}]   ;;  %s9530_s2 = inlined_call_operand.hbm [shape: f32[2,2,32], index: 2, kind: input, shape index: {}]   ;;  %s9531_s3 = inlined_call_operand.hbm [shape: f32[2,2,32], index: 3, kind: input, shape index: {}]   ;;  %s9532_s4 = inlined_call_operand.hbm [shape: f32[2,2,18], index: 4, kind: input, shape index: {}]   ;;  %s9533_s5 = inlined_call_operand.hbm [shape: bf16[48,32], index: 5, kind: input, shape index: {}]   ;;  %s9534_s6 = inlined_call_operand.hbm [shape: f32[3,1,32], index: 6, kind: input, shape index: {}]   ;;  %s9535_s7 = inlined_call_operand.hbm [shape: bf16[16,32,32], index: 7, kind: input, shape index: {}]   ;;  %s9536_s8 = inlined_call_operand.hbm [shape: f32[16,1,32], index: 8, kind: input, shape index: {}]   ;;  %s9537_s9 = inlined_call_operand.hbm [shape: f32[16,1,32], index: 9, kind: input, shape index: {}]   ;;  %s9538_s10 = inlined_call_operand.hbm [shape: bf16[4,32,128], index: 10, kind: input, shape index: {}]   ;;  %s9539_s11 = inlined_call_operand.hbm [shape: f32[4,1,128], index: 11, kind: input, shape index: {}]   ;;  %s9540_s12 = inlined_call_operand.hbm [shape: bf16[4,128,32], index: 12, kind: input, shape index: {}]   ;;  %s9541_s13 = inlined_call_operand.hbm [shape: f32[4,1,32], index: 13, kind: input, shape index: {}]   ;;  %s9542_s14 = inlined_call_operand.hbm [shape: bf16[32,48], index: 14, kind: input, shape index: {}]   ;;  %s9543_s15 = inlined_call_operand.hbm [shape: f32[1,48], index: 15, kind: input, shape index: {}]   ;;  %s9544_s16 = inlined_call_operand.hbm [shape: f32[2,18,48], index: 16, kind: output, shape index: {0}]   ;;  %s9545_s17 = inlined_call_operand.hbm [shape: f32[2,2,32], index: 17, kind: output, shape index: {1}]  }
   0x1   :  { %9590 = sst [smem:[#allocation50_spill]] %s9528_s0 }
   0x2   :  { %9591 = sst [smem:[#allocation51_spill]] %s9529_s1 }
   0x3   :  { %9592 = sst [smem:[#allocation52_spill]] %s9530_s2 }
   0x4   :  { %9593 = sst [smem:[#allocation53_spill]] %s9531_s3 }
   0x5   :  { %9594 = sst [smem:[#allocation54_spill]] %s9532_s4 }
   0x6   :  { %9595 = sst [smem:[#allocation55_spill]] %s9533_s5 }
   0x7   :  { %9596 = sst [smem:[#allocation56_spill]] %s9534_s6 }
   0x8   :  { %9597 = sst [smem:[#allocation57_spill]] %s9535_s7 }
   0x9   :  { %9598 = sst [smem:[#allocation58_spill]] %s9537_s9 }
   0xa   :  { %9599 = sst [smem:[#allocation59_spill]] %s9539_s11 }
   0xb   :  { %9600 = sst [smem:[#allocation60_spill]] %s9541_s13 }
   0xc   :  { %9601 = sst [smem:[#allocation61_spill]] %s9542_s14 }
   0xd   :  { %9602 = sst [smem:[#allocation62_spill]] %s9543_s15 }
   0xe   :  { %9603 = sst [smem:[#allocation63_spill]] %s9544_s16 }
   0xf   :  { %9604 = sst [smem:[#allocation64_spill]] %s9545_s17 }
  0x10   :  { %23 = vsyncpa [#allocation3], 0 }
  0x11   :  { %25 = vsyncpa [#allocation3 + $0x1], 0 }
  0x12   :  { %26 = vsyncpa [#allocation6], 0 }
  0x13   :  { %28 = vsyncpa [#allocation6 + $0x1], 0 }
  0x14   :  { %29 = vsyncpa [#allocation9], 0 }
  0x15   :  { %31 = vsyncpa [#allocation9 + $0x1], 0 }
  0x16   :  { %32 = vsyncpa [#allocation12], 0 }
  0x17   :  { %33 = vsyncpa [#allocation15], 0 }
  0x18   :  { %34 = vsyncpa [#allocation18], 0 }
  0x19   :  { %35 = vsyncpa [#allocation21], 0 }
  0x1a   :  { %36 = vsyncpa [#allocation24], 0 }
  0x1b   :  { %37 = vsyncpa [#allocation27], 0 }
  0x1c   :  { %38 = vsyncpa [#allocation4], 0 }
  0x1d   :  { %40 = vsyncpa [#allocation4 + $0x1], 0 }
  0x1e   :  { %41 = vsyncpa [#allocation30], 0 }
  0x1f   :  { %43 = vsyncpa [#allocation30 + $0x1], 0  ;;  %s8090_s24 = smov 0   ;;  %s8092_s25 = smov 0  }
  0x20   :  { %s8094_s26 = smov 0   ;;  %s8096_s27 = smov 0  }
  0x21 LB: > { %9605 = sst [smem:[#allocation42_spill]] %s7958_s24  ;;  %s7972_s28 = smov [#allocation11]   ;;  %s7970_s27 = sphi %s8096_s27, %s9675_s27   ;;  %s7966_s26 = sphi %s8094_s26, %s9677_s26   ;;  %s7962_s25 = sphi %s8092_s25, %s9679_s25   ;;  %s7958_s24 = sphi %s8090_s24, %s9678_s24  }
  0x22   : > { %9606 = sst [smem:[#allocation43_spill]] %s7966_s26  ;;  %s479_s29 = sshll.u32 %s7972_s28, 4  ;;  %s8116_s29 = int_to_ptr.vmem [resolvable:$true] %s479_s29 }
  0x23   : > { %s8111_s0 = sadd.s32 4294967295, %s7970_s27   ;;  %p5931_p0 = scmp.ge.s32.totalorder %s7970_s27, 1 }
  0x24   : > { %9607 = sst [smem:[#allocation44_spill]] %s8111_s0  ;;  %p9555_p1 = scmp.eq.s32.totalorder %s8111_s0, 0 }
  0x25   : > { %p467_p2 = scmp.lt.s32.totalorder %s7970_s27, 3  ;;  %s7973_s18 = smov [#allocation14]  }
  0x26   : > { %s505_s19 = sshll.u32 %s7973_s18, 4  ;;  %s7974_s20 = smov [#allocation17]   ;;  %s8131_s19 = int_to_ptr.vmem [resolvable:$true] %s505_s19 }
  0x27   : > { %p8118_p3 = pnand %p5931_p0, %p467_p2  ;;  %s8133_s21 = sshll.u32 %s7974_s20, 4  ;;  %s532_s21 = int_to_ptr.vmem [resolvable:$true] %s8133_s21 }
  0x28   : > { %s9611_s5 = sld [smem:[#allocation55_spill]] }
  0x29   : > { %s9608_s30 = scalar_select %p8118_p3, 1, 0 }
  0x2a   : > { %p7003_p5 = pneg %p8118_p3 }
  0x2b   : > { %9609 = sst [smem:[#allocation45_spill]] %s9608_s30 }
  0x2c   : > { %p8127_p6 = pnand %p7003_p5, %p9555_p1 }
  0x2e   : > { %s9610_s1 = scalar_select %p8127_p6, 1, 0 }
  0x2f   : > { %s7382_s28 = scalar_lea.hbm %s9611_s5, 384  ;;  %p8143_p8 = pneg %p8127_p6 }
  0x30   : > { %p7383_p7 = scmp.ne.s32.totalorder %s9611_s5, %s7382_s28  ;;  %p7389_p11 = scmp.lt.u32.totalorder %s7382_s28, %s9611_s5 }
  0x31   : > { %s9612_s18 = scalar_select %p8143_p8, 1, 0 }
  0x32   : > { %p7385_p9 = pnand %p8143_p8, %p7383_p7 }
  0x34   : > { %p7386_p10 = pneg %p7385_p9 }
  0x36   : > { %p7391_p12 = pnand %p7389_p11, %p7386_p10 }
  0x38   : > { %7394 = shalt.err (!%p7391_p12)
}
  0x39   : > { %s7395_s16 = scalar_lea.vmem %s8116_s29, 384  ;;  %p7403_p5 = scmp.lt.s32.totalorder %s8116_s29, %s8116_s29 }
  0x3a   : > { %p7396_p13 = scmp.ne.s32.totalorder %s8116_s29, %s7395_s16  ;;  %p7404_p4 = scmp.lt.s32.totalorder %s7395_s16, %s7395_s16 }
  0x3c   : > { %p7398_p0 = pnand %p7396_p13, %p8143_p8  ;;  %p7405_p7 = por %p7404_p4, %p7403_p5 }
  0x3e   : > { %p7399_p2 = pneg %p7398_p0 }
  0x40   : > { %p7406_p9 = pnand %p7405_p7, %p7399_p2 }
  0x42   : > { %7409 = shalt.err (!%p7406_p9)
}
  0x43   : > { %s9557_s17 = smov 64   ;;  %s9559_s30 = smov 4  }
  0x44   : > { %7006 = dma.hbm_to_vmem [thread:$0]  (!%p8127_p6), %s9611_s5, 384, %s8116_s29, [#allocation12], %s9557_s17, %s9557_s17, %s9559_s30  }
  0x45   : > { %s9613_s7 = sld [smem:[#allocation57_spill]] }
  0x4b   : > { %s7410_s16 = scalar_lea.hbm %s9613_s7, 4096 }
  0x4c   : > { %p7411_p4 = scmp.ne.s32.totalorder %s9613_s7, %s7410_s16  ;;  %p7417_p12 = scmp.lt.u32.totalorder %s7410_s16, %s9613_s7 }
  0x4e   : > { %p7413_p10 = pnand %p7411_p4, %p8143_p8 }
  0x50   : > { %p7414_p11 = pneg %p7413_p10 }
  0x52   : > { %p7419_p13 = pnand %p7417_p12, %p7414_p11 }
  0x54   : > { %7422 = shalt.err (!%p7419_p13)
}
  0x55   : > { %s7423_s29 = scalar_lea.vmem %s8131_s19, 4096  ;;  %p7431_p7 = scmp.lt.s32.totalorder %s8131_s19, %s8131_s19 }
  0x56   : > { %p7424_p0 = scmp.ne.s32.totalorder %s8131_s19, %s7423_s29  ;;  %p7432_p9 = scmp.lt.s32.totalorder %s7423_s29, %s7423_s29 }
  0x58   : > { %p7426_p2 = pnand %p7424_p0, %p8143_p8  ;;  %p7433_p4 = por %p7432_p9, %p7431_p7 }
  0x5a   : > { %p7427_p5 = pneg %p7426_p2 }
  0x5c   : > { %p7434_p10 = pnand %p7433_p4, %p7427_p5 }
  0x5e   : > { %7437 = shalt.err (!%p7434_p10)
}
  0x5f   : > { %7012 = dma.hbm_to_vmem [thread:$0]  (!%p8127_p6), %s9613_s7, 4096, %s8131_s19, [#allocation15], %s9557_s17, %s9557_s17, %s9559_s30  }
  0x60   : > { %s9614_s9 = sld [smem:[#allocation58_spill]] }
  0x66   : > { %s7438_s22 = scalar_lea.hbm %s9614_s9, 256 }
  0x67   : > { %p7439_p11 = scmp.ne.s32.totalorder %s9614_s9, %s7438_s22  ;;  %p7445_p0 = scmp.lt.u32.totalorder %s7438_s22, %s9614_s9 }
  0x69   : > { %p7441_p12 = pnand %p7439_p11, %p8143_p8 }
  0x6b   : > { %p7442_p13 = pneg %p7441_p12 }
  0x6d   : > { %p7447_p2 = pnand %p7445_p0, %p7442_p13 }
  0x6f   : > { %7450 = shalt.err (!%p7447_p2)
}
  0x70   : > { %s7451_s29 = scalar_lea.vmem %s532_s21, 256  ;;  %p7459_p4 = scmp.lt.s32.totalorder %s532_s21, %s532_s21 }
  0x71   : > { %p7452_p5 = scmp.ne.s32.totalorder %s532_s21, %s7451_s29  ;;  %p7460_p10 = scmp.lt.s32.totalorder %s7451_s29, %s7451_s29 }
  0x73   : > { %p7454_p7 = pnand %p7452_p5, %p8143_p8  ;;  %p7461_p1 = por %p7460_p10, %p7459_p4 }
  0x75   : > { %p7455_p9 = pneg %p7454_p7 }
  0x77   : > { %p7462_p3 = pnand %p7461_p1, %p7455_p9 }
  0x79   : > { %7465 = shalt.err (!%p7462_p3)
}
  0x7a   : > { %s9561_s19 = smov 16   ;;  %s9563_s2 = smov 1  }
  0x7b   : > { %7018 = dma.hbm_to_vmem [thread:$0]  (!%p8127_p6), %s9614_s9, 256, %s532_s21, [#allocation18], %s9561_s19, %s9561_s19, %s9563_s2  }
  0x7c   : > { %s7979_s15 = smov [#allocation20]   ;;  %s7980_s23 = smov [#allocation23]  }
  0x7d   : > { %s557_s22 = sshll.u32 %s7979_s15, 4  ;;  %s583_s28 = sshll.u32 %s7980_s23, 4  ;;  %s558_s22 = int_to_ptr.vmem [resolvable:$true] %s557_s22  ;;  %s584_s28 = int_to_ptr.vmem [resolvable:$true] %s583_s28 }
  0x7e   : > { %s9615_s11 = sld [smem:[#allocation59_spill]] }
  0x84   : > { %s7466_s29 = scalar_lea.hbm %s9615_s11, 64 }
  0x85   : > { %p7467_p1 = scmp.ne.s32.totalorder %s9615_s11, %s7466_s29  ;;  %p7473_p12 = scmp.lt.u32.totalorder %s7466_s29, %s9615_s11 }
  0x87   : > { %p7469_p3 = pnand %p7467_p1, %p8143_p8 }
  0x89   : > { %p7470_p11 = pneg %p7469_p3 }
  0x8b   : > { %p7475_p13 = pnand %p7473_p12, %p7470_p11 }
  0x8d   : > { %7478 = shalt.err (!%p7475_p13)
}
  0x8e   : > { %s7479_s21 = scalar_lea.vmem %s558_s22, 64  ;;  %p7487_p7 = scmp.lt.s32.totalorder %s558_s22, %s558_s22 }
  0x8f   : > { %p7480_p0 = scmp.ne.s32.totalorder %s558_s22, %s7479_s21  ;;  %p7488_p9 = scmp.lt.s32.totalorder %s7479_s21, %s7479_s21 }
  0x91   : > { %p7482_p2 = pnand %p7480_p0, %p8143_p8  ;;  %p7489_p4 = por %p7488_p9, %p7487_p7 }
  0x93   : > { %p7483_p5 = pneg %p7482_p2 }
  0x95   : > { %p7490_p10 = pnand %p7489_p4, %p7483_p5 }
  0x97   : > { %7493 = shalt.err (!%p7490_p10)
}
  0x98   : > { %7024 = dma.hbm_to_vmem [thread:$0]  (!%p8127_p6), %s9615_s11, 64, %s558_s22, [#allocation21], %s9561_s19, %s9561_s19, %s9563_s2  }
  0x99   : > { %s9616_s13 = sld [smem:[#allocation60_spill]] }
  0x9f   : > { %s7494_s4 = scalar_lea.hbm %s9616_s13, 64 }
  0xa0   : > { %p7495_p1 = scmp.ne.s32.totalorder %s9616_s13, %s7494_s4  ;;  %p7501_p12 = scmp.lt.u32.totalorder %s7494_s4, %s9616_s13 }
  0xa2   : > { %p7497_p3 = pnand %p7495_p1, %p8143_p8 }
  0xa4   : > { %p7498_p11 = pneg %p7497_p3 }
  0xa6   : > { %p7503_p13 = pnand %p7501_p12, %p7498_p11 }
  0xa8   : > { %7506 = shalt.err (!%p7503_p13)
}
  0xa9   : > { %s7507_s16 = scalar_lea.vmem %s584_s28, 64  ;;  %p7515_p7 = scmp.lt.s32.totalorder %s584_s28, %s584_s28 }
  0xaa   : > { %p7508_p0 = scmp.ne.s32.totalorder %s584_s28, %s7507_s16  ;;  %p7516_p9 = scmp.lt.s32.totalorder %s7507_s16, %s7507_s16 }
  0xac   : > { %p7510_p2 = pnand %p7508_p0, %p8143_p8  ;;  %p7517_p4 = por %p7516_p9, %p7515_p7 }
  0xae   : > { %p7511_p5 = pneg %p7510_p2 }
  0xb0   : > { %p7518_p10 = pnand %p7517_p4, %p7511_p5 }
  0xb2   : > { %7521 = shalt.err (!%p7518_p10)
}
  0xb3   : > { %7030 = dma.hbm_to_vmem [thread:$0]  (!%p8127_p6), %s9616_s13, 64, %s584_s28, [#allocation24], %s9561_s19, %s9561_s19, %s9563_s2  }
  0xb4   : > { %s5930_s21 = sadd.s32 4294967294, %s7970_s27   ;;  %s8259_s5 = sadd.s32 1, %s7970_s27  }
  0xb5   : > { %9617 = sst [smem:[#allocation46_spill]] %s8259_s5  ;;  %s56_s7 = sadd.s32 1, %s7966_s26 }
  0xb6   : > { %s53_s17 = ssub.s32 %s7970_s27, %s8259_s5  ;;  %p63_p1 = scmp.ne.s32.totalorder %s7966_s26, %s7962_s25 }
  0xb7   : > { %p54_p3 = scmp.eq.s32.totalorder %s53_s17, 0  ;;  %p64_p11 = scmp.eq.s32.totalorder %s7970_s27, 0 }
  0xb8   : > { %p69_p12 = scmp.ne.s32.totalorder %s7962_s25, %s7958_s24  ;;  %p428_p13 = scmp.eq.s32.totalorder %s8111_s0, 1 }
  0xb9   : > { %s8271_s30 = scalar_select %p54_p3, %s7966_s26, %s56_s7  }
  0xba   : > { %p65_p0 = por %p64_p11, %p63_p1  ;;  %p9619_p2 = scmp.eq.s32.totalorder %s8111_s0, 0 }
  0xbb   : > { %9618 = sst [smem:[#allocation47_spill]] %s8271_s30  ;;  %p8279_p7 = por %p428_p13, %p63_p1 }
  0xbc   : > { %p8275_p5 = por %p9619_p2, %p69_p12  ;;  %p434_p9 = scmp.eq.s32.totalorder %s5930_s21, 1 }
  0xbd   : > { %s9621_s4 = scalar_select %p8279_p7, 1, 0 }
  0xbe   : > { %s9620_s28 = scalar_select %p8275_p5, 1, 0 }
  0xbf   : > { %9622 = sst [smem:[#allocation48_spill]] %s9621_s4  ;;  %p7071_p4 = scmp.lt.s32.totalorder %s7970_s27, 2 }
  0xc0   : > { %s8285_s14 = sand.u32 1, %s7966_s26   ;;  %p8287_p10 = por %p434_p9, %p69_p12 }
  0xc1   : > { %s9565_s23 = smul.u32 24, %s8285_s14  ;;  %p8293_p3 = pnand %p7071_p4, %p65_p0 }
  0xc2   : > { %s9623_s15 = scalar_select %p8287_p10, 1, 0 }
  0xc3   : > { %s9566_s20 = smul.u32 384, %s7970_s27  ;;  %s9568_s22 = sand.u32 1, %s7970_s27  }
  0xc4   : > { %9624 = sst [smem:[#allocation49_spill]] %s9623_s15  ;;  %s9626_s7 = sld [smem:[#allocation51_spill]] }
  0xc5   : > { %s9625_s16 = scalar_select %p8293_p3, 1, 0 }
  0xc6   : > { %s646_s19 = scalar_lea.vmem [#allocation5], %s9565_s23  ;;  %s8310_s9 = sshll.u32 %s8285_s14, 1 }
  0xc7   : > { %s653_s2 = sshll.u32 %s646_s19, 4  ;;  %s8314_s11 = scalar_lea.sflag [#allocation6], %s9568_s22  ;;  %s8307_s2 = int_to_ptr.vmem [resolvable:$true] %s653_s2 }
  0xc8   : > { %p8320_p11 = pneg %p8293_p3 }
  0xca   : > { %s8303_s17 = scalar_lea.hbm %s9626_s7, %s9566_s20  ;;  %s7527_s23 = scalar_lea.hbm %s9626_s7, 768 }
  0xcb   : > { %s7522_s13 = scalar_lea.hbm %s8303_s17, 384  ;;  %p7528_p0 = scmp.lt.u32.totalorder %s8303_s17, %s9626_s7 }
  0xcc   : > { %p7523_p1 = scmp.ne.s32.totalorder %s8303_s17, %s7522_s13  ;;  %p7529_p2 = scmp.lt.u32.totalorder %s7527_s23, %s7522_s13 }
  0xcd   : > { %s9627_s29 = scalar_select %p8320_p11, 1, 0 }
  0xce   : > { %p7525_p12 = pnand %p8320_p11, %p7523_p1  ;;  %p7530_p9 = por %p7529_p2, %p7528_p0 }
  0xcf   : > { %p7531_p4 = scmp.lt.u32.totalorder %s7522_s13, %s8303_s17 }
  0xd0   : > { %p7526_p13 = pneg %p7525_p12 }
  0xd1   : > { %p7532_p10 = por %p7531_p4, %p7530_p9 }
  0xd3   : > { %p7533_p7 = pnand %p7532_p10, %p7526_p13 }
  0xd5   : > { %7536 = shalt.err (!%p7533_p7)
}
  0xd6   : > { %s7537_s22 = scalar_lea.vmem %s8307_s2, 384  ;;  %s7981_s21 = smov [#allocation5]  }
  0xd7   : > { %p7538_p1 = scmp.ne.s32.totalorder %s8307_s2, %s7537_s22  ;;  %s7542_s19 = sshll.u32 %s7981_s21, 4  ;;  %s7543_s19 = int_to_ptr.vmem [resolvable:$false] %s7542_s19 }
  0xd8   : > { %s7544_s30 = scalar_lea.vmem %s7543_s19, 768  ;;  %p7545_p6 = scmp.lt.s32.totalorder %s8307_s2, %s7543_s19 }
  0xd9   : > { %p7540_p12 = pnand %p7538_p1, %p8320_p11  ;;  %p7546_p8 = scmp.lt.s32.totalorder %s7544_s30, %s7537_s22 }
  0xdb   : > { %p7541_p5 = pneg %p7540_p12  ;;  %p7547_p0 = por %p7546_p8, %p7545_p6 }
  0xdd   : > { %p7548_p2 = pnand %p7547_p0, %p7541_p5 }
  0xdf   : > { %7551 = shalt.err (!%p7548_p2)
}
  0xe0   : > { %s9578_s13 = smov 128   ;;  %s9579_s23 = smov 8  }
  0xe1   : > { %7043 = dma.hbm_to_vmem [thread:$0]  (!%p8293_p3), %s8303_s17, 384, %s8307_s2, %s8314_s11, %s9578_s13, %s9578_s13, %s9579_s23  }
  0xe2   : > { %s8348_s20 = sshll.u32 %s7970_s27, 5  ;;  %s9628_s3 = sld [smem:[#allocation53_spill]] }
  0xe3   : > { %s685_s30 = scalar_lea.vmem [#allocation8], %s8310_s9  ;;  %s7984_s26 = smov [#allocation13]  }
  0xe4   : > { %s692_s7 = sshll.u32 %s685_s30, 4  ;;  %s8359_s5 = sshll.u32 %s7984_s26, 4  ;;  %s8357_s7 = int_to_ptr.vmem [resolvable:$true] %s692_s7  ;;  %s493_s5 = int_to_ptr.vmem [resolvable:$true] %s8359_s5 }
  0xe5   : > { %s9629_s2 = sand.u32 1, %s7970_s27  }
  0xe6   : > { %s8363_s17 = scalar_lea.sflag [#allocation9], %s9629_s2 }
  0xe8   : > { %s8354_s19 = scalar_lea.hbm %s9628_s3, %s8348_s20  ;;  %s7557_s23 = scalar_lea.hbm %s9628_s3, 64 }
  0xe9   : > { %s7552_s13 = scalar_lea.hbm %s8354_s19, 32  ;;  %p7558_p7 = scmp.lt.u32.totalorder %s8354_s19, %s9628_s3 }
  0xea   : > { %p7553_p6 = scmp.ne.s32.totalorder %s8354_s19, %s7552_s13  ;;  %p7559_p10 = scmp.lt.u32.totalorder %s7557_s23, %s7552_s13 }
  0xeb   : > { %p7561_p9 = scmp.lt.u32.totalorder %s7552_s13, %s8354_s19 }
  0xec   : > { %p7555_p8 = pnand %p7553_p6, %p8320_p11  ;;  %p7560_p13 = por %p7559_p10, %p7558_p7 }
  0xee   : > { %p7556_p5 = pneg %p7555_p8  ;;  %p7562_p4 = por %p7561_p9, %p7560_p13 }
  0xf0   : > { %p7563_p1 = pnand %p7562_p4, %p7556_p5 }
  0xf2   : > { %7566 = shalt.err (!%p7563_p1)
}
  0xf3   : > { %s7567_s26 = scalar_lea.vmem %s8357_s7, 32  ;;  %s7985_s30 = smov [#allocation8]  }
  0xf4   : > { %p7568_p12 = scmp.ne.s32.totalorder %s8357_s7, %s7567_s26  ;;  %s7572_s2 = sshll.u32 %s7985_s30, 4  ;;  %s7573_s2 = int_to_ptr.vmem [resolvable:$false] %s7572_s2 }
  0xf5   : > { %s7574_s24 = scalar_lea.vmem %s7573_s2, 64  ;;  %p7575_p6 = scmp.lt.s32.totalorder %s8357_s7, %s7573_s2 }
  0xf6   : > { %p7570_p0 = pnand %p7568_p12, %p8320_p11  ;;  %p7576_p8 = scmp.lt.s32.totalorder %s7574_s24, %s7567_s26 }
  0xf8   : > { %p7571_p2 = pneg %p7570_p0  ;;  %p7577_p7 = por %p7576_p8, %p7575_p6 }
  0xfa   : > { %p7578_p10 = pnand %p7577_p7, %p7571_p2 }
  0xfc   : > { %7581 = shalt.err (!%p7578_p10)
}
  0xfd   : > { %7049 = dma.hbm_to_vmem [thread:$0]  (!%p8293_p3), %s8354_s19, 32, %s8357_s7, %s8363_s17  }
  0xfe   : > { %s9630_s6 = sld [smem:[#allocation56_spill]]  ;;  %p9631_p13 = scmp.ne.s32.totalorder %s9612_s18, 0 }
 0x104   : > { %s7582_s23 = scalar_lea.hbm %s9630_s6, 48 }
 0x105   : > { %p7583_p5 = scmp.ne.s32.totalorder %s9630_s6, %s7582_s23  ;;  %p7589_p1 = scmp.lt.u32.totalorder %s7582_s23, %s9630_s6 }
 0x107   : > { %p7585_p9 = pnand %p7583_p5, %p9631_p13 }
 0x109   : > { %p7586_p4 = pneg %p7585_p9 }
 0x10b   : > { %p7591_p12 = pnand %p7589_p1, %p7586_p4 }
 0x10d   : > { %7594 = shalt.err (!%p7591_p12)
}
 0x10e   : > { %s7595_s2 = scalar_lea.vmem %s493_s5, 48  ;;  %s7602_s7 = scalar_lea.vmem %s493_s5, 64 }
 0x10f   : > { %p7596_p0 = scmp.ne.s32.totalorder %s493_s5, %s7595_s2  ;;  %p7603_p8 = scmp.lt.s32.totalorder %s493_s5, %s493_s5 }
 0x110   : > { %p7604_p7 = scmp.lt.s32.totalorder %s7602_s7, %s7595_s2 }
 0x111   : > { %p7598_p2 = pnand %p7596_p0, %p9631_p13 }
 0x112   : > { %p7605_p10 = por %p7604_p7, %p7603_p8 }
 0x113   : > { %p7599_p6 = pneg %p7598_p2 }
 0x115   : > { %p7606_p3 = pnand %p7605_p10, %p7599_p6 }
 0x117   : > { %7609 = shalt.err (!%p7606_p3)
}
 0x118   : > { %p9632_p5 = scmp.ne.s32.totalorder %s9610_s1, 0  ;;  %s9633_s19 = smov 1  }
 0x119   : > { %s9634_s24 = smov 16   ;;  %s7986_s23 = smov [#allocation16]  }
 0x11a   : > { %7009 = dma.hbm_to_vmem [thread:$0]  (!%p9632_p5), %s9630_s6, 48, %s493_s5, [#allocation12], %s9634_s24, %s9634_s24, %s9633_s19  }
 0x11b   : > { %s518_s22 = sshll.u32 %s7986_s23, 4  ;;  %s7987_s21 = smov [#allocation19]   ;;  %s519_s22 = int_to_ptr.vmem [resolvable:$true] %s518_s22 }
 0x11c   : > { %s544_s26 = sshll.u32 %s7987_s21, 4  ;;  %s7610_s7 = scalar_lea.hbm %s9536_s8, 256  ;;  %s545_s26 = int_to_ptr.vmem [resolvable:$true] %s544_s26 }
 0x11d   : > { %p7611_p3 = scmp.ne.s32.totalorder %s9536_s8, %s7610_s7  ;;  %p7617_p1 = scmp.lt.u32.totalorder %s7610_s7, %s9536_s8 }
 0x11f   : > { %p7613_p9 = pnand %p7611_p3, %p9631_p13 }
 0x121   : > { %p7614_p4 = pneg %p7613_p9 }
 0x123   : > { %p7619_p12 = pnand %p7617_p1, %p7614_p4 }
 0x125   : > { %7622 = shalt.err (!%p7619_p12)
}
 0x126   : > { %s7623_s5 = scalar_lea.vmem %s519_s22, 256  ;;  %p7631_p8 = scmp.lt.s32.totalorder %s519_s22, %s519_s22 }
 0x127   : > { %p7624_p0 = scmp.ne.s32.totalorder %s519_s22, %s7623_s5  ;;  %p7632_p7 = scmp.lt.s32.totalorder %s7623_s5, %s7623_s5 }
 0x129   : > { %p7626_p2 = pnand %p7624_p0, %p9631_p13  ;;  %p7633_p10 = por %p7632_p7, %p7631_p8 }
 0x12b   : > { %p7627_p6 = pneg %p7626_p2 }
 0x12d   : > { %p7634_p11 = pnand %p7633_p10, %p7627_p6 }
 0x12f   : > { %7637 = shalt.err (!%p7634_p11)
}
 0x130   : > { %7015 = dma.hbm_to_vmem [thread:$0]  (!%p9632_p5), %s9536_s8, 256, %s519_s22, [#allocation15], %s9634_s24, %s9634_s24, %s9633_s19  }
 0x131   : > { %s7638_s23 = scalar_lea.hbm %s9538_s10, 1024 }
 0x132   : > { %p7639_p3 = scmp.ne.s32.totalorder %s9538_s10, %s7638_s23  ;;  %p7645_p4 = scmp.lt.u32.totalorder %s7638_s23, %s9538_s10 }
 0x134   : > { %p7641_p11 = pnand %p7639_p3, %p9631_p13 }
 0x136   : > { %p7642_p9 = pneg %p7641_p11 }
 0x138   : > { %p7647_p1 = pnand %p7645_p4, %p7642_p9 }
 0x13a   : > { %7650 = shalt.err (!%p7647_p1)
}
 0x13b   : > { %s7651_s15 = scalar_lea.vmem %s545_s26, 1024  ;;  %p7659_p6 = scmp.lt.s32.totalorder %s545_s26, %s545_s26 }
 0x13c   : > { %p7652_p12 = scmp.ne.s32.totalorder %s545_s26, %s7651_s15  ;;  %p7660_p8 = scmp.lt.s32.totalorder %s7651_s15, %s7651_s15 }
 0x13e   : > { %p7654_p0 = pnand %p7652_p12, %p9631_p13  ;;  %p7661_p7 = por %p7660_p8, %p7659_p6 }
 0x140   : > { %p7655_p2 = pneg %p7654_p0 }
 0x142   : > { %p7662_p10 = pnand %p7661_p7, %p7655_p2 }
 0x144   : > { %7665 = shalt.err (!%p7662_p10)
}
 0x145   : > { %s9635_s19 = smov 4   ;;  %s9636_s24 = smov 64  }
 0x146   : > { %7021 = dma.hbm_to_vmem [thread:$0]  (!%p9632_p5), %s9538_s10, 1024, %s545_s26, [#allocation18], %s9636_s24, %s9636_s24, %s9635_s19  }
 0x147   : > { %s7988_s3 = smov [#allocation22]   ;;  %s7989_s4 = smov [#allocation25]  }
 0x148   : > { %s570_s0 = sshll.u32 %s7988_s3, 4  ;;  %s596_s13 = sshll.u32 %s7989_s4, 4  ;;  %s571_s0 = int_to_ptr.vmem [resolvable:$true] %s570_s0  ;;  %s597_s13 = int_to_ptr.vmem [resolvable:$true] %s596_s13 }
 0x149   : > { %s7666_s30 = scalar_lea.hbm %s9540_s12, 4096 }
 0x14a   : > { %p7667_p3 = scmp.ne.s32.totalorder %s9540_s12, %s7666_s30  ;;  %p7673_p4 = scmp.lt.u32.totalorder %s7666_s30, %s9540_s12 }
 0x14c   : > { %p7669_p11 = pnand %p7667_p3, %p9631_p13 }
 0x14e   : > { %p7670_p9 = pneg %p7669_p11 }
 0x150   : > { %p7675_p1 = pnand %p7673_p4, %p7670_p9 }
 0x152   : > { %7678 = shalt.err (!%p7675_p1)
}
 0x153   : > { %s7679_s26 = scalar_lea.vmem %s571_s0, 4096  ;;  %p7687_p6 = scmp.lt.s32.totalorder %s571_s0, %s571_s0 }
 0x154   : > { %p7680_p12 = scmp.ne.s32.totalorder %s571_s0, %s7679_s26  ;;  %p7688_p8 = scmp.lt.s32.totalorder %s7679_s26, %s7679_s26 }
 0x156   : > { %p7682_p0 = pnand %p7680_p12, %p9631_p13  ;;  %p7689_p7 = por %p7688_p8, %p7687_p6 }
 0x158   : > { %p7683_p2 = pneg %p7682_p0 }
 0x15a   : > { %p7690_p10 = pnand %p7689_p7, %p7683_p2 }
 0x15c   : > { %7693 = shalt.err (!%p7690_p10)
}
 0x15d   : > { %7027 = dma.hbm_to_vmem [thread:$0]  (!%p9632_p5), %s9540_s12, 4096, %s571_s0, [#allocation21], %s9636_s24, %s9636_s24, %s9635_s19  }
 0x15e   : > { %s9637_s21 = sld [smem:[#allocation61_spill]] }
 0x164   : > { %s7694_s30 = scalar_lea.hbm %s9637_s21, 256 }
 0x165   : > { %p7695_p3 = scmp.ne.s32.totalorder %s9637_s21, %s7694_s30  ;;  %p7701_p4 = scmp.lt.u32.totalorder %s7694_s30, %s9637_s21 }
 0x167   : > { %p7697_p11 = pnand %p7695_p3, %p9631_p13 }
 0x169   : > { %p7698_p9 = pneg %p7697_p11 }
 0x16b   : > { %p7703_p1 = pnand %p7701_p4, %p7698_p9 }
 0x16d   : > { %7706 = shalt.err (!%p7703_p1)
}
 0x16e   : > { %s7707_s26 = scalar_lea.vmem %s597_s13, 256  ;;  %p7715_p6 = scmp.lt.s32.totalorder %s597_s13, %s597_s13 }
 0x16f   : > { %p7708_p12 = scmp.ne.s32.totalorder %s597_s13, %s7707_s26  ;;  %p7716_p8 = scmp.lt.s32.totalorder %s7707_s26, %s7707_s26 }
 0x171   : > { %p7710_p0 = pnand %p7708_p12, %p9631_p13  ;;  %p7717_p7 = por %p7716_p8, %p7715_p6 }
 0x173   : > { %p7711_p2 = pneg %p7710_p0 }
 0x175   : > { %p7718_p10 = pnand %p7717_p7, %p7711_p2 }
 0x177   : > { %7721 = shalt.err (!%p7718_p10)
}
 0x178   : > { %7033 = dma.hbm_to_vmem [thread:$0]  (!%p9632_p5), %s9637_s21, 256, %s597_s13, [#allocation24], %s9636_s24, %s9636_s24, %s9635_s19  }
 0x179   : > { %s7990_s3 = smov [#allocation26]   ;;  %s9638_s2 = sld [smem:[#allocation62_spill]] }
 0x17a   : > { %s610_s4 = sshll.u32 %s7990_s3, 4  ;;  %s611_s4 = int_to_ptr.vmem [resolvable:$true] %s610_s4 }
 0x17f   : > { %s7722_s7 = scalar_lea.hbm %s9638_s2, 16 }
 0x180   : > { %p7723_p3 = scmp.ne.s32.totalorder %s9638_s2, %s7722_s7  ;;  %p7729_p4 = scmp.lt.u32.totalorder %s7722_s7, %s9638_s2 }
 0x182   : > { %p7725_p11 = pnand %p7723_p3, %p9631_p13 }
 0x184   : > { %p7726_p9 = pneg %p7725_p11 }
 0x186   : > { %p7731_p1 = pnand %p7729_p4, %p7726_p9 }
 0x188   : > { %7734 = shalt.err (!%p7731_p1)
}
 0x189   : > { %s7735_s19 = scalar_lea.vmem %s611_s4, 16  ;;  %s7742_s24 = scalar_lea.vmem %s611_s4, 32 }
 0x18a   : > { %p7736_p12 = scmp.ne.s32.totalorder %s611_s4, %s7735_s19  ;;  %p7743_p6 = scmp.lt.s32.totalorder %s611_s4, %s611_s4 }
 0x18b   : > { %p7744_p8 = scmp.lt.s32.totalorder %s7742_s24, %s7735_s19 }
 0x18c   : > { %p7738_p0 = pnand %p7736_p12, %p9631_p13 }
 0x18d   : > { %p7745_p7 = por %p7744_p8, %p7743_p6 }
 0x18e   : > { %p7739_p2 = pneg %p7738_p0 }
 0x190   : > { %p7746_p10 = pnand %p7745_p7, %p7739_p2 }
 0x192   : > { %7749 = shalt.err (!%p7746_p10)
}
 0x193   : > { %7036 = dma.hbm_to_vmem [thread:$0]  (!%p9632_p5), %s9638_s2, 16, %s611_s4, [#allocation27]  }
 0x194   : > { %s9639_s6 = smul.u32 384, %s7970_s27  ;;  %s9640_s3 = sld [smem:[#allocation50_spill]] }
 0x195   : > { %s9641_s30 = smul.u32 24, %s8285_s14  ;;  %s622_s15 = scalar_lea.sflag [#allocation3], %s8285_s14 }
 0x196   : > { %p9642_p3 = scmp.ne.s32.totalorder %s9627_s29, 0 }
 0x197   : > { %s625_s1 = scalar_lea.vmem [#allocation2], %s9641_s30 }
 0x198   : > { %s632_s7 = sshll.u32 %s625_s1, 4  ;;  %s8520_s7 = int_to_ptr.vmem [resolvable:$true] %s632_s7 }
 0x19a   : > { %s8516_s23 = scalar_lea.hbm %s9640_s3, %s9639_s6  ;;  %s7755_s19 = scalar_lea.hbm %s9640_s3, 768 }
 0x19b   : > { %s7750_s22 = scalar_lea.hbm %s8516_s23, 384  ;;  %p7756_p9 = scmp.lt.u32.totalorder %s8516_s23, %s9640_s3 }
 0x19c   : > { %p7751_p13 = scmp.ne.s32.totalorder %s8516_s23, %s7750_s22  ;;  %p7757_p4 = scmp.lt.u32.totalorder %s7755_s19, %s7750_s22 }
 0x19d   : > { %p7759_p12 = scmp.lt.u32.totalorder %s7750_s22, %s8516_s23 }
 0x19e   : > { %p7753_p5 = pnand %p7751_p13, %p9642_p3  ;;  %p7758_p1 = por %p7757_p4, %p7756_p9 }
 0x1a0   : > { %p7754_p11 = pneg %p7753_p5  ;;  %p7760_p0 = por %p7759_p12, %p7758_p1 }
 0x1a2   : > { %p7761_p2 = pnand %p7760_p0, %p7754_p11 }
 0x1a4   : > { %7764 = shalt.err (!%p7761_p2)
}
 0x1a5   : > { %s7765_s0 = scalar_lea.vmem %s8520_s7, 384  ;;  %s7991_s6 = smov [#allocation2]  }
 0x1a6   : > { %p7766_p6 = scmp.ne.s32.totalorder %s8520_s7, %s7765_s0  ;;  %s7770_s18 = sshll.u32 %s7991_s6, 4  ;;  %s7771_s18 = int_to_ptr.vmem [resolvable:$false] %s7770_s18 }
 0x1a7   : > { %s7772_s5 = scalar_lea.vmem %s7771_s18, 768  ;;  %p7773_p10 = scmp.lt.s32.totalorder %s8520_s7, %s7771_s18 }
 0x1a8   : > { %p7768_p8 = pnand %p7766_p6, %p9642_p3  ;;  %p7774_p13 = scmp.lt.s32.totalorder %s7772_s5, %s7765_s0 }
 0x1aa   : > { %p7769_p7 = pneg %p7768_p8  ;;  %p7775_p5 = por %p7774_p13, %p7773_p10 }
 0x1ac   : > { %p7776_p9 = pnand %p7775_p5, %p7769_p7 }
 0x1ae   : > { %7779 = shalt.err (!%p7776_p9)
}
 0x1af   : > { %p9643_p11 = scmp.ne.s32.totalorder %s9625_s16, 0  ;;  %s9644_s30 = smov 8  }
 0x1b0   : > { %s9645_s1 = smov 128   ;;  %s9646_s26 = sld [smem:[#allocation52_spill]] }
 0x1b1   : > { %7040 = dma.hbm_to_vmem [thread:$0]  (!%p9643_p11), %s8516_s23, 384, %s8520_s7, %s622_s15, %s9645_s1, %s9645_s1, %s9644_s30  }
 0x1b2   : > { %s667_s13 = scalar_lea.vmem [#allocation7], %s8310_s9 }
 0x1b3   : > { %s674_s0 = sshll.u32 %s667_s13, 4  ;;  %s675_s0 = int_to_ptr.vmem [resolvable:$true] %s674_s0 }
 0x1b6   : > { %s9647_s19 = smov %s9646_s26  ;;  %s8553_s24 = scalar_lea.hbm %s9646_s26, %s8348_s20 }
 0x1b7   : > { %s7780_s6 = scalar_lea.hbm %s8553_s24, 32  ;;  %s7785_s23 = scalar_lea.hbm %s9647_s19, 64 }
 0x1b8   : > { %p7781_p4 = scmp.ne.s32.totalorder %s8553_s24, %s7780_s6  ;;  %p7786_p0 = scmp.lt.u32.totalorder %s8553_s24, %s9647_s19 }
 0x1b9   : > { %p7787_p2 = scmp.lt.u32.totalorder %s7785_s23, %s7780_s6  ;;  %p7789_p8 = scmp.lt.u32.totalorder %s7780_s6, %s8553_s24 }
 0x1ba   : > { %p7783_p1 = pnand %p7781_p4, %p9642_p3 }
 0x1bb   : > { %p7788_p6 = por %p7787_p2, %p7786_p0 }
 0x1bc   : > { %p7784_p12 = pneg %p7783_p1 }
 0x1bd   : > { %p7790_p7 = por %p7789_p8, %p7788_p6 }
 0x1bf   : > { %p7791_p10 = pnand %p7790_p7, %p7784_p12 }
 0x1c1   : > { %7794 = shalt.err (!%p7791_p10)
}
 0x1c2   : > { %s7795_s5 = scalar_lea.vmem %s675_s0, 32  ;;  %s7992_s30 = smov [#allocation7]  }
 0x1c3   : > { %p7796_p13 = scmp.ne.s32.totalorder %s675_s0, %s7795_s5  ;;  %s7800_s1 = sshll.u32 %s7992_s30, 4  ;;  %s7801_s1 = int_to_ptr.vmem [resolvable:$false] %s7800_s1 }
 0x1c4   : > { %s7802_s22 = scalar_lea.vmem %s7801_s1, 64  ;;  %p7803_p4 = scmp.lt.s32.totalorder %s675_s0, %s7801_s1 }
 0x1c5   : > { %p7798_p5 = pnand %p7796_p13, %p9642_p3  ;;  %p7804_p1 = scmp.lt.s32.totalorder %s7802_s22, %s7795_s5 }
 0x1c7   : > { %p7799_p9 = pneg %p7798_p5  ;;  %p7805_p11 = por %p7804_p1, %p7803_p4 }
 0x1c9   : > { %p7806_p0 = pnand %p7805_p11, %p7799_p9 }
 0x1cb   : > { %7809 = shalt.err (!%p7806_p0)
}
 0x1cc   : > { %p9648_p2 = scmp.ne.s32.totalorder %s9625_s16, 0  ;;  %s9649_s13 = sld [smem:[#allocation54_spill]] }
 0x1cd   : > { %s703_s14 = scalar_lea.vmem [#allocation10], %s8310_s9 }
 0x1ce   : > { %7046 = dma.hbm_to_vmem [thread:$0]  (!%p9648_p2), %s8553_s24, 32, %s675_s0, %s8314_s11  }
 0x1cf   : > { %s710_s18 = sshll.u32 %s703_s14, 4  ;;  %s711_s18 = int_to_ptr.vmem [resolvable:$true] %s710_s18 }
 0x1d2   : > { %s8578_s6 = scalar_lea.hbm %s9649_s13, %s8348_s20  ;;  %s7815_s11 = scalar_lea.hbm %s9649_s13, 64 }
 0x1d3   : > { %s7810_s23 = scalar_lea.hbm %s8578_s6, 32  ;;  %p7816_p8 = scmp.lt.u32.totalorder %s8578_s6, %s9649_s13 }
 0x1d4   : > { %p7811_p11 = scmp.ne.s32.totalorder %s8578_s6, %s7810_s23  ;;  %p7817_p7 = scmp.lt.u32.totalorder %s7815_s11, %s7810_s23 }
 0x1d5   : > { %p7819_p13 = scmp.lt.u32.totalorder %s7810_s23, %s8578_s6 }
 0x1d6   : > { %p7813_p12 = pnand %p7811_p11, %p9642_p3  ;;  %p7818_p10 = por %p7817_p7, %p7816_p8 }
 0x1d8   : > { %p7814_p6 = pneg %p7813_p12  ;;  %p7820_p5 = por %p7819_p13, %p7818_p10 }
 0x1da   : > { %p7821_p9 = pnand %p7820_p5, %p7814_p6 }
 0x1dc   : > { %7824 = shalt.err (!%p7821_p9)
}
 0x1dd   : > { %s7825_s9 = scalar_lea.vmem %s711_s18, 32  ;;  %s7993_s20 = smov [#allocation10]  }
 0x1de   : > { %p7826_p4 = scmp.ne.s32.totalorder %s711_s18, %s7825_s9  ;;  %s7830_s5 = sshll.u32 %s7993_s20, 4  ;;  %s7831_s5 = int_to_ptr.vmem [resolvable:$false] %s7830_s5 }
 0x1df   : > { %s7832_s30 = scalar_lea.vmem %s7831_s5, 64  ;;  %p7833_p11 = scmp.lt.s32.totalorder %s711_s18, %s7831_s5 }
 0x1e0   : > { %p7828_p1 = pnand %p7826_p4, %p9642_p3  ;;  %p7834_p12 = scmp.lt.s32.totalorder %s7832_s30, %s7825_s9 }
 0x1e2   : > { %p7829_p0 = pneg %p7828_p1  ;;  %p7835_p2 = por %p7834_p12, %p7833_p11 }
 0x1e4   : > { %p7836_p7 = pnand %p7835_p2, %p7829_p0 }
 0x1e6   : > { %7839 = shalt.err (!%p7836_p7)
}
 0x1e7   : > { %p9650_p8 = scmp.ne.s32.totalorder %s9625_s16, 0  ;;  %s9651_s1 = sld [smem:[#allocation45_spill]] }
 0x1e9   : > { %7052 = dma.hbm_to_vmem [thread:$0]  (!%p9650_p8), %s8578_s6, 32, %s711_s18, %s8363_s17  }
 0x1ed   : > { %p9652_p6 = scmp.ne.s32.totalorder %s9651_s1, 0 }
 0x1ee   : > { %s8602_s29 = sand.u32 (!%p9652_p6), 1, %s7962_s25   ;;  %p9653_p3 = scmp.ne.s32.totalorder (!%p9652_p6), %s9620_s28, 0 }
 0x1ef   : > { %719 = sbr.rel (%p9652_p6) target bundleno = 10319 (0x284f), region = 84  ;;  %s722_s4 = scalar_lea.sflag (!%p9652_p6), [#allocation3], %s8602_s29 }
 0x1f0   : > { %s8605_s22 = smul.u32 (!%p9652_p6), 24, %s8602_s29 }
 0x1f2   : > { %s8609_s26 = scalar_lea.vmem (!%p9652_p6), [#allocation2], %s8605_s22 }
 0x1f6   : > { %7913 = dma.done.wait (%p9653_p3), %s722_s4, 384  }
 0x1f7   : > { %7915 = vsyncadd (%p9653_p3), %s722_s4, 4294966912  ;;  %s9654_s16 = sld [smem:[#allocation44_spill]]  ;;  %s8617_s14 = scalar_lea.vmem [#allocation5], %s8605_s22 }
 0x1fd   : > { %s730_s17 = sand.u32 1, %s9654_s16  }
 0x1fe   : > { %s731_s6 = scalar_lea.sflag [#allocation6], %s730_s17 }
 0x1ff   : > { %7917 = dma.done.wait (%p9653_p3), %s731_s6, 416  }
 0x200   : > { %7919 = vsyncadd (%p9653_p3), %s731_s6, 4294966880  ;;  %s8624_s18 = sshll.u32 %s8602_s29, 1  ;;  %s749_s7 = scalar_lea.sflag [#allocation9], %s730_s17 }
 0x201   : > { %s743_s23 = scalar_lea.vmem [#allocation7], %s8624_s18  ;;  %s752_s15 = scalar_lea.vmem [#allocation8], %s8624_s18 }
 0x202   : > { %7921 = dma.done.wait (%p9653_p3), %s749_s7, 64  }
 0x203   : > { %7923 = vsyncadd (%p9653_p3), %s749_s7, 4294967232  ;;  %s761_s11 = scalar_lea.vmem [#allocation10], %s8624_s18  ;;  %p9655_p2 = scmp.eq.s32.totalorder %s9654_s16, 0 }
 0x205   : > { %7925 = dma.done.wait (%p9655_p2), [#allocation12], 432   ;;  %p9656_p10 = pmov %p9655_p2 }
 0x206   : > { %p9657_p13 = pmov %p9655_p2 }
 0x207   : > { %7927 = vsyncadd (%p9656_p10), [#allocation12], 4294966864 }
 0x208   : > { %7929 = dma.done.wait (%p9657_p13), [#allocation15], 4352   ;;  %p9658_p5 = pmov %p9655_p2 }
 0x209   : > { %p9659_p9 = pmov %p9655_p2 }
 0x20a   : > { %7931 = vsyncadd (%p9658_p5), [#allocation15], 4294962944 }
 0x20b   : > { %7933 = dma.done.wait (%p9659_p9), [#allocation18], 1280   ;;  %p9660_p4 = pmov %p9655_p2 }
 0x20c   : > { %p9661_p1 = pmov %p9655_p2 }
 0x20d   : > { %7935 = vsyncadd (%p9660_p4), [#allocation18], 4294966016 }
 0x20e   : > { %7937 = dma.done.wait (%p9661_p1), [#allocation21], 4160   ;;  %p9662_p0 = pmov %p9661_p1 }
 0x210   : > { %7939 = vsyncadd (%p9662_p0), [#allocation21], 4294963136  ;;  %p9663_p11 = pmov %p9662_p0 }
 0x211   : > { %p9664_p12 = pmov %p9662_p0 }
 0x212   : > { %7941 = dma.done.wait (%p9663_p11), [#allocation24], 320  }
 0x213   : > { %7943 = vsyncadd (%p9664_p12), [#allocation24], 4294966976  ;;  %p9665_p7 = pmov %p9662_p0 }
 0x214   : > { %p9666_p8 = pmov %p9662_p0 }
 0x215   : > { %7945 = dma.done.wait (%p9665_p7), [#allocation27], 16  }
 0x216   : > { %7947 = vsyncadd (%p9666_p8), [#allocation27], 4294967280  ;;  %v7137_v0 = vld [vmem:[#allocation11] sm:$0xff]   ;;  %v7138_v1 = vld [vmem:[#allocation11 + $0x8] sm:$0xff]   ;;  %vm947_vm0 = vcmask 392192   ;;  %vm1016_vm1 = vcmask 254976  }
 0x217   : > { %6393 = vmatprep.subr.bf16.mxu1 %v7137_v0  ;;  %v7139_v2 = vld [vmem:[#allocation11 + $0x10] sm:$0xff]   ;;  %v913_v6 = vld [vmem:[%s8609_s26 + $0x10] sm:$0x3]  ;;  %v5972_v8 = vld [vmem:[#allocation13] ss:$0 sm:$0xff]  ;;  %vm1009_vm2 = vcmask 261120  }
 0x218   : > { %6394 = vmatpush3.bf16.msra.mxu1 %v7137_v0  ;;  %v911_v3 = vld [vmem:[%s8609_s26] sm:$0xff]  ;;  %v912_v4 = vld [vmem:[%s8609_s26 + $0x8] sm:$0xff]  ;;  %v921_v7 = vpack.c.bf16 %v913_v6, %v913_v6  ;;  %v8666_v13 = vld [vmem:[%s8617_s14] sm:$0xff]  ;;  %v7994_v42 = vmov 0.0   ;;  %vm7995_vm3 = vmmov 0   ;;  %vm1478_vm14 = vcmask 1040384  }
 0x219   : > { %6395 = vmatprep.subr.bf16.mxu1 %v7138_v1  ;;  %v920_v5 = vpack.c.bf16 %v912_v4, %v911_v3  ;;  %v8663_v10 = vld [vmem:[%s8617_s14 + $0x10] sm:$0x3]  ;;  %v8670_v18 = vld [vmem:[%s8617_s14 + $0x8] sm:$0xff]  ;;  %v7140_v40 = vld [vmem:[#allocation14] sm:$0xff]   ;;  %6419 = vmatprep.subr.bf16.mxu0 %v7994_v42  ;;  %vm1344_vm15 = vcmask 15360   ;;  %s873_s28 = scalar_lea.vmem [#allocation28], %s8605_s22 }
 0x21a   : > { %v7141_v41 = vld [vmem:[#allocation14 + $0x8] sm:$0xff]   ;;  %6423 = vmatprep.mubr.msk.bf16.mxu0 %vm7995_vm3, %v7994_v42  ;;  %v5978_v54 = vld [vmem:[#allocation13 + $0x1] ss:$0 sm:$0xff]  ;;  %v5979_v60 = vld [vmem:[#allocation13 + $0x2] ss:$0 sm:$0xff]  ;;  %s9667_s24 = sld [smem:[#allocation48_spill]] }
 0x21b   : > { %6399 = vmatprep.mubr.msk.bf16.mxu1 %vm947_vm0, %v920_v5  ;;  %v7142_v4 = vld [vmem:[#allocation14 + $0x10] sm:$0xff]   ;;  %v7143_v5 = vld [vmem:[#allocation14 + $0x18] sm:$0xff]   ;;  %s5621_s0 = sshll.u32 %s873_s28, 4  ;;  %s6944_s9 = smul.u32 384, %s9654_s16  ;;  %s9444_s0 = int_to_ptr.vmem [resolvable:$true] %s5621_s0 }
 0x21c   : > { %6396 = vmatpush3.bf16.msra.mxu1 %v7138_v1  ;;  %v885_v6 = vld [vmem:[%s743_s23] sm:$0x3]  ;;  %s9668_s30 = sld [smem:[#allocation63_spill]]  ;;  %s5603_s22 = scalar_lea.sflag [#allocation4], %s8602_s29 }
 0x21d   : > { %6397 = vmatprep.subr.bf16.mxu1 %v7139_v2  ;;  %s7840_s4 = scalar_lea.vmem %s9444_s0, 384  ;;  %s7996_s26 = smov [#allocation28]  }
 0x21e   : > { %p7841_p6 = scmp.ne.s32.totalorder %s9444_s0, %s7840_s4  ;;  %s7844_s17 = sshll.u32 %s7996_s26, 4  ;;  %s7845_s17 = int_to_ptr.vmem [resolvable:$false] %s7844_s17 }
 0x21f   : > { %s7846_s6 = scalar_lea.vmem %s7845_s17, 768  ;;  %p7847_p13 = scmp.lt.s32.totalorder %s9444_s0, %s7845_s17 }
 0x220   : > { %6398 = vmatpush3.bf16.msra.mxu1 %v7139_v2  ;;  %p9669_p3 = scmp.ne.s32.totalorder %s9667_s24, 0  ;;  %p7848_p5 = scmp.lt.s32.totalorder %s7846_s6, %s7840_s4 }
 0x221   : > { %6403 = vmatprep.subr.bf16.mxu1 %v7140_v40 }
 0x222   : > { %s9450_s1 = scalar_lea.hbm %s9668_s30, %s6944_s9  ;;  %p7842_p2 = pnand %p7841_p6, %p9669_p3 }
 0x223   : > { %6400 = vmatmul.mubr.msk.bf16.vlgmr.msra.gmra.mrb[0].mxu1 %vm947_vm0, %v921_v7  ;;  %v8701_v7 = vpack.c.bf16 %v885_v6, %v885_v6  ;;  %p7849_p9 = por %p7848_p5, %p7847_p13 }
 0x224   : > { %6404 = vmatpush3.bf16.msra.mxu1 %v7140_v40  ;;  %p7843_p10 = pneg %p7842_p2 }
 0x225   : > { %6405 = vmatprep.subr.bf16.mxu1 %v7141_v41 }
 0x226   : > { %p7850_p4 = pnand %p7849_p9, %p7843_p10 }
 0x228   : > { %6406 = vmatpush3.bf16.msra.mxu1 %v7141_v41 }
 0x229   : > { %6411 = vmatprep.subr.bf16.mxu1 %v7994_v42 }
 0x2f6   : > { %v6401_v9 = vpop.f32.mrb[0].mxu1 }
 0x2f7   : > { %v997_v11 = vadd.f32 %v6401_v9, %v5972_v8  ;;  %v988_v12 = vpop.f32.mrb[1].mxu1  ;;  %v7145_v9 = vld [vmem:[#allocation14 + $0x28] sm:$0xff]  }
 0x2f8   : > { %v989_v14 = vadd.f32 %v5972_v8, %v988_v12  ;;  %v6402_v15 = vpop.f32.mrb[2].mxu1 }
 0x2f9   : > { %v991_v16 = vpop.f32.mrb[3].mxu1  ;;  %v1008_v17 = vadd.f32 %v997_v11, %v8663_v10  ;;  %v889_v11 = vlaneseq  ;;  %v5980_v15 = vld [vmem:[#allocation16] ss:$0 sm:$0xff] }
 0x2fa   : > { %v992_v19 = vadd.f32 %v5972_v8, %v991_v16  ;;  %v1006_v20 = vadd.f32 %v989_v14, %v8666_v13  ;;  %v7144_v8 = vld [vmem:[#allocation14 + $0x20] sm:$0xff]  }
 0x2fb   : > { %v1017_v21 = vsel %vm1016_vm1, %v1008_v17, 0.0  ;;  %6420 = vmatpush3.bf16.msra.mxu0 %v7144_v8  ;;  %v890_v12 = vand.u32 127, %v889_v11 }
 0x2fc   : > { %1018 = vadd.xlane.f32.xlu1 %v1017_v21  ;;  %v1010_v22 = vsel %vm1009_vm2, %v1006_v20, 0.0  ;;  %v1007_v23 = vadd.f32 %v992_v19, %v8670_v18  ;;  %6421 = vmatprep.subr.bf16.mxu0 %v7994_v42 }
 0x2fd   : > { %1011 = vadd.xlane.f32.xlu0 %v1010_v22  ;;  %vm896_vm4 = vcmp.ge.s32.totalorder %v890_v12, 8  ;;  %vm897_vm5 = vcmp.lt.s32.totalorder %v890_v12, 16  ;;  %vm901_vm6 = vcmp.ge.s32.totalorder %v890_v12, 16  ;;  %vm902_vm7 = vcmp.lt.s32.totalorder %v890_v12, 24 }
 0x2fe   : > { %v1013_v24 = vsel %vm1009_vm2, %v1007_v23, 0.0  ;;  %vm898_vm8 = vmand %vm896_vm4, %vm897_vm5  ;;  %vm892_vm9 = vcmp.lt.s32.totalorder %v890_v12, 8  ;;  %vm906_vm11 = vcmp.ge.s32.totalorder %v890_v12, 24  ;;  %vm907_vm12 = vcmp.lt.s32.totalorder %v890_v12, 32 }
 0x2ff   : > { %6422 = vmatpush3.bf16.msra.mxu0 %v7145_v9  ;;  %vm903_vm10 = vmand %vm901_vm6, %vm902_vm7  ;;  %vm1351_vm4 = vcmask 9216   ;;  %vm2578_vm5 = vcmask 140288   ;;  %vm2661_vm6 = vcmask 146432  }
 0x300   : > { %vm908_vm13 = vmand %vm906_vm11, %vm907_vm12 }
 0x301   : > { %1014 = vadd.xlane.f32.xlu0 %v1013_v24  ;;  %v8727_v40 = vsel %vm908_vm13, 1.0, %v7994_v42 }
 0x302   : > { %6424 = vmatmul.mubr.msk.bf16.vlgmr.msra.gmra.mrb[0].mxu0 %vm1009_vm2, %v8701_v7 }
 0x389   : > { %v1019_v25 = vpop.xlane.xlu1 %1018 }
 0x38a   : > { %v1023_v26 = vmul.f32 0.03125, %v1019_v25  ;;  %v1012_v27 = vpop.xlane.xlu0 %1011  ;;  %v8711_v25 = vsel %vm892_vm9, 1.0, %v7994_v42 }
 0x38b   : > { %v1021_v28 = vmul.f32 0.03125, %v1012_v27  ;;  %v8717_v27 = vsel %vm903_vm10, 1.0, %v7994_v42 }
 0x38c   : > { %v1026_v29 = vsub.f32 %v1008_v17, %v1023_v26  ;;  %v8714_v26 = vsel %vm898_vm8, 1.0, %v7994_v42 }
 0x38d   : > { %v1024_v30 = vsub.f32 %v1006_v20, %v1021_v28 }
 0x38e   : > { %v1015_v31 = vpop.xlane.xlu0 %1014  ;;  %v1029_v36 = vmul.f32 %v1026_v29, %v1026_v29 }
 0x38f   : > { %v1022_v32 = vmul.f32 0.03125, %v1015_v31  ;;  %v1027_v33 = vmul.f32 %v1024_v30, %v1024_v30 }
 0x390   : > { %v1036_v38 = vsel %vm1016_vm1, %v1029_v36, 0.0 }
 0x391   : > { %v1025_v34 = vsub.f32 %v1007_v23, %v1022_v32  ;;  %v1030_v35 = vsel %vm1009_vm2, %v1027_v33, 0.0  ;;  %v5985_v23 = vld [vmem:[#allocation16 + $0x1] ss:$0 sm:$0xff] }
 0x392   : > { %1031 = vadd.xlane.f32.xlu1 %v1030_v35 }
 0x393   : > { %v1028_v37 = vmul.f32 %v1025_v34, %v1025_v34 }
 0x395   : > { %v1033_v39 = vsel %vm1009_vm2, %v1028_v37, 0.0 }
 0x396   : > { %1037 = vadd.xlane.f32.xlu1 %v1036_v38  ;;  %1034 = vadd.xlane.f32.xlu0 %v1033_v39 }
 0x41f   : > { %v1032_v43 = vpop.xlane.xlu1 %1031 }
 0x420   : > { %v1039_v44 = vmul.f32 0.03125, %v1032_v43 }
 0x422   : > { %v1042_v45 = vadd.f32 1e-05, %v1039_v44 }
 0x423   : > { %v1038_v46 = vpop.xlane.xlu1 %1037  ;;  %v1035_v47 = vpop.xlane.xlu0 %1034 }
 0x424   : > { %7214 = vrsqrt.f32 %v1042_v45  ;;  %v1041_v48 = vmul.f32 0.03125, %v1038_v46  ;;  %v1040_v49 = vmul.f32 0.03125, %v1035_v47 }
 0x426   : > { %v1044_v50 = vadd.f32 1e-05, %v1041_v48  ;;  %v1043_v51 = vadd.f32 1e-05, %v1040_v49  ;;  %v5989_v48 = vld [vmem:[#allocation16 + $0x2] ss:$0 sm:$0xff] }
 0x427   : > { %v1276_v49 = vpop.f32.mrb[0].mxu0 }
 0x428   : > { %7216 = vrsqrt.f32 %v1044_v50  ;;  %v8740_v50 = vadd.f32 %v5989_v48, %v1276_v49 }
 0x429   : > { %7218 = vrsqrt.f32 %v1043_v51  ;;  %v6425_v51 = vpop.f32.mrb[1].mxu0 }
 0x42e   : > { %v7215_v52 = vpop.eup %7214 }
 0x42f   : > { %v1048_v53 = vmul.f32 %v7215_v52, %v1024_v30  ;;  %v1279_v52 = vpop.f32.mrb[2].mxu0 }
 0x431   : > { %v1057_v59 = vmul.f32 %v5978_v54, %v1048_v53  ;;  %v6426_v53 = vpop.f32.mrb[3].mxu0 }
 0x432   : > { %v7217_v55 = vpop.eup %7216 }
 0x433   : > { %v7219_v56 = vpop.eup %7218  ;;  %v1050_v57 = vmul.f32 %v7217_v55, %v1026_v29  ;;  %v8686_v0 = vadd.f32 %v5979_v60, %v1057_v59  ;;  %v1283_v55 = vmul.f32 %v8711_v25, %v8740_v50 }
 0x434   : > { %v1049_v58 = vmul.f32 %v7219_v56, %v1025_v34 }
 0x435   : > { %v1059_v61 = vmul.f32 %v5978_v54, %v1050_v57  ;;  %v8746_v57 = vpack.c.bf16 %v1283_v55, %v1283_v55 }
 0x436   : > { %v1058_v62 = vmul.f32 %v5978_v54, %v1049_v58  ;;  %v1383_v54 = vmul.f32 %v8714_v26, %v8740_v50 }
 0x437   : > { %v8684_v63 = vadd.f32 %v5979_v60, %v1059_v61 }
 0x438   : > { %v8688_v1 = vadd.f32 %v5979_v60, %v1058_v62  ;;  %v1471_v56 = vpack.c.bf16 %v1383_v54, %v1383_v54 }
 0x439   : > { %v1074_v2 = vpack.c.bf16 %v8684_v63, %v8684_v63 }
 0x43a   : > { %v1073_v3 = vpack.c.bf16 %v8688_v1, %v8686_v0  ;;  %v1480_v58 = vsel %vm1478_vm14, %v1471_v56, 0 }
 0x43c   : > { %6407 = vmatprep.mubr.msk.bf16.mxu1 %vm1009_vm2, %v1073_v3 }
 0x43d   : > { %6408 = vmatmul.mubr.msk.bf16.vlgmr.msra.gmra.mrb[4].mxu1 %vm1009_vm2, %v1074_v2 }
 0x43e   : > { %6412 = vmatpush3.bf16.msra.mxu1 %v7142_v4  ;;  %6415 = vmatprep.mubr.msk.bf16.mxu1 %vm7995_vm3, %v7994_v42 }
 0x43f   : > { %6413 = vmatprep.subr.bf16.mxu1 %v7994_v42 }
 0x442   : > { %6414 = vmatpush3.bf16.msra.mxu1 %v7143_v5 }
 0x445   : > { %6416 = vmatmul.mubr.msk.bf16.vlgmr.msra.gmra.mrb[8].mxu1 %vm1009_vm2, %v8701_v7 }
 0x510   : > { %v6409_v14 = vpop.f32.mrb[4].mxu1 }
 0x511   : > { %v1134_v16 = vpop.f32.mrb[5].mxu1  ;;  %v1143_v41 = vadd.f32 %v6409_v14, %v5980_v15 }
 0x512   : > { %v6410_v17 = vpop.f32.mrb[6].mxu1  ;;  %v1135_v20 = vadd.f32 %v5980_v15, %v1134_v16 }
 0x513   : > { %v1137_v19 = vpop.f32.mrb[7].mxu1  ;;  %v1285_v44 = vpack.c.bf16 %v1143_v41, %v1143_v41 }
 0x514   : > { %v1138_v21 = vadd.f32 %v5980_v15, %v1137_v19 }
 0x516   : > { %v1284_v22 = vpack.c.bf16 %v1138_v21, %v1135_v20 }
 0x518   : > { %v1211_v24 = vpop.f32.mrb[8].mxu1  ;;  %6429 = vmatprep.mubr.msk.bf16.mxu1 %vm1009_vm2, %v1284_v22  ;;  %6435 = vmatprep.mubr.msk.bf16.mxu0 %vm1009_vm2, %v1284_v22 }
 0x519   : > { %v1212_v28 = vadd.f32 %v5985_v23, %v1211_v24  ;;  %v6417_v29 = vpop.f32.mrb[9].mxu1 }
 0x51a   : > { %v1214_v30 = vpop.f32.mrb[10].mxu1 }
 0x51b   : > { %v6418_v31 = vpop.f32.mrb[11].mxu1  ;;  %v1282_v32 = vmul.f32 %v8711_v25, %v1212_v28  ;;  %v1382_v33 = vmul.f32 %v8714_v26, %v1212_v28  ;;  %v1587_v34 = vmul.f32 %v8717_v27, %v1212_v28  ;;  %v1737_v43 = vmul.f32 %v8727_v40, %v1212_v28 }
 0x51d   : > { %v1286_v35 = vpack.c.bf16 %v1282_v32, %v1282_v32  ;;  %v1384_v36 = vpack.c.bf16 %v1382_v33, %v1382_v33  ;;  %v1589_v39 = vpack.c.bf16 %v1587_v34, %v1587_v34  ;;  %v1739_v46 = vpack.c.bf16 %v1737_v43, %v1737_v43 }
 0x51f   : > { %6923 = vmatprep.subr.msk.bf16.mxu1 %vm1009_vm2, %v1286_v35  ;;  %6924 = vmatprep.subr.msk.bf16.mxu0 %vm1009_vm2, %v1384_v36  ;;  %v1294_v37 = vsel %vm1009_vm2, %v1286_v35, 0  ;;  %v1386_v38 = vsel %vm1009_vm2, %v1384_v36, 0  ;;  %v1591_v45 = vsel %vm1009_vm2, %v1589_v39, 0  ;;  %v1741_v47 = vsel %vm1009_vm2, %v1739_v46, 0 }
 0x520   : > { %6428 = vmatpush3.bf16.xpose.msra.mxu1 %v1294_v37  ;;  %6434 = vmatpush3.bf16.xpose.msra.mxu0 %v1386_v38 }
 0x521   : > { %6927 = vmatprep.subr.msk.bf16.mxu0 %vm1009_vm2, %v1589_v39  ;;  %6925 = vmatprep.subr.msk.bf16.mxu1 %vm1478_vm14, %v1471_v56 }
 0x527   : > { %6430 = vmatmul.mubr.msk.bf16.vlgmr.msra.gmra.mrb[12].mxu1 %vm1009_vm2, %v1285_v44  ;;  %6436 = vmatmul.mubr.msk.bf16.vlgmr.msra.gmra.mrb[4].mxu0 %vm1009_vm2, %v1285_v44 }
 0x528   : > { %6452 = vmatpush3.bf16.xpose.msra.mxu0 %v1591_v45  ;;  %6453 = vmatprep.mubr.msk.bf16.mxu0 %vm1009_vm2, %v1284_v22 }
 0x529   : > { %6929 = vmatprep.subr.msk.bf16.mxu0 %vm1009_vm2, %v1739_v46  ;;  %6440 = vmatpush3.bf16.msra.mxu1 %v1480_v58 }
 0x52a   : > { %6926 = vmatprep.subr.msk.bf16.mxu1 %vm1478_vm14, %v8746_v57 }
 0x52f   : > { %6454 = vmatmul.mubr.msk.bf16.vlgmr.msra.gmra.mrb[8].mxu0 %vm1009_vm2, %v1285_v44 }
 0x530   : > { %6464 = vmatpush3.bf16.xpose.msra.mxu0 %v1741_v47  ;;  %6465 = vmatprep.mubr.msk.bf16.mxu0 %vm1009_vm2, %v1284_v22 }
 0x537   : > { %6466 = vmatmul.mubr.msk.bf16.vlgmr.msra.gmra.mrb[12].mxu0 %vm1009_vm2, %v1285_v44 }
 0x5fa   : > { %v8752_v59 = vpop.f32.mrb[12].mxu1  ;;  %v6437_v60 = vpop.f32.mrb[4].mxu0 }
 0x5fb   : > { %v1330_v61 = vpop.f32.mrb[13].mxu1  ;;  %v1422_v62 = vpop.f32.mrb[5].mxu0  ;;  %v1442_v9 = vsel %vm1351_vm4, %v6437_v60, -inf  ;;  %v1352_v19 = vsel %vm1351_vm4, %v8752_v59, -inf }
 0x5fc   : > { %v6432_v2 = vpop.f32.mrb[14].mxu1  ;;  %v6438_v3 = vpop.f32.mrb[6].mxu0  ;;  %v1436_v4 = vsel %vm1344_vm15, %v1422_v62, -inf  ;;  %v1345_v12 = vsel %vm1344_vm15, %v1330_v61, -inf }
 0x5fd   : > { %1437 = vmax.xlane.f32.xlu0 %v1436_v4  ;;  %v1333_v5 = vpop.f32.mrb[15].mxu1  ;;  %v1425_v6 = vpop.f32.mrb[7].mxu0 }
 0x5fe   : > { %v1439_v8 = vsel %vm1344_vm15, %v1425_v6, -inf  ;;  %v1348_v16 = vsel %vm1344_vm15, %v1333_v5, -inf }
 0x5ff   : > { %1440 = vmax.xlane.f32.xlu1 %v1439_v8 }
 0x601   : > { %1443 = vmax.xlane.f32.xlu0 %v1442_v9 }
 0x602   : > { %v8757_v11 = vpop.f32.mrb[8].mxu0 }
 0x603   : > { %v1627_v14 = vpop.f32.mrb[9].mxu0  ;;  %1346 = vmax.xlane.f32.xlu1 %v1345_v12  ;;  %v1647_v28 = vsel %vm1351_vm4, %v8757_v11, -inf }
 0x604   : > { %v6456_v15 = vpop.f32.mrb[10].mxu0  ;;  %v1641_v20 = vsel %vm1344_vm15, %v1627_v14, -inf }
 0x605   : > { %v1630_v17 = vpop.f32.mrb[11].mxu0  ;;  %1349 = vmax.xlane.f32.xlu0 %v1348_v16 }
 0x606   : > { %v1644_v22 = vsel %vm1344_vm15, %v1630_v17, -inf }
 0x607   : > { %1353 = vmax.xlane.f32.xlu1 %v1352_v19 }
 0x609   : > { %1642 = vmax.xlane.f32.xlu0 %v1641_v20 }
 0x60a   : > { %v8764_v21 = vpop.f32.mrb[12].mxu0 }
 0x60b   : > { %v1777_v23 = vpop.f32.mrb[13].mxu0  ;;  %1645 = vmax.xlane.f32.xlu1 %v1644_v22  ;;  %v1797_v32 = vsel %vm1351_vm4, %v8764_v21, -inf }
 0x60c   : > { %v6468_v24 = vpop.f32.mrb[14].mxu0  ;;  %v1791_v30 = vsel %vm1344_vm15, %v1777_v23, -inf }
 0x60d   : > { %v8769_v29 = vpop.f32.mrb[15].mxu0  ;;  %1648 = vmax.xlane.f32.xlu0 %v1647_v28 }
 0x60e   : > { %v1794_v31 = vsel %vm1344_vm15, %v8769_v29, -inf }
 0x60f   : > { %1792 = vmax.xlane.f32.xlu1 %v1791_v30 }
 0x611   : > { %1795 = vmax.xlane.f32.xlu0 %v1794_v31 }
 0x613   : > { %1798 = vmax.xlane.f32.xlu1 %v1797_v32 }
 0x68a   : > { %v1438_v33 = vpop.xlane.xlu0 %1437 }
 0x68b   : > { %v1445_v34 = vsub.f32 %v1422_v62, %v1438_v33 }
 0x68c   : > { %v1441_v35 = vpop.xlane.xlu1 %1440 }
 0x68d   : > { %v1448_v36 = vmul.f32 1.442695, %v1445_v34  ;;  %v1446_v37 = vsub.f32 %v1425_v6, %v1441_v35 }
 0x68e   : > { %v1444_v38 = vpop.xlane.xlu0 %1443 }
 0x68f   : > { %7220 = vpow2.f32 %v1448_v36  ;;  %v1450_v39 = vmul.f32 1.442695, %v1446_v37  ;;  %v1447_v41 = vsub.f32 %v6437_v60, %v1444_v38 }
 0x690   : > { %v1347_v43 = vpop.xlane.xlu1 %1346 }
 0x691   : > { %7222 = vpow2.f32 %v1450_v39  ;;  %v1452_v44 = vmul.f32 1.442695, %v1447_v41  ;;  %v1355_v45 = vsub.f32 %v1330_v61, %v1347_v43 }
 0x692   : > { %v1350_v46 = vpop.xlane.xlu0 %1349 }
 0x693   : > { %7224 = vpow2.f32 %v1452_v44  ;;  %v1358_v47 = vmul.f32 1.442695, %v1355_v45  ;;  %v1356_v48 = vsub.f32 %v1333_v5, %v1350_v46  ;;  %v7146_v45 = vld [vmem:[#allocation14 + $0x30] sm:$0xff]  }
 0x694   : > { %v1354_v49 = vpop.xlane.xlu1 %1353  ;;  %6475 = vmatprep.subr.bf16.mxu0 %v7146_v45 }
 0x695   : > { %7226 = vpow2.f32 %v1358_v47  ;;  %v1360_v51 = vmul.f32 1.442695, %v1356_v48  ;;  %v1357_v52 = vsub.f32 %v8752_v59, %v1354_v49  ;;  %6476 = vmatpush3.bf16.msra.mxu0 %v7146_v45 }
 0x696   : > { %v1643_v53 = vpop.xlane.xlu0 %1642 }
 0x697   : > { %7228 = vpow2.f32 %v1360_v51  ;;  %v1362_v54 = vmul.f32 1.442695, %v1357_v52  ;;  %v1650_v55 = vsub.f32 %v1627_v14, %v1643_v53 }
 0x698   : > { %v1646_v56 = vpop.xlane.xlu1 %1645 }
 0x699   : > { %v8777_v58 = vpop.eup %7220  ;;  %7230 = vpow2.f32 %v1362_v54  ;;  %v1653_v60 = vmul.f32 1.442695, %v1650_v55  ;;  %v1651_v62 = vsub.f32 %v1630_v17, %v1646_v56 }
 0x69a   : > { %v1649_v61 = vpop.xlane.xlu0 %1648  ;;  %v1454_v2 = vsel %vm1344_vm15, %v8777_v58, 0.0 }
 0x69b   : > { %v8781_v3 = vpop.eup %7222  ;;  %7232 = vpow2.f32 %v1653_v60  ;;  %v1655_v4 = vmul.f32 1.442695, %v1651_v62  ;;  %v1652_v59 = vsub.f32 %v8757_v11, %v1649_v61  ;;  %1455 = vadd.xlane.f32.xlu0 %v1454_v2 }
 0x69c   : > { %v1793_v5 = vpop.xlane.xlu1 %1792  ;;  %v1457_v6 = vsel %vm1344_vm15, %v8781_v3, 0.0 }
 0x69d   : > { %v8786_v8 = vpop.eup %7224  ;;  %7234 = vpow2.f32 %v1655_v4  ;;  %v1657_v9 = vmul.f32 1.442695, %v1652_v59  ;;  %v1800_v12 = vsub.f32 %v1777_v23, %v1793_v5  ;;  %1458 = vadd.xlane.f32.xlu1 %v1457_v6  ;;  %v1588_v59 = vmul.f32 %v8717_v27, %v8740_v50 }
 0x69e   : > { %v1796_v14 = vpop.xlane.xlu0 %1795  ;;  %v1460_v15 = vsel %vm1351_vm4, %v8786_v8, 0.0 }
 0x69f   : > { %v8790_v16 = vpop.eup %7226  ;;  %7236 = vpow2.f32 %v1657_v9  ;;  %v1803_v17 = vmul.f32 1.442695, %v1800_v12  ;;  %v1801_v11 = vsub.f32 %v8769_v29, %v1796_v14  ;;  %1461 = vadd.xlane.f32.xlu0 %v1460_v15 }
 0x6a0   : > { %v1799_v19 = vpop.xlane.xlu1 %1798  ;;  %v1364_v20 = vsel %vm1344_vm15, %v8790_v16, 0.0 }
 0x6a1   : > { %v8795_v22 = vpop.eup %7228  ;;  %7238 = vpow2.f32 %v1803_v17  ;;  %v1805_v23 = vmul.f32 1.442695, %v1801_v11  ;;  %v1802_v24 = vsub.f32 %v8764_v21, %v1799_v19  ;;  %1365 = vadd.xlane.f32.xlu1 %v1364_v20 }
 0x6a2   : > { %v1367_v28 = vsel %vm1344_vm15, %v8795_v22, 0.0 }
 0x6a3   : > { %v8800_v30 = vpop.eup %7230  ;;  %7240 = vpow2.f32 %v1805_v23  ;;  %v1807_v31 = vmul.f32 1.442695, %v1802_v24  ;;  %1368 = vadd.xlane.f32.xlu0 %v1367_v28 }
 0x6a4   : > { %v1370_v29 = vsel %vm1351_vm4, %v8800_v30, 0.0 }
 0x6a5   : > { %v8804_v32 = vpop.eup %7232  ;;  %7242 = vpow2.f32 %v1807_v31  ;;  %1371 = vadd.xlane.f32.xlu1 %v1370_v29 }
 0x6a6   : > { %v1659_v33 = vsel %vm1344_vm15, %v8804_v32, 0.0 }
 0x6a7   : > { %v8808_v21 = vpop.eup %7234  ;;  %1660 = vadd.xlane.f32.xlu0 %v1659_v33 }
 0x6a8   : > { %v1662_v34 = vsel %vm1344_vm15, %v8808_v21, 0.0 }
 0x6a9   : > { %v8812_v35 = vpop.eup %7236  ;;  %1663 = vadd.xlane.f32.xlu1 %v1662_v34 }
 0x6aa   : > { %v1665_v36 = vsel %vm1351_vm4, %v8812_v35, 0.0 }
 0x6ab   : > { %v8816_v37 = vpop.eup %7238  ;;  %1666 = vadd.xlane.f32.xlu0 %v1665_v36 }
 0x6ac   : > { %v1809_v38 = vsel %vm1344_vm15, %v8816_v37, 0.0 }
 0x6ad   : > { %v8820_v39 = vpop.eup %7240  ;;  %1810 = vadd.xlane.f32.xlu1 %v1809_v38 }
 0x6ae   : > { %v1812_v41 = vsel %vm1344_vm15, %v8820_v39, 0.0 }
 0x6af   : > { %v8824_v43 = vpop.eup %7242  ;;  %1813 = vadd.xlane.f32.xlu0 %v1812_v41 }
 0x6b0   : > { %v1815_v44 = vsel %vm1351_vm4, %v8824_v43, 0.0 }
 0x6b1   : > { %1816 = vadd.xlane.f32.xlu1 %v1815_v44 }
 0x728   : > { %v1456_v46 = vpop.xlane.xlu0 %1455 }
 0x729   : > { %7244 = vrcp.f32 %v1456_v46 }
 0x72a   : > { %v1459_v47 = vpop.xlane.xlu1 %1458 }
 0x72b   : > { %7246 = vrcp.f32 %v1459_v47 }
 0x72c   : > { %v1462_v48 = vpop.xlane.xlu0 %1461 }
 0x72d   : > { %7248 = vrcp.f32 %v1462_v48 }
 0x72e   : > { %v1366_v49 = vpop.xlane.xlu1 %1365 }
 0x72f   : > { %7250 = vrcp.f32 %v1366_v49 }
 0x730   : > { %v1369_v51 = vpop.xlane.xlu0 %1368 }
 0x731   : > { %7252 = vrcp.f32 %v1369_v51 }
 0x732   : > { %v1372_v52 = vpop.xlane.xlu1 %1371 }
 0x733   : > { %v7245_v53 = vpop.eup %7244  ;;  %7254 = vrcp.f32 %v1372_v52 }
 0x734   : > { %v1661_v54 = vpop.xlane.xlu0 %1660  ;;  %v1466_v60 = vmul.f32 %v7245_v53, %v8777_v58  ;;  %v1537_v58 = vsel %vm1478_vm14, %v8746_v57, 0 }
 0x735   : > { %v7247_v55 = vpop.eup %7246 }
 0x736   : > { %v1664_v56 = vpop.xlane.xlu1 %1663  ;;  %v1467_v62 = vmul.f32 %v7247_v55, %v8781_v3  ;;  %v1676_v3 = vpack.c.bf16 %v1588_v59, %v1588_v59 }
 0x737   : > { %v7249_v61 = vpop.eup %7248  ;;  %7256 = vrcp.f32 %v1664_v56 }
 0x738   : > { %v1468_v2 = vmul.f32 %v7249_v61, %v8786_v8  ;;  %7258 = vrcp.f32 %v1661_v54  ;;  %v1469_v4 = vpack.c.bf16 %v1467_v62, %v1466_v60  ;;  %v1667_v6 = vpop.xlane.xlu0 %1666  ;;  %v1684_v29 = vsel %vm1478_vm14, %v1676_v3, 0  ;;  %v6009_v54 = vld [vmem:[#allocation16 + $0x3] ss:$0 sm:$0xff] }
 0x739   : > { %v7251_v5 = vpop.eup %7250  ;;  %7260 = vrcp.f32 %v1667_v6 }
 0x73a   : > { %6441 = vmatprep.mubr.msk.bf16.mxu1 %vm1344_vm15, %v1469_v4  ;;  %v1470_v9 = vpack.c.bf16 %v1468_v2, %v1468_v2  ;;  %v1376_v14 = vmul.f32 %v7251_v5, %v8790_v16  ;;  %v1811_v20 = vpop.xlane.xlu1 %1810  ;;  %v1738_v16 = vmul.f32 %v8727_v40, %v8740_v50 }
 0x73b   : > { %v7253_v12 = vpop.eup %7252 }
 0x73c   : > { %6442 = vmatmul.mubr.msk.bf16.vlgmr.msra.gmra.mrb[16].mxu1 %vm1344_vm15, %v1470_v9  ;;  %v1377_v8 = vmul.f32 %v7253_v12, %v8795_v22  ;;  %v1814_v11 = vpop.xlane.xlu0 %1813  ;;  %v1826_v33 = vpack.c.bf16 %v1738_v16, %v1738_v16  ;;  %v7148_v16 = vld [vmem:[#allocation19] sm:$0xff]  }
 0x73d   : > { %6446 = vmatpush3.bf16.msra.mxu1 %v1537_v58  ;;  %v7255_v17 = vpop.eup %7254  ;;  %7262 = vrcp.f32 %v1814_v11 }
 0x73e   : > { %6928 = vmatprep.subr.msk.bf16.mxu1 %vm1478_vm14, %v1676_v3  ;;  %v1379_v15 = vpack.c.bf16 %v1377_v8, %v1376_v14  ;;  %v1378_v24 = vmul.f32 %v7255_v17, %v8800_v30  ;;  %7264 = vrcp.f32 %v1811_v20  ;;  %v1817_v30 = vpop.xlane.xlu1 %1816  ;;  %v1834_v45 = vsel %vm1478_vm14, %v1826_v33, 0 }
 0x73f   : > { %7266 = vrcp.f32 %v1817_v30  ;;  %v7154_v30 = vld [vmem:[#allocation22 + $0x20] sm:$0xff]  }
 0x740   : > { %6447 = vmatprep.mubr.msk.bf16.mxu1 %vm1344_vm15, %v1379_v15  ;;  %v1380_v28 = vpack.c.bf16 %v1378_v24, %v1378_v24 }
 0x741   : > { %v7257_v19 = vpop.eup %7256 }
 0x742   : > { %v7259_v23 = vpop.eup %7258  ;;  %v1672_v57 = vmul.f32 %v7257_v19, %v8808_v21 }
 0x743   : > { %v1671_v22 = vmul.f32 %v7259_v23, %v8804_v32  ;;  %v7261_v21 = vpop.eup %7260 }
 0x744   : > { %v1673_v50 = vmul.f32 %v7261_v21, %v8812_v35  ;;  %v7147_v35 = vld [vmem:[#allocation14 + $0x38] sm:$0xff]   ;;  %v7155_v21 = vld [vmem:[#allocation22 + $0x28] sm:$0xff]  }
 0x745   : > { %v1674_v31 = vpack.c.bf16 %v1672_v57, %v1671_v22  ;;  %6477 = vmatprep.subr.bf16.mxu0 %v7147_v35  ;;  %v7149_v22 = vld [vmem:[#allocation19 + $0x8] sm:$0xff]  }
 0x746   : > { %v1675_v41 = vpack.c.bf16 %v1673_v50, %v1673_v50  ;;  %6478 = vmatpush3.bf16.msra.mxu0 %v7147_v35 }
 0x747   : > { %v7263_v34 = vpop.eup %7262  ;;  %6483 = vmatprep.subr.bf16.mxu0 %v7148_v16 }
 0x748   : > { %6448 = vmatmul.mubr.msk.bf16.vlgmr.msra.gmra.mrb[16].mxu1 %vm1344_vm15, %v1380_v28  ;;  %v7265_v36 = vpop.eup %7264  ;;  %v1822_v32 = vmul.f32 %v7263_v34, %v8820_v39  ;;  %v7150_v28 = vld [vmem:[#allocation22] sm:$0xff]  }
 0x749   : > { %6458 = vmatpush3.bf16.msra.mxu1 %v1684_v29  ;;  %6459 = vmatprep.mubr.msk.bf16.mxu1 %vm1344_vm15, %v1674_v31  ;;  %v1821_v38 = vmul.f32 %v7265_v36, %v8816_v37  ;;  %v7267_v46 = vpop.eup %7266  ;;  %v7151_v31 = vld [vmem:[#allocation22 + $0x8] sm:$0xff]   ;;  %v7152_v29 = vld [vmem:[#allocation22 + $0x10] sm:$0xff]  }
 0x74a   : > { %6930 = vmatprep.subr.msk.bf16.mxu1 %vm1478_vm14, %v1826_v33  ;;  %v1823_v47 = vmul.f32 %v7267_v46, %v8824_v43  ;;  %v7153_v33 = vld [vmem:[#allocation22 + $0x18] sm:$0xff]  }
 0x74b   : > { %v1824_v44 = vpack.c.bf16 %v1822_v32, %v1821_v38 }
 0x74c   : > { %v1825_v48 = vpack.c.bf16 %v1823_v47, %v1823_v47 }
 0x754   : > { %6460 = vmatmul.mubr.msk.bf16.vlgmr.msra.gmra.mrb[16].mxu1 %vm1344_vm15, %v1675_v41 }
 0x755   : > { %6470 = vmatpush3.bf16.msra.mxu1 %v1834_v45  ;;  %6471 = vmatprep.mubr.msk.bf16.mxu1 %vm1344_vm15, %v1824_v44 }
 0x756   : > { %6491 = vmatprep.subr.bf16.mxu1 %v7150_v28 }
 0x760   : > { %6472 = vmatmul.mubr.msk.bf16.vlgmr.msra.gmra.mrb[16].mxu1 %vm1344_vm15, %v1825_v48  ;;  %v6014_v48 = vld [vmem:[#allocation17] ss:$0 sm:$0xff] }
 0x761   : > { %6492 = vmatpush3.bf16.msra.mxu1 %v7150_v28 }
 0x762   : > { %6493 = vmatprep.subr.bf16.mxu1 %v7151_v31 }
 0x765   : > { %6494 = vmatpush3.bf16.msra.mxu1 %v7151_v31 }
 0x766   : > { %6495 = vmatprep.subr.bf16.mxu1 %v7152_v29 }
 0x769   : > { %6496 = vmatpush3.bf16.msra.mxu1 %v7152_v29 }
 0x76a   : > { %6497 = vmatprep.subr.bf16.mxu1 %v7153_v33 }
 0x76d   : > { %6498 = vmatpush3.bf16.msra.mxu1 %v7153_v33 }
 0x76e   : > { %6499 = vmatprep.subr.bf16.mxu1 %v7154_v30 }
 0x771   : > { %6500 = vmatpush3.bf16.msra.mxu1 %v7154_v30 }
 0x772   : > { %6501 = vmatprep.subr.bf16.mxu1 %v7155_v21 }
 0x775   : > { %6502 = vmatpush3.bf16.msra.mxu1 %v7155_v21 }
 0x833   : > { %v6473_v39 = vpop.f32.mrb[16].mxu1 }
 0x834   : > { %v1870_v37 = vpop.f32.mrb[17].mxu1  ;;  %v1893_v53 = vpack.c.bf16 %v6473_v39, %v6473_v39 }
 0x835   : > { %v6474_v49 = vpop.f32.mrb[18].mxu1 }
 0x836   : > { %v1873_v51 = vpop.f32.mrb[19].mxu1 }
 0x837   : > { %v1892_v52 = vpack.c.bf16 %v1873_v51, %v1870_v37 }
 0x839   : > { %6479 = vmatprep.mubr.msk.bf16.mxu0 %vm1009_vm2, %v1892_v52  ;;  %v6015_v52 = vld [vmem:[#allocation17 + $0x1] ss:$0 sm:$0xff] }
 0x83a   : > { %6480 = vmatmul.mubr.msk.bf16.vlgmr.msra.gmra.mrb[16].mxu0 %vm1009_vm2, %v1893_v53 }
 0x83b   : > { %6484 = vmatpush3.bf16.msra.mxu0 %v7148_v16 }
 0x83c   : > { %6485 = vmatprep.subr.bf16.mxu0 %v7149_v22 }
 0x83f   : > { %6486 = vmatpush3.bf16.msra.mxu0 %v7149_v22 }
 0x840   : > { %6511 = vmatprep.subr.bf16.mxu0 %v7994_v42 }
 0x90d   : > { %v6481_v55 = vpop.f32.mrb[16].mxu0 }
 0x90e   : > { %v1954_v56 = vpop.f32.mrb[17].mxu0  ;;  %v1963_v43 = vadd.f32 %v6481_v55, %v6009_v54 }
 0x90f   : > { %v1955_v60 = vadd.f32 %v6009_v54, %v1954_v56  ;;  %v6482_v62 = vpop.f32.mrb[18].mxu0 }
 0x910   : > { %v1957_v61 = vpop.f32.mrb[19].mxu0  ;;  %v1973_v6 = vadd.f32 %v1963_v43, %v8684_v63 }
 0x911   : > { %v1958_v2 = vadd.f32 %v6009_v54, %v1957_v61  ;;  %v1971_v4 = vadd.f32 %v1955_v60, %v8686_v0 }
 0x912   : > { %v1980_v12 = vsel %vm1016_vm1, %v1973_v6, 0.0 }
 0x913   : > { %v1974_v59 = vsel %vm1009_vm2, %v1971_v4, 0.0  ;;  %v1972_v5 = vadd.f32 %v1958_v2, %v8688_v1  ;;  %v7156_v2 = vld [vmem:[#allocation22 + $0x30] sm:$0xff]  }
 0x914   : > { %1975 = vadd.xlane.f32.xlu0 %v1974_v59  ;;  %6503 = vmatprep.subr.bf16.mxu1 %v7156_v2  ;;  %v6016_v59 = vld [vmem:[#allocation20] ss:$0 sm:$0xff] }
 0x915   : > { %v1977_v9 = vsel %vm1009_vm2, %v1972_v5, 0.0  ;;  %6504 = vmatpush3.bf16.msra.mxu1 %v7156_v2 }
 0x916   : > { %1978 = vadd.xlane.f32.xlu1 %v1977_v9 }
 0x918   : > { %1981 = vadd.xlane.f32.xlu0 %v1980_v12 }
 0x9a1   : > { %v1976_v58 = vpop.xlane.xlu0 %1975 }
 0x9a2   : > { %v1983_v3 = vmul.f32 0.03125, %v1976_v58 }
 0x9a3   : > { %v1979_v14 = vpop.xlane.xlu1 %1978 }
 0x9a4   : > { %v1986_v8 = vsub.f32 %v1971_v4, %v1983_v3  ;;  %v1984_v15 = vmul.f32 0.03125, %v1979_v14  ;;  %v7157_v4 = vld [vmem:[#allocation22 + $0x38] sm:$0xff]  }
 0x9a5   : > { %v1982_v17 = vpop.xlane.xlu0 %1981  ;;  %6505 = vmatprep.subr.bf16.mxu1 %v7157_v4 }
 0x9a6   : > { %v1987_v0 = vsub.f32 %v1972_v5, %v1984_v15  ;;  %v1985_v11 = vmul.f32 0.03125, %v1982_v17  ;;  %v1989_v19 = vmul.f32 %v1986_v8, %v1986_v8  ;;  %6506 = vmatpush3.bf16.msra.mxu1 %v7157_v4 }
 0x9a7   : > { %6543 = vmatprep.subr.bf16.mxu1 %v7994_v42 }
 0x9a8   : > { %v1988_v20 = vsub.f32 %v1973_v6, %v1985_v11  ;;  %v1992_v1 = vsel %vm1009_vm2, %v1989_v19, 0.0  ;;  %v1990_v63 = vmul.f32 %v1987_v0, %v1987_v0  ;;  %v6021_v19 = vld [vmem:[#allocation23] ss:$0 sm:$0xff] }
 0x9a9   : > { %1993 = vadd.xlane.f32.xlu1 %v1992_v1 }
 0x9aa   : > { %v1995_v23 = vsel %vm1009_vm2, %v1990_v63, 0.0  ;;  %v1991_v24 = vmul.f32 %v1988_v20, %v1988_v20 }
 0x9ab   : > { %1996 = vadd.xlane.f32.xlu0 %v1995_v23 }
 0x9ac   : > { %v1998_v57 = vsel %vm1016_vm1, %v1991_v24, 0.0 }
 0x9ad   : > { %1999 = vadd.xlane.f32.xlu1 %v1998_v57 }
 0xa36   : > { %v1994_v34 = vpop.xlane.xlu1 %1993 }
 0xa37   : > { %v2001_v36 = vmul.f32 0.03125, %v1994_v34 }
 0xa38   : > { %v1997_v50 = vpop.xlane.xlu0 %1996 }
 0xa39   : > { %v2004_v32 = vadd.f32 1e-05, %v2001_v36  ;;  %v2002_v38 = vmul.f32 0.03125, %v1997_v50 }
 0xa3a   : > { %v2000_v41 = vpop.xlane.xlu1 %1999 }
 0xa3b   : > { %7268 = vrsqrt.f32 %v2004_v32  ;;  %v2005_v44 = vadd.f32 1e-05, %v2002_v38  ;;  %v2003_v45 = vmul.f32 0.03125, %v2000_v41 }
 0xa3d   : > { %7270 = vrsqrt.f32 %v2005_v44  ;;  %v2006_v46 = vadd.f32 1e-05, %v2003_v45 }
 0xa3f   : > { %7272 = vrsqrt.f32 %v2006_v46 }
 0xa45   : > { %v7269_v47 = vpop.eup %7268 }
 0xa46   : > { %v2010_v35 = vmul.f32 %v7269_v47, %v1986_v8 }
 0xa47   : > { %v7271_v39 = vpop.eup %7270 }
 0xa48   : > { %v2011_v37 = vmul.f32 %v7271_v39, %v1987_v0  ;;  %v2019_v49 = vmul.f32 %v6014_v48, %v2010_v35 }
 0xa49   : > { %v7273_v51 = vpop.eup %7272 }
 0xa4a   : > { %v2012_v53 = vmul.f32 %v7273_v51, %v1988_v20  ;;  %v2020_v54 = vmul.f32 %v6014_v48, %v2011_v37  ;;  %v2028_v55 = vadd.f32 %v6015_v52, %v2019_v49  ;;  %v7158_v49 = vld [vmem:[#allocation14 + $0x40] sm:$0xff]   ;;  %v7159_v51 = vld [vmem:[#allocation14 + $0x48] sm:$0xff]  }
 0xa4c   : > { %v2029_v56 = vadd.f32 %v6015_v52, %v2020_v54  ;;  %v2021_v43 = vmul.f32 %v6014_v48, %v2012_v53  ;;  %v7161_v53 = vld [vmem:[#allocation14 + $0x58] sm:$0xff]   ;;  %v7162_v54 = vld [vmem:[#allocation14 + $0x60] sm:$0xff]  }
 0xa4e   : > { %v2053_v60 = vpack.c.bf16 %v2029_v56, %v2028_v55  ;;  %v2030_v62 = vadd.f32 %v6015_v52, %v2021_v43  ;;  %v7160_v52 = vld [vmem:[#allocation14 + $0x50] sm:$0xff]  }
 0xa50   : > { %6487 = vmatprep.mubr.msk.bf16.mxu0 %vm1009_vm2, %v2053_v60  ;;  %v2054_v61 = vpack.c.bf16 %v2030_v62, %v2030_v62 }
 0xa52   : > { %6488 = vmatmul.mubr.msk.bf16.vlgmr.msra.gmra.mrb[20].mxu0 %vm1009_vm2, %v2054_v61 }
 0xa53   : > { %6515 = vmatprep.mubr.msk.bf16.mxu0 %vm7995_vm3, %v7994_v42  ;;  %6512 = vmatpush3.bf16.msra.mxu0 %v7158_v49 }
 0xa54   : > { %6513 = vmatprep.subr.bf16.mxu0 %v7994_v42 }
 0xa57   : > { %6514 = vmatpush3.bf16.msra.mxu0 %v7159_v51 }
 0xa58   : > { %6519 = vmatprep.subr.bf16.mxu0 %v7160_v52 }
 0xa5a   : > { %6516 = vmatmul.mubr.msk.bf16.vlgmr.msra.gmra.mrb[24].mxu0 %vm1009_vm2, %v8701_v7 }
 0xa5b   : > { %6520 = vmatpush3.bf16.msra.mxu0 %v7160_v52 }
 0xa5c   : > { %6521 = vmatprep.subr.bf16.mxu0 %v7161_v53 }
 0xa5f   : > { %6522 = vmatpush3.bf16.msra.mxu0 %v7161_v53 }
 0xa60   : > { %6527 = vmatprep.subr.bf16.mxu0 %v7162_v54 }
 0xb25   : > { %v6489_v5 = vpop.f32.mrb[20].mxu0 }
 0xb26   : > { %v2122_v6 = vadd.f32 %v6489_v5, %v6016_v59  ;;  %v2113_v9 = vpop.f32.mrb[21].mxu0  ;;  %v6030_v5 = vld [vmem:[#allocation17 + $0x2] ss:$0 sm:$0xff] }
 0xb27   : > { %v2114_v12 = vadd.f32 %v6016_v59, %v2113_v9  ;;  %v6490_v58 = vpop.f32.mrb[22].mxu0 }
 0xb28   : > { %v2116_v3 = vpop.f32.mrb[23].mxu0  ;;  %v2129_v8 = vmax.f32 %v2122_v6, 0.0 }
 0xb29   : > { %v2117_v14 = vadd.f32 %v6016_v59, %v2116_v3  ;;  %v2127_v15 = vmax.f32 %v2114_v12, 0.0 }
 0xb2a   : > { %v2131_v11 = vpack.c.bf16 %v2129_v8, %v2129_v8 }
 0xb2b   : > { %v2128_v17 = vmax.f32 %v2117_v14, 0.0  ;;  %v6031_v14 = vld [vmem:[#allocation17 + $0x3] ss:$0 sm:$0xff] }
 0xb2d   : > { %v2130_v0 = vpack.c.bf16 %v2128_v17, %v2127_v15 }
 0xb2f   : > { %6507 = vmatprep.mubr.bf16.mxu1 %v2130_v0 }
 0xb30   : > { %6508 = vmatmul.mubr.bf16.vlgmr.msra.gmra.mrb[20].mxu1 %v2131_v11 }
 0xb31   : > { %6547 = vmatprep.mubr.msk.bf16.mxu1 %vm7995_vm3, %v7994_v42 }
 0xc03   : > { %v6509_v20 = vpop.f32.mrb[20].mxu1 }
 0xc04   : > { %v2229_v1 = vadd.f32 %v6509_v20, %v6021_v19  ;;  %v2220_v63 = vpop.f32.mrb[21].mxu1 }
 0xc05   : > { %v2221_v23 = vadd.f32 %v6021_v19, %v2220_v63  ;;  %v6510_v24 = vpop.f32.mrb[22].mxu1  ;;  %v7163_v63 = vld [vmem:[#allocation14 + $0x68] sm:$0xff]  }
 0xc06   : > { %v2223_v57 = vpop.f32.mrb[23].mxu1  ;;  %v2236_v16 = vadd.f32 %v2229_v1, %v8663_v10 }
 0xc07   : > { %v2234_v22 = vadd.f32 %v2221_v23, %v8666_v13  ;;  %v2224_v28 = vadd.f32 %v6021_v19, %v2223_v57  ;;  %v2360_v23 = vpop.f32.mrb[24].mxu0 }
 0xc08   : > { %v2243_v21 = vadd.f32 %v2236_v16, %v2030_v62  ;;  %v6517_v24 = vpop.f32.mrb[25].mxu0 }
 0xc09   : > { %v2235_v31 = vadd.f32 %v2224_v28, %v8670_v18  ;;  %v2241_v29 = vadd.f32 %v2234_v22, %v2028_v55  ;;  %v2363_v57 = vpop.f32.mrb[26].mxu0  ;;  %v6036_v22 = vld [vmem:[#allocation16 + $0x5] ss:$0 sm:$0xff] }
 0xc0a   : > { %v2250_v36 = vsel %vm1016_vm1, %v2243_v21, 0.0  ;;  %v6518_v16 = vpop.f32.mrb[27].mxu0 }
 0xc0b   : > { %v2244_v33 = vsel %vm1009_vm2, %v2241_v29, 0.0  ;;  %v2242_v30 = vadd.f32 %v2235_v31, %v2029_v56 }
 0xc0c   : > { %2245 = vadd.xlane.f32.xlu0 %v2244_v33 }
 0xc0d   : > { %v2247_v34 = vsel %vm1009_vm2, %v2242_v30, 0.0 }
 0xc0e   : > { %2248 = vadd.xlane.f32.xlu1 %v2247_v34 }
 0xc10   : > { %2251 = vadd.xlane.f32.xlu0 %v2250_v36 }
 0xc99   : > { %v2246_v50 = vpop.xlane.xlu0 %2245 }
 0xc9a   : > { %v2253_v32 = vmul.f32 0.03125, %v2246_v50 }
 0xc9b   : > { %v2249_v10 = vpop.xlane.xlu1 %2248 }
 0xc9c   : > { %v2256_v38 = vsub.f32 %v2241_v29, %v2253_v32  ;;  %v2254_v13 = vmul.f32 0.03125, %v2249_v10 }
 0xc9d   : > { %v2252_v41 = vpop.xlane.xlu0 %2251 }
 0xc9e   : > { %v2257_v44 = vsub.f32 %v2242_v30, %v2254_v13  ;;  %v2255_v18 = vmul.f32 0.03125, %v2252_v41  ;;  %v2259_v45 = vmul.f32 %v2256_v38, %v2256_v38 }
 0xca0   : > { %v2258_v46 = vsub.f32 %v2243_v21, %v2255_v18  ;;  %v2262_v47 = vsel %vm1009_vm2, %v2259_v45, 0.0  ;;  %v2260_v48 = vmul.f32 %v2257_v44, %v2257_v44  ;;  %v6041_v18 = vld [vmem:[#allocation16 + $0x6] ss:$0 sm:$0xff] }
 0xca1   : > { %2263 = vadd.xlane.f32.xlu1 %v2262_v47 }
 0xca2   : > { %v2265_v35 = vsel %vm1009_vm2, %v2260_v48, 0.0  ;;  %v2261_v39 = vmul.f32 %v2258_v46, %v2258_v46 }
 0xca3   : > { %2266 = vadd.xlane.f32.xlu0 %v2265_v35 }
 0xca4   : > { %v2268_v37 = vsel %vm1016_vm1, %v2261_v39, 0.0 }
 0xca5   : > { %2269 = vadd.xlane.f32.xlu1 %v2268_v37 }
 0xd2e   : > { %v2264_v55 = vpop.xlane.xlu1 %2263 }
 0xd2f   : > { %v2271_v56 = vmul.f32 0.03125, %v2264_v55 }
 0xd30   : > { %v2267_v43 = vpop.xlane.xlu0 %2266 }
 0xd31   : > { %v2274_v60 = vadd.f32 1e-05, %v2271_v56  ;;  %v2272_v62 = vmul.f32 0.03125, %v2267_v43 }
 0xd32   : > { %v2270_v61 = vpop.xlane.xlu1 %2269 }
 0xd33   : > { %7274 = vrsqrt.f32 %v2274_v60  ;;  %v2275_v2 = vadd.f32 1e-05, %v2272_v62  ;;  %v2273_v4 = vmul.f32 0.03125, %v2270_v61 }
 0xd35   : > { %7276 = vrsqrt.f32 %v2275_v2  ;;  %v2276_v59 = vadd.f32 1e-05, %v2273_v4 }
 0xd37   : > { %7278 = vrsqrt.f32 %v2276_v59 }
 0xd3d   : > { %v7275_v7 = vpop.eup %7274 }
 0xd3e   : > { %v2280_v6 = vmul.f32 %v7275_v7, %v2256_v38 }
 0xd3f   : > { %v7277_v9 = vpop.eup %7276 }
 0xd40   : > { %v2281_v12 = vmul.f32 %v7277_v9, %v2257_v44  ;;  %v2289_v58 = vmul.f32 %v6030_v5, %v2280_v6  ;;  %v6032_v9 = vld [vmem:[#allocation16 + $0x4] ss:$0 sm:$0xff] }
 0xd41   : > { %v7279_v3 = vpop.eup %7278 }
 0xd42   : > { %v2282_v8 = vmul.f32 %v7279_v3, %v2258_v46  ;;  %v2290_v15 = vmul.f32 %v6030_v5, %v2281_v12  ;;  %v8889_v17 = vadd.f32 %v6031_v14, %v2289_v58 }
 0xd44   : > { %v8891_v0 = vadd.f32 %v6031_v14, %v2290_v15  ;;  %v2291_v11 = vmul.f32 %v6030_v5, %v2282_v8 }
 0xd46   : > { %v8895_v19 = vpack.c.bf16 %v8891_v0, %v8889_v17  ;;  %v8897_v20 = vadd.f32 %v6031_v14, %v2291_v11 }
 0xd48   : > { %6523 = vmatprep.mubr.msk.bf16.mxu0 %vm1009_vm2, %v8895_v19  ;;  %v8903_v1 = vpack.c.bf16 %v8897_v20, %v8897_v20 }
 0xd4a   : > { %6524 = vmatmul.mubr.msk.bf16.vlgmr.msra.gmra.mrb[28].mxu0 %vm1009_vm2, %v8903_v1 }
 0xd4b   : > { %6528 = vmatpush3.bf16.msra.mxu0 %v7162_v54  ;;  %6531 = vmatprep.mubr.msk.bf16.mxu0 %vm1009_vm2, %v8895_v19 }
 0xd4c   : > { %6529 = vmatprep.subr.bf16.mxu0 %v7163_v63 }
 0xd4f   : > { %6530 = vmatpush3.bf16.msra.mxu0 %v7163_v63  ;;  %v2361_v63 = vadd.f32 %v6032_v9, %v2360_v23 }
 0xd50   : > { %6535 = vmatprep.subr.bf16.mxu0 %v7994_v42 }
 0xd51   : > { %v2526_v57 = vpack.c.bf16 %v2361_v63, %v2361_v63 }
 0xd52   : > { %6532 = vmatmul.mubr.msk.bf16.vlgmr.msra.gmra.mrb[32].mxu0 %vm1009_vm2, %v8903_v1 }
 0xd53   : > { %6539 = vmatprep.mubr.msk.bf16.mxu0 %vm7995_vm3, %v7994_v42 }
 0xe1d   : > { %v6525_v28 = vpop.f32.mrb[28].mxu0 }
 0xe1e   : > { %v2433_v31 = vpop.f32.mrb[29].mxu0  ;;  %v8914_v21 = vadd.f32 %v6525_v28, %v6036_v22 }
 0xe1f   : > { %v2434_v29 = vadd.f32 %v6036_v22, %v2433_v31  ;;  %v6526_v33 = vpop.f32.mrb[30].mxu0 }
 0xe20   : > { %v2436_v30 = vpop.f32.mrb[31].mxu0  ;;  %v2522_v37 = vmul.f32 %v8711_v25, %v8914_v21  ;;  %v2595_v49 = vmul.f32 %v8714_v26, %v8914_v21  ;;  %v2756_v28 = vmul.f32 %v8717_v27, %v8914_v21 }
 0xe21   : > { %v2437_v34 = vadd.f32 %v6036_v22, %v2436_v30  ;;  %v2520_v36 = vmul.f32 %v8711_v25, %v2434_v29  ;;  %v2593_v50 = vmul.f32 %v8714_v26, %v2434_v29  ;;  %v2754_v32 = vmul.f32 %v8717_v27, %v2434_v29 }
 0xe22   : > { %v8920_v10 = vmul.f32 %v8727_v40, %v2434_v29  ;;  %v2528_v43 = vpack.c.bf16 %v2522_v37, %v2522_v37  ;;  %v2600_v60 = vpack.c.bf16 %v2595_v49, %v2595_v49  ;;  %v2761_v31 = vpack.c.bf16 %v2756_v28, %v2756_v28 }
 0xe23   : > { %v2521_v38 = vmul.f32 %v8711_v25, %v2437_v34  ;;  %v2594_v13 = vmul.f32 %v8714_v26, %v2437_v34  ;;  %v2755_v41 = vmul.f32 %v8717_v27, %v2437_v34  ;;  %v8926_v44 = vmul.f32 %v8727_v40, %v2437_v34 }
 0xe24   : > { %v2536_v15 = vsel %vm1009_vm2, %v2528_v43, 0  ;;  %v2605_v11 = vsel %vm1009_vm2, %v2600_v60, 0  ;;  %v2766_v29 = vsel %vm1009_vm2, %v2761_v31, 0  ;;  %v2871_v30 = vmul.f32 %v8727_v40, %v8914_v21 }
 0xe25   : > { %v6533_v45 = vpop.f32.mrb[32].mxu0  ;;  %v2527_v46 = vpack.c.bf16 %v2521_v38, %v2520_v36  ;;  %v2599_v47 = vpack.c.bf16 %v2594_v13, %v2593_v50  ;;  %v2760_v48 = vpack.c.bf16 %v2755_v41, %v2754_v32  ;;  %v2875_v35 = vpack.c.bf16 %v8926_v44, %v8920_v10  ;;  %v887_v50 = vld [vmem:[%s761_s11] sm:$0x3] }
 0xe26   : > { %v2506_v39 = vpop.f32.mrb[33].mxu0  ;;  %v8964_v8 = vadd.f32 %v6533_v45, %v6041_v18  ;;  %v2876_v34 = vpack.c.bf16 %v2871_v30, %v2871_v30  ;;  %v9001_v21 = vmul.f32 -1e+30, %v887_v50 }
 0xe27   : > { %v2507_v51 = vadd.f32 %v6041_v18, %v2506_v39  ;;  %v6534_v52 = vpop.f32.mrb[34].mxu0  ;;  %v2533_v53 = vsel %vm1009_vm2, %v2527_v46, 0  ;;  %v2602_v54 = vsel %vm1009_vm2, %v2599_v47, 0  ;;  %v2763_v16 = vsel %vm1009_vm2, %v2760_v48, 0 }
 0xe28   : > { %v2509_v55 = vpop.f32.mrb[35].mxu0  ;;  %6536 = vmatpush3.bf16.xpose.msra.mxu0 %v2533_v53  ;;  %6544 = vmatpush3.bf16.xpose.msra.mxu1 %v2602_v54  ;;  %v2598_v24 = vmul.f32 %v8714_v26, %v8964_v8  ;;  %v2878_v33 = vsel %vm1009_vm2, %v2875_v35, 0  ;;  %v2881_v36 = vsel %vm1009_vm2, %v2876_v34, 0 }
 0xe29   : > { %6537 = vmatprep.subr.bf16.mxu0 %v7994_v42  ;;  %v2510_v56 = vadd.f32 %v6041_v18, %v2509_v55  ;;  %6545 = vmatprep.subr.bf16.mxu1 %v7994_v42  ;;  %v8939_v62 = vmul.f32 %v8711_v25, %v2507_v51  ;;  %v2596_v61 = vmul.f32 %v8714_v26, %v2507_v51 }
 0xe2a   : > { %v8943_v2 = vmul.f32 %v8717_v27, %v2507_v51  ;;  %v8946_v4 = vmul.f32 %v8727_v40, %v2507_v51  ;;  %v2660_v22 = vpack.c.bf16 %v2598_v24, %v2598_v24 }
 0xe2b   : > { %v8949_v59 = vmul.f32 %v8711_v25, %v2510_v56  ;;  %v2597_v7 = vmul.f32 %v8714_v26, %v2510_v56  ;;  %v8953_v5 = vmul.f32 %v8717_v27, %v2510_v56  ;;  %v8956_v6 = vmul.f32 %v8727_v40, %v2510_v56 }
 0xe2c   : > { %v2666_v23 = vsel %vm1478_vm14, %v2660_v22, 0 }
 0xe2d   : > { %v2659_v12 = vpack.c.bf16 %v2597_v7, %v2596_v61  ;;  %v2591_v58 = vpack.c.bf16 %v8949_v59, %v8939_v62  ;;  %v2820_v3 = vpack.c.bf16 %v8953_v5, %v8943_v2  ;;  %v2935_v14 = vpack.c.bf16 %v8956_v6, %v8946_v4  ;;  %v7165_v4 = vld [vmem:[#allocation14 + $0x78] sm:$0xff]  }
 0xe30   : > { %6538 = vmatpush3.bf16.xpose.msra.mxu0 %v2536_v15  ;;  %6546 = vmatpush3.bf16.xpose.msra.mxu1 %v2605_v11 }
 0xe31   : > { %6551 = vmatprep.subr.bf16.mxu0 %v7994_v42  ;;  %6567 = vmatprep.subr.bf16.mxu1 %v7994_v42 }
 0xe37   : > { %6540 = vmatmul.mubr.msk.bf16.vlgmr.msra.gmra.mrb[36].mxu0 %vm1009_vm2, %v2526_v57  ;;  %6548 = vmatmul.mubr.msk.bf16.vlgmr.msra.gmra.mrb[24].mxu1 %vm1009_vm2, %v2526_v57 }
 0xe38   : > { %6552 = vmatpush3.bf16.msra.mxu0 %v2659_v12  ;;  %6568 = vmatpush3.bf16.xpose.msra.mxu1 %v2763_v16 }
 0xe39   : > { %6553 = vmatprep.subr.bf16.mxu0 %v7994_v42  ;;  %6569 = vmatprep.subr.bf16.mxu1 %v7994_v42 }
 0xe3a   : > { %6571 = vmatprep.mubr.msk.bf16.mxu1 %vm7995_vm3, %v7994_v42  ;;  %6555 = vmatprep.mubr.msk.bf16.mxu0 %vm7995_vm3, %v7994_v42 }
 0xe3c   : > { %6554 = vmatpush3.bf16.msra.mxu0 %v2666_v23 }
 0xe3d   : > { %6559 = vmatprep.subr.bf16.mxu0 %v7994_v42 }
 0xe40   : > { %6570 = vmatpush3.bf16.xpose.msra.mxu1 %v2766_v29 }
 0xe41   : > { %6583 = vmatprep.subr.bf16.mxu1 %v7994_v42 }
 0xe47   : > { %6572 = vmatmul.mubr.msk.bf16.vlgmr.msra.gmra.mrb[28].mxu1 %vm1009_vm2, %v2526_v57 }
 0xe48   : > { %6584 = vmatpush3.bf16.xpose.msra.mxu1 %v2878_v33  ;;  %6587 = vmatprep.mubr.msk.bf16.mxu1 %vm7995_vm3, %v7994_v42 }
 0xe49   : > { %6585 = vmatprep.subr.bf16.mxu1 %v7994_v42 }
 0xe50   : > { %6586 = vmatpush3.bf16.xpose.msra.mxu1 %v2881_v36 }
 0xe51   : > { %6607 = vmatprep.subr.bf16.mxu1 %v7994_v42 }
 0xe57   : > { %6588 = vmatmul.mubr.msk.bf16.vlgmr.msra.gmra.mrb[32].mxu1 %vm1009_vm2, %v2526_v57 }
 0xe58   : > { %6611 = vmatprep.mubr.msk.bf16.mxu1 %vm7995_vm3, %v7994_v42 }
 0xf0a   : > { %v2572_v32 = vpop.f32.mrb[36].mxu0  ;;  %v2641_v10 = vpop.f32.mrb[24].mxu1 }
 0xf0b   : > { %v2573_v38 = vadd.f32 %v2572_v32, %v9001_v21  ;;  %v2642_v13 = vadd.f32 %v2641_v10, %v9001_v21  ;;  %v6541_v41 = vpop.f32.mrb[37].mxu0  ;;  %v6549_v44 = vpop.f32.mrb[25].mxu1 }
 0xf0c   : > { %v2575_v18 = vpop.f32.mrb[38].mxu0  ;;  %v2644_v45 = vpop.f32.mrb[26].mxu1  ;;  %v2525_v44 = vmul.f32 %v8711_v25, %v8964_v8 }
 0xf0d   : > { %v6542_v46 = vpop.f32.mrb[39].mxu0  ;;  %v6550_v47 = vpop.f32.mrb[27].mxu1  ;;  %v2647_v48 = vsel %vm2578_vm5, %v2642_v13, -inf  ;;  %v2579_v35 = vsel %vm2578_vm5, %v2573_v38, -inf }
 0xf0e   : > { %2648 = vmax.xlane.f32.xlu0 %v2647_v48  ;;  %2580 = vmax.xlane.f32.xlu1 %v2579_v35  ;;  %v2592_v45 = vpack.c.bf16 %v2525_v44, %v2525_v44 }
 0xf10   : > { %v2712_v48 = vsel %vm1478_vm14, %v2592_v45, 0  ;;  %v6058_v45 = vld [vmem:[#allocation17 + $0x4] ss:$0 sm:$0xff] }
 0xf1a   : > { %v2802_v39 = vpop.f32.mrb[28].mxu1 }
 0xf1b   : > { %v2803_v37 = vadd.f32 %v2802_v39, %v9001_v21  ;;  %v6573_v49 = vpop.f32.mrb[29].mxu1  ;;  %v2759_v39 = vmul.f32 %v8717_v27, %v8964_v8 }
 0xf1c   : > { %v2805_v51 = vpop.f32.mrb[30].mxu1 }
 0xf1d   : > { %v6574_v52 = vpop.f32.mrb[31].mxu1  ;;  %v2808_v53 = vsel %vm2578_vm5, %v2803_v37, -inf  ;;  %v2821_v62 = vpack.c.bf16 %v2759_v39, %v2759_v39 }
 0xf1e   : > { %2809 = vmax.xlane.f32.xlu0 %v2808_v53  ;;  %v2874_v52 = vmul.f32 %v8727_v40, %v8964_v8  ;;  %v7164_v8 = vld [vmem:[#allocation14 + $0x70] sm:$0xff]  }
 0xf20   : > { %v2936_v2 = vpack.c.bf16 %v2874_v52, %v2874_v52 }
 0xf2a   : > { %v2917_v54 = vpop.f32.mrb[32].mxu1 }
 0xf2b   : > { %v2918_v55 = vadd.f32 %v2917_v54, %v9001_v21  ;;  %v6589_v56 = vpop.f32.mrb[33].mxu1 }
 0xf2c   : > { %v2920_v43 = vpop.f32.mrb[34].mxu1 }
 0xf2d   : > { %v6590_v60 = vpop.f32.mrb[35].mxu1  ;;  %v2923_v61 = vsel %vm2578_vm5, %v2918_v55, -inf }
 0xf2e   : > { %2924 = vmax.xlane.f32.xlu1 %v2923_v61  ;;  %v6054_v61 = vld [vmem:[#allocation16 + $0x7] ss:$0 sm:$0xff] }
 0xf9b   : > { %v2649_v7 = vpop.xlane.xlu0 %2648  ;;  %v2581_v9 = vpop.xlane.xlu1 %2580 }
 0xf9c   : > { %v2650_v12 = vsub.f32 %v2642_v13, %v2649_v7  ;;  %v2582_v15 = vsub.f32 %v2573_v38, %v2581_v9 }
 0xf9e   : > { %v2651_v11 = vmul.f32 1.442695, %v2650_v12  ;;  %v2583_v63 = vmul.f32 1.442695, %v2582_v15 }
 0xfa0   : > { %7280 = vpow2.f32 %v2651_v11 }
 0xfa1   : > { %7282 = vpow2.f32 %v2583_v63  ;;  %v7380_v63 = vld [vmem:[%s743_s23] sm:$0x3] }
 0xfaa   : > { %v7281_v24 = vpop.eup %7280 }
 0xfab   : > { %v7283_v57 = vpop.eup %7282  ;;  %v2810_v16 = vpop.xlane.xlu0 %2809  ;;  %v2653_v22 = vsel %vm2578_vm5, %v7281_v24, 0.0 }
 0xfac   : > { %v2811_v28 = vsub.f32 %v2803_v37, %v2810_v16  ;;  %2654 = vadd.xlane.f32.xlu0 %v2653_v22  ;;  %v2585_v23 = vsel %vm2578_vm5, %v7283_v57, 0.0 }
 0xfad   : > { %2586 = vadd.xlane.f32.xlu1 %v2585_v23 }
 0xfae   : > { %v2812_v31 = vmul.f32 1.442695, %v2811_v28 }
 0xfb0   : > { %7284 = vpow2.f32 %v2812_v31 }
 0xfba   : > { %v7285_v29 = vpop.eup %7284 }
 0xfbb   : > { %v2925_v33 = vpop.xlane.xlu1 %2924  ;;  %v2814_v30 = vsel %vm2578_vm5, %v7285_v29, 0.0 }
 0xfbc   : > { %v2926_v34 = vsub.f32 %v2918_v55, %v2925_v33  ;;  %2815 = vadd.xlane.f32.xlu0 %v2814_v30  ;;  %v7167_v33 = vld [vmem:[#allocation19 + $0x18] sm:$0xff]   ;;  %v7168_v30 = vld [vmem:[#allocation14 + $0x80] sm:$0xff]  }
 0xfbe   : > { %v2927_v36 = vmul.f32 1.442695, %v2926_v34  ;;  %v7170_v34 = vld [vmem:[#allocation22 + $0x40] sm:$0xff]  }
 0xfc0   : > { %7286 = vpow2.f32 %v2927_v36  ;;  %v7171_v36 = vld [vmem:[#allocation22 + $0x48] sm:$0xff]  }
 0xfca   : > { %v7287_v50 = vpop.eup %7286 }
 0xfcb   : > { %v2929_v32 = vsel %vm2578_vm5, %v7287_v50, 0.0 }
 0xfcc   : > { %2930 = vadd.xlane.f32.xlu1 %v2929_v32  ;;  %v7173_v32 = vld [vmem:[#allocation22 + $0x58] sm:$0xff]  }
0x1039   : > { %v2655_v10 = vpop.xlane.xlu0 %2654 }
0x103a   : > { %7288 = vrcp.f32 %v2655_v10  ;;  %v2587_v38 = vpop.xlane.xlu1 %2586  ;;  %v7174_v10 = vld [vmem:[#allocation22 + $0x60] sm:$0xff]  }
0x103b   : > { %7290 = vrcp.f32 %v2587_v38  ;;  %v7175_v38 = vld [vmem:[#allocation22 + $0x68] sm:$0xff]  }
0x1044   : > { %v7289_v13 = vpop.eup %7288 }
0x1045   : > { %v2657_v41 = vmul.f32 %v7289_v13, %v7281_v24  ;;  %v7291_v47 = vpop.eup %7290 }
0x1046   : > { %v2589_v35 = vmul.f32 %v7291_v47, %v7283_v57  ;;  %v6059_v47 = vld [vmem:[#allocation17 + $0x5] ss:$0 sm:$0xff] }
0x1047   : > { %v2658_v18 = vpack.c.bf16 %v2657_v41, %v2657_v41 }
0x1048   : > { %v2590_v37 = vpack.c.bf16 %v2589_v35, %v2589_v35 }
0x1049   : > { %6556 = vmatmul.mubr.msk.bf16.vlgmr.msra.gmra.mrb[40].mxu0 %vm2661_vm6, %v2658_v18  ;;  %v2816_v46 = vpop.xlane.xlu0 %2815 }
0x104a   : > { %6560 = vmatpush3.bf16.msra.mxu0 %v2591_v58  ;;  %6563 = vmatprep.mubr.msk.bf16.mxu0 %vm7995_vm3, %v7994_v42  ;;  %7292 = vrcp.f32 %v2816_v46  ;;  %v2826_v58 = vsel %vm1478_vm14, %v2821_v62, 0  ;;  %v7176_v62 = vld [vmem:[#allocation22 + $0x70] sm:$0xff]  }
0x104b   : > { %6561 = vmatprep.subr.bf16.mxu0 %v7994_v42 }
0x104e   : > { %6562 = vmatpush3.bf16.msra.mxu0 %v2712_v48 }
0x104f   : > { %6575 = vmatprep.subr.bf16.mxu0 %v7994_v42 }
0x1054   : > { %v7293_v59 = vpop.eup %7292 }
0x1055   : > { %6564 = vmatmul.mubr.msk.bf16.vlgmr.msra.gmra.mrb[40].mxu0 %vm2661_vm6, %v2590_v37  ;;  %v2818_v51 = vmul.f32 %v7293_v59, %v7285_v29  ;;  %v7166_v29 = vld [vmem:[#allocation19 + $0x10] sm:$0xff]   ;;  %v7169_v37 = vld [vmem:[#allocation14 + $0x88] sm:$0xff]   ;;  %v7177_v59 = vld [vmem:[#allocation22 + $0x78] sm:$0xff]  }
0x1056   : > { %6576 = vmatpush3.bf16.msra.mxu0 %v2820_v3  ;;  %6579 = vmatprep.mubr.msk.bf16.mxu0 %vm7995_vm3, %v7994_v42  ;;  %v2941_v3 = vsel %vm1478_vm14, %v2936_v2, 0 }
0x1057   : > { %6577 = vmatprep.subr.bf16.mxu0 %v7994_v42  ;;  %v2819_v53 = vpack.c.bf16 %v2818_v51, %v2818_v51  ;;  %6608 = vmatpush3.bf16.msra.mxu1 %v7166_v29 }
0x1058   : > { %6609 = vmatprep.subr.bf16.mxu1 %v7994_v42 }
0x1059   : > { %v2931_v49 = vpop.xlane.xlu1 %2930 }
0x105a   : > { %6578 = vmatpush3.bf16.msra.mxu0 %v2826_v58  ;;  %7294 = vrcp.f32 %v2931_v49  ;;  %v6060_v58 = vld [vmem:[#allocation20 + $0x1] ss:$0 sm:$0xff] }
0x105b   : > { %6591 = vmatprep.subr.bf16.mxu0 %v7994_v42  ;;  %6610 = vmatpush3.bf16.msra.mxu1 %v7167_v33 }
0x105c   : > { %6635 = vmatprep.subr.bf16.mxu1 %v7168_v30 }
0x1061   : > { %6580 = vmatmul.mubr.msk.bf16.vlgmr.msra.gmra.mrb[40].mxu0 %vm2661_vm6, %v2819_v53 }
0x1062   : > { %6592 = vmatpush3.bf16.msra.mxu0 %v2935_v14  ;;  %6595 = vmatprep.mubr.msk.bf16.mxu0 %vm7995_vm3, %v7994_v42 }
0x1063   : > { %6593 = vmatprep.subr.bf16.mxu0 %v7994_v42 }
0x1064   : > { %v7295_v5 = vpop.eup %7294 }
0x1065   : > { %v2933_v54 = vmul.f32 %v7295_v5, %v7287_v50  ;;  %v7172_v50 = vld [vmem:[#allocation22 + $0x50] sm:$0xff]  }
0x1066   : > { %6594 = vmatpush3.bf16.msra.mxu0 %v2941_v3  ;;  %v6075_v3 = vld [vmem:[#allocation16 + $0x8] ss:$0 sm:$0xff] }
0x1067   : > { %6599 = vmatprep.subr.bf16.mxu0 %v7994_v42  ;;  %v2934_v55 = vpack.c.bf16 %v2933_v54, %v2933_v54 }
0x106d   : > { %6596 = vmatmul.mubr.msk.bf16.vlgmr.msra.gmra.mrb[40].mxu0 %vm2661_vm6, %v2934_v55 }
0x106e   : > { %6600 = vmatpush3.bf16.msra.mxu0 %v7164_v8  ;;  %6603 = vmatprep.mubr.msk.bf16.mxu0 %vm7995_vm3, %v7994_v42 }
0x106f   : > { %6601 = vmatprep.subr.bf16.mxu0 %v7994_v42 }
0x1072   : > { %6602 = vmatpush3.bf16.msra.mxu0 %v7165_v4 }
0x1073   : > { %6615 = vmatprep.subr.bf16.mxu0 %v7994_v42 }
0x1140   : > { %v2977_v6 = vpop.f32.mrb[40].mxu0 }
0x1141   : > { %v2989_v14 = vpack.c.bf16 %v2977_v6, %v2977_v6  ;;  %v6597_v56 = vpop.f32.mrb[41].mxu0 }
0x1142   : > { %v2980_v43 = vpop.f32.mrb[42].mxu0 }
0x1143   : > { %v6598_v60 = vpop.f32.mrb[43].mxu0  ;;  %6604 = vmatmul.mubr.msk.bf16.vlgmr.msra.gmra.mrb[44].mxu0 %vm1009_vm2, %v2989_v14  ;;  %v6064_v43 = vld [vmem:[#allocation23 + $0x1] ss:$0 sm:$0xff] }
0x1144   : > { %6631 = vmatprep.mubr.msk.bf16.mxu0 %vm7995_vm3, %v7994_v42  ;;  %6616 = vmatpush3.bf16.msra.mxu0 %v7170_v34  ;;  %v6073_v34 = vld [vmem:[#allocation17 + $0x6] ss:$0 sm:$0xff] }
0x1145   : > { %6617 = vmatprep.subr.bf16.mxu0 %v7994_v42 }
0x1148   : > { %6618 = vmatpush3.bf16.msra.mxu0 %v7171_v36 }
0x1149   : > { %6619 = vmatprep.subr.bf16.mxu0 %v7994_v42 }
0x114c   : > { %6620 = vmatpush3.bf16.msra.mxu0 %v7172_v50  ;;  %v6074_v50 = vld [vmem:[#allocation17 + $0x7] ss:$0 sm:$0xff] }
0x114d   : > { %6621 = vmatprep.subr.bf16.mxu0 %v7994_v42 }
0x1150   : > { %6622 = vmatpush3.bf16.msra.mxu0 %v7173_v32 }
0x1151   : > { %6623 = vmatprep.subr.bf16.mxu0 %v7994_v42 }
0x1154   : > { %6624 = vmatpush3.bf16.msra.mxu0 %v7174_v10  ;;  %v886_v10 = vld [vmem:[%s752_s15] sm:$0x3] }
0x1155   : > { %6625 = vmatprep.subr.bf16.mxu0 %v7994_v42 }
0x1158   : > { %6626 = vmatpush3.bf16.msra.mxu0 %v7175_v38 }
0x1159   : > { %6627 = vmatprep.subr.bf16.mxu0 %v7994_v42 }
0x115c   : > { %6628 = vmatpush3.bf16.msra.mxu0 %v7176_v62 }
0x115d   : > { %6629 = vmatprep.subr.bf16.mxu0 %v7994_v42 }
0x1160   : > { %6630 = vmatpush3.bf16.msra.mxu0 %v7177_v59 }
0x1216   : > { %v3047_v7 = vpop.f32.mrb[44].mxu0 }
0x1217   : > { %v3048_v9 = vadd.f32 %v6054_v61, %v3047_v7  ;;  %v6605_v12 = vpop.f32.mrb[45].mxu0 }
0x1218   : > { %v3050_v15 = vpop.f32.mrb[46].mxu0 }
0x1219   : > { %v6606_v11 = vpop.f32.mrb[47].mxu0  ;;  %v3057_v24 = vadd.f32 %v7380_v63, %v3048_v9 }
0x121b   : > { %v3058_v57 = vsel %vm1016_vm1, %v3057_v24, 0.0 }
0x121c   : > { %3059 = vadd.xlane.f32.xlu0 %v3058_v57 }
0x12a9   : > { %v3060_v16 = vpop.xlane.xlu0 %3059 }
0x12aa   : > { %v3061_v22 = vmul.f32 0.03125, %v3060_v16 }
0x12ac   : > { %v3062_v28 = vsub.f32 %v3057_v24, %v3061_v22 }
0x12ae   : > { %v3063_v23 = vmul.f32 %v3062_v28, %v3062_v28 }
0x12b0   : > { %v3064_v31 = vsel %vm1016_vm1, %v3063_v23, 0.0  ;;  %v7179_v23 = vld [vmem:[#allocation14 + $0x98] sm:$0xff]  }
0x12b1   : > { %3065 = vadd.xlane.f32.xlu1 %v3064_v31 }
0x133e   : > { %v3066_v13 = vpop.xlane.xlu1 %3065 }
0x133f   : > { %v3067_v41 = vmul.f32 0.03125, %v3066_v13 }
0x1341   : > { %v3068_v44 = vadd.f32 1e-05, %v3067_v41  ;;  %v7180_v41 = vld [vmem:[#allocation14 + $0xa0] sm:$0xff]  }
0x1343   : > { %7296 = vrsqrt.f32 %v3068_v44 }
0x134d   : > { %v7297_v18 = vpop.eup %7296 }
0x134e   : > { %v3070_v46 = vmul.f32 %v7297_v18, %v3062_v28  ;;  %v7178_v28 = vld [vmem:[#allocation14 + $0x90] sm:$0xff]   ;;  %v7181_v18 = vld [vmem:[#allocation14 + $0xa8] sm:$0xff]  }
0x1350   : > { %v3077_v48 = vmul.f32 %v6058_v45, %v3070_v46  ;;  %v6080_v45 = vld [vmem:[#allocation16 + $0x9] ss:$0 sm:$0xff] }
0x1352   : > { %v3084_v35 = vadd.f32 %v6059_v47, %v3077_v48 }
0x1354   : > { %v3111_v39 = vpack.c.bf16 %v3084_v35, %v3084_v35 }
0x1356   : > { %6612 = vmatmul.mubr.msk.bf16.vlgmr.msra.gmra.mrb[36].mxu1 %vm1009_vm2, %v3111_v39 }
0x1357   : > { %6636 = vmatpush3.bf16.msra.mxu1 %v7168_v30  ;;  %6639 = vmatprep.mubr.msk.bf16.mxu1 %vm1009_vm2, %v8895_v19 }
0x1358   : > { %6637 = vmatprep.subr.bf16.mxu1 %v7169_v37 }
0x135b   : > { %6638 = vmatpush3.bf16.msra.mxu1 %v7169_v37 }
0x135c   : > { %6643 = vmatprep.subr.bf16.mxu1 %v7994_v42 }
0x135e   : > { %6640 = vmatmul.mubr.msk.bf16.vlgmr.msra.gmra.mrb[40].mxu1 %vm1009_vm2, %v8903_v1 }
0x135f   : > { %6647 = vmatprep.mubr.msk.bf16.mxu1 %vm7995_vm3, %v7994_v42  ;;  %6644 = vmatpush3.bf16.msra.mxu1 %v7178_v28 }
0x1360   : > { %6645 = vmatprep.subr.bf16.mxu1 %v7994_v42 }
0x1363   : > { %6646 = vmatpush3.bf16.msra.mxu1 %v7179_v23 }
0x1364   : > { %6651 = vmatprep.subr.bf16.mxu1 %v7994_v42 }
0x1429   : > { %v3167_v49 = vpop.f32.mrb[36].mxu1 }
0x142a   : > { %v3168_v51 = vadd.f32 %v6060_v58, %v3167_v49  ;;  %v6613_v19 = vpop.f32.mrb[37].mxu1 }
0x142b   : > { %v3170_v52 = vpop.f32.mrb[38].mxu1 }
0x142c   : > { %v3173_v53 = vmax.f32 %v3168_v51, 0.0  ;;  %v6614_v2 = vpop.f32.mrb[39].mxu1  ;;  %v6084_v51 = vld [vmem:[#allocation16 + $0xa] ss:$0 sm:$0xff] }
0x142e   : > { %v3174_v5 = vpack.c.bf16 %v3173_v53, %v3173_v53 }
0x1430   : > { %6632 = vmatmul.mubr.bf16.vlgmr.msra.gmra.mrb[48].mxu0 %v3174_v5 }
0x1431   : > { %v6641_v1 = vpop.f32.mrb[40].mxu1 }
0x1432   : > { %v9076_v54 = vadd.f32 %v6641_v1, %v6075_v3  ;;  %v3361_v8 = vpop.f32.mrb[41].mxu1 }
0x1433   : > { %v6642_v55 = vpop.f32.mrb[42].mxu1  ;;  %v3362_v6 = vadd.f32 %v6075_v3, %v3361_v8 }
0x1434   : > { %v3364_v4 = vpop.f32.mrb[43].mxu1 }
0x1435   : > { %v3365_v14 = vadd.f32 %v6075_v3, %v3364_v4 }
0x1437   : > { %v9078_v56 = vpack.c.bf16 %v3365_v14, %v3362_v6  ;;  %v3512_v14 = vpack.c.bf16 %v9076_v54, %v9076_v54 }
0x1439   : > { %6667 = vmatprep.mubr.msk.bf16.mxu0 %vm1009_vm2, %v9078_v56 }
0x1503   : > { %v3263_v60 = vpop.f32.mrb[48].mxu0 }
0x1504   : > { %v3264_v61 = vadd.f32 %v6064_v43, %v3263_v60  ;;  %v6633_v7 = vpop.f32.mrb[49].mxu0 }
0x1505   : > { %v3266_v9 = vpop.f32.mrb[50].mxu0 }
0x1506   : > { %v6634_v12 = vpop.f32.mrb[51].mxu0  ;;  %v3273_v15 = vadd.f32 %v3264_v61, %v3084_v35 }
0x1508   : > { %v3274_v11 = vsel %vm1016_vm1, %v3273_v15, 0.0 }
0x1509   : > { %3275 = vadd.xlane.f32.xlu0 %v3274_v11 }
0x1596   : > { %v3276_v63 = vpop.xlane.xlu0 %3275 }
0x1597   : > { %v3277_v24 = vmul.f32 0.03125, %v3276_v63 }
0x1599   : > { %v3278_v57 = vsub.f32 %v3273_v15, %v3277_v24 }
0x159b   : > { %v3279_v16 = vmul.f32 %v3278_v57, %v3278_v57 }
0x159d   : > { %v3280_v22 = vsel %vm1016_vm1, %v3279_v16, 0.0 }
0x159e   : > { %3281 = vadd.xlane.f32.xlu1 %v3280_v22 }
0x162b   : > { %v3282_v31 = vpop.xlane.xlu1 %3281 }
0x162c   : > { %v3283_v29 = vmul.f32 0.03125, %v3282_v31 }
0x162e   : > { %v3284_v33 = vadd.f32 1e-05, %v3283_v29 }
0x1630   : > { %7298 = vrsqrt.f32 %v3284_v33 }
0x163a   : > { %v7299_v30 = vpop.eup %7298 }
0x163b   : > { %v3286_v36 = vmul.f32 %v7299_v30, %v3278_v57 }
0x163d   : > { %v3293_v32 = vmul.f32 %v6073_v34, %v3286_v36 }
0x163f   : > { %v3300_v38 = vadd.f32 %v6074_v50, %v3293_v32 }
0x1641   : > { %v9088_v13 = vadd.f32 %v3300_v38, %v886_v10 }
0x1643   : > { %v9092_v44 = vpack.c.bf16 %v9088_v13, %v9088_v13 }
0x1645   : > { %6648 = vmatmul.mubr.msk.bf16.vlgmr.msra.gmra.mrb[44].mxu1 %vm1009_vm2, %v9092_v44 }
0x1646   : > { %6652 = vmatpush3.bf16.msra.mxu1 %v7180_v41  ;;  %6655 = vmatprep.mubr.msk.bf16.mxu1 %vm7995_vm3, %v7994_v42 }
0x1647   : > { %6653 = vmatprep.subr.bf16.mxu1 %v7994_v42 }
0x164a   : > { %6654 = vmatpush3.bf16.msra.mxu1 %v7181_v18 }
0x164d   : > { %6656 = vmatmul.mubr.msk.bf16.vlgmr.msra.gmra.mrb[48].mxu1 %vm1009_vm2, %v9092_v44 }
0x164e   : > { %6661 = vmatprep.mubr.msk.bf16.mxu1 %vm1009_vm2, %v9078_v56 }
0x1718   : > { %v3438_v46 = vpop.f32.mrb[44].mxu1 }
0x1719   : > { %v3439_v47 = vadd.f32 %v6080_v45, %v3438_v46  ;;  %v6649_v48 = vpop.f32.mrb[45].mxu1 }
0x171a   : > { %v3441_v35 = vpop.f32.mrb[46].mxu1 }
0x171b   : > { %v6650_v39 = vpop.f32.mrb[47].mxu1  ;;  %v3509_v37 = vmul.f32 %v8711_v25, %v3439_v47  ;;  %v3607_v62 = vmul.f32 %v8714_v26, %v3439_v47  ;;  %v3811_v59 = vmul.f32 %v8717_v27, %v3439_v47  ;;  %v3961_v6 = vmul.f32 %v8727_v40, %v3439_v47 }
0x171d   : > { %v3513_v58 = vpack.c.bf16 %v3509_v37, %v3509_v37  ;;  %v3609_v49 = vpack.c.bf16 %v3607_v62, %v3607_v62  ;;  %v3813_v53 = vpack.c.bf16 %v3811_v59, %v3811_v59  ;;  %v3963_v9 = vpack.c.bf16 %v3961_v6, %v3961_v6 }
0x171f   : > { %6931 = vmatprep.subr.msk.bf16.mxu1 %vm1009_vm2, %v3513_v58  ;;  %6932 = vmatprep.subr.msk.bf16.mxu0 %vm1009_vm2, %v3609_v49  ;;  %v3521_v19 = vsel %vm1009_vm2, %v3513_v58, 0  ;;  %v3611_v52 = vsel %vm1009_vm2, %v3609_v49, 0  ;;  %v3815_v61 = vsel %vm1009_vm2, %v3813_v53, 0  ;;  %v3965_v54 = vsel %vm1009_vm2, %v3963_v9, 0 }
0x1720   : > { %v3503_v2 = vpop.f32.mrb[48].mxu1  ;;  %6660 = vmatpush3.bf16.xpose.msra.mxu1 %v3521_v19  ;;  %6666 = vmatpush3.bf16.xpose.msra.mxu0 %v3611_v52 }
0x1721   : > { %v9110_v5 = vadd.f32 %v6084_v51, %v3503_v2  ;;  %v6657_v3 = vpop.f32.mrb[49].mxu1  ;;  %6935 = vmatprep.subr.msk.bf16.mxu0 %vm1009_vm2, %v3813_v53 }
0x1722   : > { %v3506_v1 = vpop.f32.mrb[50].mxu1 }
0x1723   : > { %v6658_v8 = vpop.f32.mrb[51].mxu1  ;;  %v3608_v55 = vmul.f32 %v8714_v26, %v9110_v5  ;;  %v3510_v4 = vmul.f32 %v8711_v25, %v9110_v5 }
0x1725   : > { %v3696_v43 = vpack.c.bf16 %v3608_v55, %v3608_v55  ;;  %v9125_v7 = vpack.c.bf16 %v3510_v4, %v3510_v4 }
0x1727   : > { %6662 = vmatmul.mubr.msk.bf16.vlgmr.msra.gmra.mrb[52].mxu1 %vm1009_vm2, %v3512_v14  ;;  %6668 = vmatmul.mubr.msk.bf16.vlgmr.msra.gmra.mrb[52].mxu0 %vm1009_vm2, %v3512_v14  ;;  %v3704_v60 = vsel %vm1478_vm14, %v3696_v43, 0 }
0x1728   : > { %6933 = vmatprep.subr.msk.bf16.mxu1 %vm1478_vm14, %v3696_v43  ;;  %6684 = vmatpush3.bf16.xpose.msra.mxu0 %v3815_v61 }
0x1729   : > { %6672 = vmatpush3.bf16.msra.mxu1 %v3704_v60  ;;  %6685 = vmatprep.mubr.msk.bf16.mxu0 %vm1009_vm2, %v9078_v56 }
0x172a   : > { %6934 = vmatprep.subr.msk.bf16.mxu1 %vm1478_vm14, %v9125_v7  ;;  %6937 = vmatprep.subr.msk.bf16.mxu0 %vm1009_vm2, %v3963_v9 }
0x172f   : > { %6686 = vmatmul.mubr.msk.bf16.vlgmr.msra.gmra.mrb[56].mxu0 %vm1009_vm2, %v3512_v14 }
0x1730   : > { %6696 = vmatpush3.bf16.xpose.msra.mxu0 %v3965_v54  ;;  %6697 = vmatprep.mubr.msk.bf16.mxu0 %vm1009_vm2, %v9078_v56 }
0x1737   : > { %6698 = vmatmul.mubr.msk.bf16.vlgmr.msra.gmra.mrb[60].mxu0 %vm1009_vm2, %v3512_v14 }
0x17fa   : > { %v9137_v12 = vpop.f32.mrb[52].mxu1  ;;  %v6669_v15 = vpop.f32.mrb[52].mxu0 }
0x17fb   : > { %v3557_v11 = vpop.f32.mrb[53].mxu1  ;;  %v3647_v63 = vpop.f32.mrb[53].mxu0  ;;  %v3667_v31 = vsel %vm1351_vm4, %v6669_v15, -inf  ;;  %v3577_v50 = vsel %vm1351_vm4, %v9137_v12, -inf }
0x17fc   : > { %v6664_v24 = vpop.f32.mrb[54].mxu1  ;;  %v6670_v57 = vpop.f32.mrb[54].mxu0  ;;  %v3661_v16 = vsel %vm1344_vm15, %v3647_v63, -inf  ;;  %v3571_v29 = vsel %vm1344_vm15, %v3557_v11, -inf }
0x17fd   : > { %v3560_v22 = vpop.f32.mrb[55].mxu1  ;;  %3662 = vmax.xlane.f32.xlu0 %v3661_v16  ;;  %v3650_v28 = vpop.f32.mrb[55].mxu0 }
0x17fe   : > { %v3664_v23 = vsel %vm1344_vm15, %v3650_v28, -inf  ;;  %v3574_v34 = vsel %vm1344_vm15, %v3560_v22, -inf }
0x17ff   : > { %3665 = vmax.xlane.f32.xlu1 %v3664_v23 }
0x1801   : > { %3668 = vmax.xlane.f32.xlu0 %v3667_v31 }
0x1802   : > { %v9142_v56 = vpop.f32.mrb[56].mxu0 }
0x1803   : > { %v3851_v33 = vpop.f32.mrb[57].mxu0  ;;  %3572 = vmax.xlane.f32.xlu1 %v3571_v29  ;;  %v3871_v45 = vsel %vm1351_vm4, %v9142_v56, -inf }
0x1804   : > { %v6688_v30 = vpop.f32.mrb[58].mxu0  ;;  %v3865_v32 = vsel %vm1344_vm15, %v3851_v33, -inf }
0x1805   : > { %3575 = vmax.xlane.f32.xlu0 %v3574_v34  ;;  %v3854_v36 = vpop.f32.mrb[59].mxu0 }
0x1806   : > { %v3868_v38 = vsel %vm1344_vm15, %v3854_v36, -inf }
0x1807   : > { %3578 = vmax.xlane.f32.xlu1 %v3577_v50 }
0x1809   : > { %3866 = vmax.xlane.f32.xlu0 %v3865_v32 }
0x180a   : > { %v9149_v10 = vpop.f32.mrb[60].mxu0 }
0x180b   : > { %v4001_v41 = vpop.f32.mrb[61].mxu0  ;;  %3869 = vmax.xlane.f32.xlu1 %v3868_v38  ;;  %v4021_v35 = vsel %vm1351_vm4, %v9149_v10, -inf }
0x180c   : > { %v6700_v18 = vpop.f32.mrb[62].mxu0  ;;  %v4015_v47 = vsel %vm1344_vm15, %v4001_v41, -inf }
0x180d   : > { %3872 = vmax.xlane.f32.xlu0 %v3871_v45  ;;  %v4004_v46 = vpop.f32.mrb[63].mxu0 }
0x180e   : > { %v4018_v48 = vsel %vm1344_vm15, %v4004_v46, -inf }
0x180f   : > { %4016 = vmax.xlane.f32.xlu1 %v4015_v47 }
0x1811   : > { %4019 = vmax.xlane.f32.xlu0 %v4018_v48 }
0x1813   : > { %4022 = vmax.xlane.f32.xlu1 %v4021_v35 }
0x188a   : > { %v3663_v39 = vpop.xlane.xlu0 %3662 }
0x188b   : > { %v3670_v37 = vsub.f32 %v3647_v63, %v3663_v39 }
0x188c   : > { %v3666_v62 = vpop.xlane.xlu1 %3665 }
0x188d   : > { %v3673_v59 = vmul.f32 1.442695, %v3670_v37  ;;  %v3671_v58 = vsub.f32 %v3650_v28, %v3666_v62 }
0x188e   : > { %v3669_v49 = vpop.xlane.xlu0 %3668 }
0x188f   : > { %7300 = vpow2.f32 %v3673_v59  ;;  %v3675_v51 = vmul.f32 1.442695, %v3671_v58  ;;  %v3672_v19 = vsub.f32 %v6669_v15, %v3669_v49 }
0x1890   : > { %v3573_v52 = vpop.xlane.xlu1 %3572 }
0x1891   : > { %7302 = vpow2.f32 %v3675_v51  ;;  %v3677_v53 = vmul.f32 1.442695, %v3672_v19  ;;  %v3580_v2 = vsub.f32 %v3557_v11, %v3573_v52 }
0x1892   : > { %v3576_v3 = vpop.xlane.xlu0 %3575 }
0x1893   : > { %7304 = vpow2.f32 %v3677_v53  ;;  %v3583_v1 = vmul.f32 1.442695, %v3580_v2  ;;  %v3581_v8 = vsub.f32 %v3560_v22, %v3576_v3  ;;  %v7182_v53 = vld [vmem:[#allocation14 + $0xb0] sm:$0xff]  }
0x1894   : > { %v3579_v55 = vpop.xlane.xlu1 %3578  ;;  %6707 = vmatprep.subr.bf16.mxu0 %v7182_v53 }
0x1895   : > { %7306 = vpow2.f32 %v3583_v1  ;;  %v3585_v4 = vmul.f32 1.442695, %v3581_v8  ;;  %v3582_v6 = vsub.f32 %v9137_v12, %v3579_v55  ;;  %6708 = vmatpush3.bf16.msra.mxu0 %v7182_v53 }
0x1896   : > { %v3867_v14 = vpop.xlane.xlu0 %3866 }
0x1897   : > { %7308 = vpow2.f32 %v3585_v4  ;;  %v3587_v43 = vmul.f32 1.442695, %v3582_v6  ;;  %v3874_v60 = vsub.f32 %v3851_v33, %v3867_v14 }
0x1898   : > { %v3870_v61 = vpop.xlane.xlu1 %3869 }
0x1899   : > { %v9159_v9 = vpop.eup %7300  ;;  %7310 = vpow2.f32 %v3587_v43  ;;  %v3877_v54 = vmul.f32 1.442695, %v3874_v60  ;;  %v3875_v15 = vsub.f32 %v3854_v36, %v3870_v61 }
0x189a   : > { %v3873_v11 = vpop.xlane.xlu0 %3872  ;;  %v3679_v63 = vsel %vm1344_vm15, %v9159_v9, 0.0 }
0x189b   : > { %v9163_v24 = vpop.eup %7302  ;;  %7312 = vpow2.f32 %v3877_v54  ;;  %v3879_v57 = vmul.f32 1.442695, %v3875_v15  ;;  %v3876_v12 = vsub.f32 %v9142_v56, %v3873_v11  ;;  %3680 = vadd.xlane.f32.xlu0 %v3679_v63 }
0x189c   : > { %v4017_v16 = vpop.xlane.xlu1 %4016  ;;  %v3682_v22 = vsel %vm1344_vm15, %v9163_v24, 0.0 }
0x189d   : > { %v9168_v28 = vpop.eup %7304  ;;  %7314 = vpow2.f32 %v3879_v57  ;;  %v3881_v23 = vmul.f32 1.442695, %v3876_v12  ;;  %v4024_v31 = vsub.f32 %v4001_v41, %v4017_v16  ;;  %3683 = vadd.xlane.f32.xlu1 %v3682_v22  ;;  %v3812_v57 = vmul.f32 %v8717_v27, %v9110_v5 }
0x189e   : > { %v4020_v29 = vpop.xlane.xlu0 %4019  ;;  %v3685_v33 = vsel %vm1351_vm4, %v9168_v28, 0.0 }
0x189f   : > { %v9172_v30 = vpop.eup %7306  ;;  %7316 = vpow2.f32 %v3881_v23  ;;  %v4027_v34 = vmul.f32 1.442695, %v4024_v31  ;;  %v4025_v56 = vsub.f32 %v4004_v46, %v4020_v29  ;;  %3686 = vadd.xlane.f32.xlu0 %v3685_v33 }
0x18a0   : > { %v4023_v36 = vpop.xlane.xlu1 %4022  ;;  %v3589_v50 = vsel %vm1344_vm15, %v9172_v30, 0.0 }
0x18a1   : > { %v9176_v32 = vpop.eup %7308  ;;  %7318 = vpow2.f32 %v4027_v34  ;;  %v4029_v38 = vmul.f32 1.442695, %v4025_v56  ;;  %v4026_v41 = vsub.f32 %v9149_v10, %v4023_v36  ;;  %3590 = vadd.xlane.f32.xlu1 %v3589_v50 }
0x18a2   : > { %v3592_v18 = vsel %vm1344_vm15, %v9176_v32, 0.0 }
0x18a3   : > { %v9181_v45 = vpop.eup %7310  ;;  %7320 = vpow2.f32 %v4029_v38  ;;  %v4031_v47 = vmul.f32 1.442695, %v4026_v41  ;;  %3593 = vadd.xlane.f32.xlu0 %v3592_v18 }
0x18a4   : > { %v3595_v46 = vsel %vm1351_vm4, %v9181_v45, 0.0 }
0x18a5   : > { %v9185_v48 = vpop.eup %7312  ;;  %7322 = vpow2.f32 %v4031_v47  ;;  %3596 = vadd.xlane.f32.xlu1 %v3595_v46 }
0x18a6   : > { %v3883_v35 = vsel %vm1344_vm15, %v9185_v48, 0.0 }
0x18a7   : > { %v9189_v10 = vpop.eup %7314  ;;  %3884 = vadd.xlane.f32.xlu0 %v3883_v35 }
0x18a8   : > { %v3886_v39 = vsel %vm1344_vm15, %v9189_v10, 0.0 }
0x18a9   : > { %v9193_v37 = vpop.eup %7316  ;;  %3887 = vadd.xlane.f32.xlu1 %v3886_v39 }
0x18aa   : > { %v3889_v62 = vsel %vm1351_vm4, %v9193_v37, 0.0 }
0x18ab   : > { %v9197_v59 = vpop.eup %7318  ;;  %3890 = vadd.xlane.f32.xlu0 %v3889_v62 }
0x18ac   : > { %v4033_v58 = vsel %vm1344_vm15, %v9197_v59, 0.0 }
0x18ad   : > { %v9201_v49 = vpop.eup %7320  ;;  %4034 = vadd.xlane.f32.xlu1 %v4033_v58 }
0x18ae   : > { %v4036_v51 = vsel %vm1344_vm15, %v9201_v49, 0.0 }
0x18af   : > { %v9205_v19 = vpop.eup %7322  ;;  %4037 = vadd.xlane.f32.xlu0 %v4036_v51 }
0x18b0   : > { %v4039_v52 = vsel %vm1351_vm4, %v9205_v19, 0.0 }
0x18b1   : > { %4040 = vadd.xlane.f32.xlu1 %v4039_v52 }
0x1928   : > { %v3681_v2 = vpop.xlane.xlu0 %3680 }
0x1929   : > { %7324 = vrcp.f32 %v3681_v2 }
0x192a   : > { %v3684_v3 = vpop.xlane.xlu1 %3683 }
0x192b   : > { %7326 = vrcp.f32 %v3684_v3 }
0x192c   : > { %v3687_v1 = vpop.xlane.xlu0 %3686 }
0x192d   : > { %7328 = vrcp.f32 %v3687_v1 }
0x192e   : > { %v3591_v8 = vpop.xlane.xlu1 %3590 }
0x192f   : > { %7330 = vrcp.f32 %v3591_v8 }
0x1930   : > { %v3594_v55 = vpop.xlane.xlu0 %3593 }
0x1931   : > { %7332 = vrcp.f32 %v3594_v55 }
0x1932   : > { %v3597_v4 = vpop.xlane.xlu1 %3596 }
0x1933   : > { %v7325_v6 = vpop.eup %7324  ;;  %7334 = vrcp.f32 %v3597_v4 }
0x1934   : > { %v3885_v14 = vpop.xlane.xlu0 %3884  ;;  %v3691_v61 = vmul.f32 %v7325_v6, %v9159_v9  ;;  %v3761_v9 = vsel %vm1478_vm14, %v9125_v7, 0  ;;  %v6104_v6 = vld [vmem:[#allocation16 + $0xb] ss:$0 sm:$0xff] }
0x1935   : > { %v7327_v43 = vpop.eup %7326 }
0x1936   : > { %v3888_v60 = vpop.xlane.xlu1 %3887  ;;  %v3692_v54 = vmul.f32 %v7327_v43, %v9163_v24  ;;  %v3900_v24 = vpack.c.bf16 %v3812_v57, %v3812_v57 }
0x1937   : > { %v7329_v15 = vpop.eup %7328  ;;  %7336 = vrcp.f32 %v3888_v60 }
0x1938   : > { %v3693_v11 = vmul.f32 %v7329_v15, %v9168_v28  ;;  %7338 = vrcp.f32 %v3885_v14  ;;  %v3694_v63 = vpack.c.bf16 %v3692_v54, %v3691_v61  ;;  %v3891_v16 = vpop.xlane.xlu0 %3890  ;;  %v3908_v47 = vsel %vm1478_vm14, %v3900_v24, 0 }
0x1939   : > { %v7331_v12 = vpop.eup %7330  ;;  %7340 = vrcp.f32 %v3891_v16 }
0x193a   : > { %6673 = vmatprep.mubr.msk.bf16.mxu1 %vm1344_vm15, %v3694_v63  ;;  %v3695_v22 = vpack.c.bf16 %v3693_v11, %v3693_v11  ;;  %v3601_v31 = vmul.f32 %v7331_v12, %v9172_v30  ;;  %v4035_v36 = vpop.xlane.xlu1 %4034  ;;  %v3962_v30 = vmul.f32 %v8727_v40, %v9110_v5 }
0x193b   : > { %v7333_v23 = vpop.eup %7332 }
0x193c   : > { %6674 = vmatmul.mubr.msk.bf16.vlgmr.msra.gmra.mrb[56].mxu1 %vm1344_vm15, %v3695_v22  ;;  %v3602_v28 = vmul.f32 %v7333_v23, %v9176_v32  ;;  %v4038_v34 = vpop.xlane.xlu0 %4037  ;;  %v4050_v46 = vpack.c.bf16 %v3962_v30, %v3962_v30  ;;  %v7185_v30 = vld [vmem:[#allocation19 + $0x28] sm:$0xff]  }
0x193d   : > { %6678 = vmatpush3.bf16.msra.mxu1 %v3761_v9  ;;  %v7335_v33 = vpop.eup %7334  ;;  %7342 = vrcp.f32 %v4038_v34 }
0x193e   : > { %6936 = vmatprep.subr.msk.bf16.mxu1 %vm1478_vm14, %v3900_v24  ;;  %v3604_v29 = vpack.c.bf16 %v3602_v28, %v3601_v31  ;;  %v3603_v38 = vmul.f32 %v7335_v33, %v9181_v45  ;;  %7344 = vrcp.f32 %v4035_v36  ;;  %v4041_v45 = vpop.xlane.xlu1 %4040  ;;  %v4058_v52 = vsel %vm1478_vm14, %v4050_v46, 0 }
0x193f   : > { %7346 = vrcp.f32 %v4041_v45  ;;  %v7193_v45 = vld [vmem:[#allocation22 + $0xa8] sm:$0xff]  }
0x1940   : > { %6679 = vmatprep.mubr.msk.bf16.mxu1 %vm1344_vm15, %v3604_v29  ;;  %v3605_v41 = vpack.c.bf16 %v3603_v38, %v3603_v38 }
0x1941   : > { %v7337_v56 = vpop.eup %7336 }
0x1942   : > { %v7339_v50 = vpop.eup %7338  ;;  %v3896_v7 = vmul.f32 %v7337_v56, %v9189_v10 }
0x1943   : > { %v3895_v32 = vmul.f32 %v7339_v50, %v9185_v48  ;;  %v7341_v35 = vpop.eup %7340 }
0x1944   : > { %v3897_v5 = vmul.f32 %v7341_v35, %v9193_v37  ;;  %v7183_v37 = vld [vmem:[#allocation14 + $0xb8] sm:$0xff]  }
0x1945   : > { %v3898_v18 = vpack.c.bf16 %v3896_v7, %v3895_v32  ;;  %6709 = vmatprep.subr.bf16.mxu0 %v7183_v37  ;;  %v7184_v7 = vld [vmem:[#allocation19 + $0x20] sm:$0xff]  }
0x1946   : > { %v3899_v58 = vpack.c.bf16 %v3897_v5, %v3897_v5  ;;  %6710 = vmatpush3.bf16.msra.mxu0 %v7183_v37  ;;  %v7188_v32 = vld [vmem:[#allocation22 + $0x80] sm:$0xff]  }
0x1947   : > { %v7343_v10 = vpop.eup %7342  ;;  %6715 = vmatprep.subr.bf16.mxu0 %v7184_v7 }
0x1948   : > { %6680 = vmatmul.mubr.msk.bf16.vlgmr.msra.gmra.mrb[56].mxu1 %vm1344_vm15, %v3605_v41  ;;  %v7345_v39 = vpop.eup %7344  ;;  %v4046_v48 = vmul.f32 %v7343_v10, %v9201_v49  ;;  %v7189_v41 = vld [vmem:[#allocation22 + $0x88] sm:$0xff]  }
0x1949   : > { %6690 = vmatpush3.bf16.msra.mxu1 %v3908_v47  ;;  %6691 = vmatprep.mubr.msk.bf16.mxu1 %vm1344_vm15, %v3898_v18  ;;  %v4045_v62 = vmul.f32 %v7345_v39, %v9197_v59  ;;  %v7347_v53 = vpop.eup %7346  ;;  %v7190_v18 = vld [vmem:[#allocation22 + $0x90] sm:$0xff]   ;;  %v7191_v47 = vld [vmem:[#allocation22 + $0x98] sm:$0xff]  }
0x194a   : > { %6938 = vmatprep.subr.msk.bf16.mxu1 %vm1478_vm14, %v4050_v46  ;;  %v4047_v2 = vmul.f32 %v7347_v53, %v9205_v19  ;;  %v7192_v46 = vld [vmem:[#allocation22 + $0xa0] sm:$0xff]  }
0x194b   : > { %v4048_v51 = vpack.c.bf16 %v4046_v48, %v4045_v62 }
0x194c   : > { %v4049_v3 = vpack.c.bf16 %v4047_v2, %v4047_v2  ;;  %v6109_v2 = vld [vmem:[#allocation17 + $0x8] ss:$0 sm:$0xff] }
0x1954   : > { %6692 = vmatmul.mubr.msk.bf16.vlgmr.msra.gmra.mrb[56].mxu1 %vm1344_vm15, %v3899_v58 }
0x1955   : > { %6702 = vmatpush3.bf16.msra.mxu1 %v4058_v52  ;;  %6703 = vmatprep.mubr.msk.bf16.mxu1 %vm1344_vm15, %v4048_v51 }
0x1956   : > { %6723 = vmatprep.subr.bf16.mxu1 %v7188_v32 }
0x1960   : > { %6704 = vmatmul.mubr.msk.bf16.vlgmr.msra.gmra.mrb[56].mxu1 %vm1344_vm15, %v4049_v3 }
0x1961   : > { %6724 = vmatpush3.bf16.msra.mxu1 %v7188_v32 }
0x1962   : > { %6725 = vmatprep.subr.bf16.mxu1 %v7189_v41 }
0x1965   : > { %6726 = vmatpush3.bf16.msra.mxu1 %v7189_v41 }
0x1966   : > { %6727 = vmatprep.subr.bf16.mxu1 %v7190_v18 }
0x1969   : > { %6728 = vmatpush3.bf16.msra.mxu1 %v7190_v18 }
0x196a   : > { %6729 = vmatprep.subr.bf16.mxu1 %v7191_v47 }
0x196d   : > { %6730 = vmatpush3.bf16.msra.mxu1 %v7191_v47 }
0x196e   : > { %6731 = vmatprep.subr.bf16.mxu1 %v7192_v46 }
0x1971   : > { %6732 = vmatpush3.bf16.msra.mxu1 %v7192_v46 }
0x1972   : > { %6733 = vmatprep.subr.bf16.mxu1 %v7193_v45 }
0x1975   : > { %6734 = vmatpush3.bf16.msra.mxu1 %v7193_v45 }
0x1a33   : > { %v6705_v49 = vpop.f32.mrb[56].mxu1 }
0x1a34   : > { %v4094_v59 = vpop.f32.mrb[57].mxu1  ;;  %v4117_v4 = vpack.c.bf16 %v6705_v49, %v6705_v49 }
0x1a35   : > { %v6706_v1 = vpop.f32.mrb[58].mxu1 }
0x1a36   : > { %v4097_v8 = vpop.f32.mrb[59].mxu1 }
0x1a37   : > { %v4116_v55 = vpack.c.bf16 %v4097_v8, %v4094_v59  ;;  %v6110_v8 = vld [vmem:[#allocation17 + $0x9] ss:$0 sm:$0xff] }
0x1a39   : > { %6711 = vmatprep.mubr.msk.bf16.mxu0 %vm1009_vm2, %v4116_v55 }
0x1a3a   : > { %6712 = vmatmul.mubr.msk.bf16.vlgmr.msra.gmra.mrb[64].mxu0 %vm1009_vm2, %v4117_v4 }
0x1a3b   : > { %6716 = vmatpush3.bf16.msra.mxu0 %v7184_v7 }
0x1a3c   : > { %6717 = vmatprep.subr.bf16.mxu0 %v7185_v30 }
0x1a3f   : > { %6718 = vmatpush3.bf16.msra.mxu0 %v7185_v30 }
0x1a40   : > { %6743 = vmatprep.subr.bf16.mxu0 %v7994_v42 }
0x1b0d   : > { %v6713_v14 = vpop.f32.mrb[64].mxu0 }
0x1b0e   : > { %v4178_v43 = vpop.f32.mrb[65].mxu0  ;;  %v4187_v19 = vadd.f32 %v6713_v14, %v6104_v6 }
0x1b0f   : > { %v4179_v60 = vadd.f32 %v6104_v6, %v4178_v43  ;;  %v6714_v61 = vpop.f32.mrb[66].mxu0 }
0x1b10   : > { %v4181_v54 = vpop.f32.mrb[67].mxu0  ;;  %v4198_v12 = vadd.f32 %v4187_v19, %v8897_v20  ;;  %v7186_v61 = vld [vmem:[#allocation14 + $0xc0] sm:$0xff]  }
0x1b11   : > { %v4182_v15 = vadd.f32 %v6104_v6, %v4181_v54  ;;  %v4196_v11 = vadd.f32 %v4179_v60, %v8889_v17 }
0x1b12   : > { %v4205_v22 = vsel %vm1016_vm1, %v4198_v12, 0.0 }
0x1b13   : > { %v4199_v63 = vsel %vm1009_vm2, %v4196_v11, 0.0  ;;  %v4197_v57 = vadd.f32 %v4182_v15, %v8891_v0  ;;  %v7187_v15 = vld [vmem:[#allocation14 + $0xc8] sm:$0xff]  }
0x1b14   : > { %4200 = vadd.xlane.f32.xlu0 %v4199_v63  ;;  %v7195_v63 = vld [vmem:[#allocation22 + $0xb8] sm:$0xff]  }
0x1b15   : > { %v4202_v16 = vsel %vm1009_vm2, %v4197_v57, 0.0 }
0x1b16   : > { %4203 = vadd.xlane.f32.xlu1 %v4202_v16 }
0x1b18   : > { %4206 = vadd.xlane.f32.xlu0 %v4205_v22 }
0x1ba1   : > { %v4201_v23 = vpop.xlane.xlu0 %4200 }
0x1ba2   : > { %v4208_v9 = vmul.f32 0.03125, %v4201_v23 }
0x1ba3   : > { %v4204_v24 = vpop.xlane.xlu1 %4203 }
0x1ba4   : > { %v4211_v31 = vsub.f32 %v4196_v11, %v4208_v9  ;;  %v4209_v28 = vmul.f32 0.03125, %v4204_v24  ;;  %v7194_v11 = vld [vmem:[#allocation22 + $0xb0] sm:$0xff]  }
0x1ba5   : > { %v4207_v29 = vpop.xlane.xlu0 %4206  ;;  %6735 = vmatprep.subr.bf16.mxu1 %v7194_v11 }
0x1ba6   : > { %v4212_v17 = vsub.f32 %v4197_v57, %v4209_v28  ;;  %v4210_v33 = vmul.f32 0.03125, %v4207_v29  ;;  %v4214_v34 = vmul.f32 %v4211_v31, %v4211_v31  ;;  %6736 = vmatpush3.bf16.msra.mxu1 %v7194_v11  ;;  %v6111_v57 = vld [vmem:[#allocation20 + $0x2] ss:$0 sm:$0xff] }
0x1ba7   : > { %6737 = vmatprep.subr.bf16.mxu1 %v7195_v63 }
0x1ba8   : > { %v4213_v56 = vsub.f32 %v4198_v12, %v4210_v33  ;;  %v4217_v0 = vsel %vm1009_vm2, %v4214_v34, 0.0  ;;  %v4215_v20 = vmul.f32 %v4212_v17, %v4212_v17 }
0x1ba9   : > { %4218 = vadd.xlane.f32.xlu1 %v4217_v0 }
0x1baa   : > { %v4220_v36 = vsel %vm1009_vm2, %v4215_v20, 0.0  ;;  %v4216_v50 = vmul.f32 %v4213_v56, %v4213_v56  ;;  %6738 = vmatpush3.bf16.msra.mxu1 %v7195_v63 }
0x1bab   : > { %4221 = vadd.xlane.f32.xlu0 %v4220_v36  ;;  %6775 = vmatprep.subr.bf16.mxu1 %v7994_v42  ;;  %v6116_v36 = vld [vmem:[#allocation23 + $0x2] ss:$0 sm:$0xff] }
0x1bac   : > { %v4223_v38 = vsel %vm1016_vm1, %v4216_v50, 0.0 }
0x1bad   : > { %4224 = vadd.xlane.f32.xlu1 %v4223_v38 }
0x1c36   : > { %v4219_v35 = vpop.xlane.xlu1 %4218 }
0x1c37   : > { %v4226_v10 = vmul.f32 0.03125, %v4219_v35 }
0x1c38   : > { %v4222_v39 = vpop.xlane.xlu0 %4221 }
0x1c39   : > { %v4229_v5 = vadd.f32 1e-05, %v4226_v10  ;;  %v4227_v48 = vmul.f32 0.03125, %v4222_v39 }
0x1c3a   : > { %v4225_v62 = vpop.xlane.xlu1 %4224 }
0x1c3b   : > { %7348 = vrsqrt.f32 %v4229_v5  ;;  %v4230_v58 = vadd.f32 1e-05, %v4227_v48  ;;  %v4228_v51 = vmul.f32 0.03125, %v4225_v62 }
0x1c3d   : > { %7350 = vrsqrt.f32 %v4230_v58  ;;  %v4231_v52 = vadd.f32 1e-05, %v4228_v51 }
0x1c3f   : > { %7352 = vrsqrt.f32 %v4231_v52 }
0x1c45   : > { %v7349_v53 = vpop.eup %7348 }
0x1c46   : > { %v4235_v3 = vmul.f32 %v7349_v53, %v4211_v31 }
0x1c47   : > { %v7351_v37 = vpop.eup %7350 }
0x1c48   : > { %v4236_v49 = vmul.f32 %v7351_v37, %v4212_v17  ;;  %v4244_v59 = vmul.f32 %v6109_v2, %v4235_v3 }
0x1c49   : > { %v7353_v1 = vpop.eup %7352 }
0x1c4a   : > { %v4237_v55 = vmul.f32 %v7353_v1, %v4213_v56  ;;  %v4245_v4 = vmul.f32 %v6109_v2, %v4236_v49  ;;  %v4253_v6 = vadd.f32 %v6110_v8, %v4244_v59 }
0x1c4c   : > { %v4254_v14 = vadd.f32 %v6110_v8, %v4245_v4  ;;  %v4246_v43 = vmul.f32 %v6109_v2, %v4237_v55  ;;  %v7196_v4 = vld [vmem:[#allocation14 + $0xd0] sm:$0xff]  }
0x1c4e   : > { %v4282_v19 = vpack.c.bf16 %v4254_v14, %v4253_v6  ;;  %v4255_v60 = vadd.f32 %v6110_v8, %v4246_v43 }
0x1c50   : > { %6719 = vmatprep.mubr.msk.bf16.mxu0 %vm1009_vm2, %v4282_v19  ;;  %v4283_v54 = vpack.c.bf16 %v4255_v60, %v4255_v60 }
0x1c52   : > { %6720 = vmatmul.mubr.msk.bf16.vlgmr.msra.gmra.mrb[68].mxu0 %vm1009_vm2, %v4283_v54 }
0x1c53   : > { %6744 = vmatpush3.bf16.msra.mxu0 %v7186_v61  ;;  %6747 = vmatprep.mubr.msk.bf16.mxu0 %vm7995_vm3, %v7994_v42 }
0x1c54   : > { %6745 = vmatprep.subr.bf16.mxu0 %v7994_v42 }
0x1c57   : > { %6746 = vmatpush3.bf16.msra.mxu0 %v7187_v15 }
0x1c58   : > { %6751 = vmatprep.subr.bf16.mxu0 %v7196_v4 }
0x1c5a   : > { %6748 = vmatmul.mubr.msk.bf16.vlgmr.msra.gmra.mrb[72].mxu0 %vm1009_vm2, %v9092_v44 }
0x1c5b   : > { %6752 = vmatpush3.bf16.msra.mxu0 %v7196_v4 }
0x1d25   : > { %v6721_v12 = vpop.f32.mrb[68].mxu0 }
0x1d26   : > { %v4351_v16 = vadd.f32 %v6721_v12, %v6111_v57  ;;  %v4342_v22 = vpop.f32.mrb[69].mxu0 }
0x1d27   : > { %v4343_v23 = vadd.f32 %v6111_v57, %v4342_v22  ;;  %v6722_v9 = vpop.f32.mrb[70].mxu0 }
0x1d28   : > { %v4345_v24 = vpop.f32.mrb[71].mxu0  ;;  %v4358_v28 = vmax.f32 %v4351_v16, 0.0  ;;  %v6125_v16 = vld [vmem:[#allocation17 + $0xa] ss:$0 sm:$0xff] }
0x1d29   : > { %v4346_v31 = vadd.f32 %v6111_v57, %v4345_v24  ;;  %v4356_v29 = vmax.f32 %v4343_v23, 0.0 }
0x1d2a   : > { %v4360_v34 = vpack.c.bf16 %v4358_v28, %v4358_v28  ;;  %v6126_v28 = vld [vmem:[#allocation17 + $0xb] ss:$0 sm:$0xff] }
0x1d2b   : > { %v4357_v17 = vmax.f32 %v4346_v31, 0.0 }
0x1d2d   : > { %v4359_v44 = vpack.c.bf16 %v4357_v17, %v4356_v29  ;;  %v9259_v33 = vpop.f32.mrb[72].mxu0 }
0x1d2e   : > { %v6749_v56 = vpop.f32.mrb[73].mxu0 }
0x1d2f   : > { %6739 = vmatprep.mubr.bf16.mxu1 %v4359_v44  ;;  %v4589_v0 = vpop.f32.mrb[74].mxu0 }
0x1d30   : > { %6740 = vmatmul.mubr.bf16.vlgmr.msra.gmra.mrb[60].mxu1 %v4360_v34  ;;  %v6750_v20 = vpop.f32.mrb[75].mxu0 }
0x1d31   : > { %6779 = vmatprep.mubr.msk.bf16.mxu1 %vm7995_vm3, %v7994_v42 }
0x1e03   : > { %v6741_v50 = vpop.f32.mrb[60].mxu1 }
0x1e04   : > { %v4449_v38 = vpop.f32.mrb[61].mxu1  ;;  %v4458_v7 = vadd.f32 %v6741_v50, %v6116_v36  ;;  %v7199_v50 = vld [vmem:[#allocation14 + $0xe8] sm:$0xff]  }
0x1e05   : > { %v4450_v30 = vadd.f32 %v6116_v36, %v4449_v38  ;;  %v6742_v32 = vpop.f32.mrb[62].mxu1  ;;  %v6131_v38 = vld [vmem:[#allocation16 + $0xd] ss:$0 sm:$0xff] }
0x1e06   : > { %v4452_v41 = vpop.f32.mrb[63].mxu1  ;;  %v4469_v35 = vadd.f32 %v4458_v7, %v4255_v60 }
0x1e07   : > { %v4453_v18 = vadd.f32 %v6116_v36, %v4452_v41  ;;  %v4467_v47 = vadd.f32 %v4450_v30, %v4253_v6  ;;  %v7197_v6 = vld [vmem:[#allocation14 + $0xd8] sm:$0xff]  }
0x1e08   : > { %v4476_v39 = vsel %vm1016_vm1, %v4469_v35, 0.0  ;;  %6753 = vmatprep.subr.bf16.mxu0 %v7197_v6 }
0x1e09   : > { %v4470_v46 = vsel %vm1009_vm2, %v4467_v47, 0.0  ;;  %v4468_v45 = vadd.f32 %v4453_v18, %v4254_v14  ;;  %6754 = vmatpush3.bf16.msra.mxu0 %v7197_v6  ;;  %v7198_v14 = vld [vmem:[#allocation14 + $0xe0] sm:$0xff]  }
0x1e0a   : > { %4471 = vadd.xlane.f32.xlu0 %v4470_v46  ;;  %6759 = vmatprep.subr.bf16.mxu0 %v7198_v14 }
0x1e0b   : > { %v4473_v10 = vsel %vm1009_vm2, %v4468_v45, 0.0 }
0x1e0c   : > { %4474 = vadd.xlane.f32.xlu1 %v4473_v10 }
0x1e0e   : > { %4477 = vadd.xlane.f32.xlu0 %v4476_v39 }
0x1e97   : > { %v4472_v5 = vpop.xlane.xlu0 %4471 }
0x1e98   : > { %v4479_v48 = vmul.f32 0.03125, %v4472_v5 }
0x1e99   : > { %v4475_v62 = vpop.xlane.xlu1 %4474 }
0x1e9a   : > { %v4482_v58 = vsub.f32 %v4467_v47, %v4479_v48  ;;  %v4480_v51 = vmul.f32 0.03125, %v4475_v62 }
0x1e9b   : > { %v4478_v52 = vpop.xlane.xlu0 %4477 }
0x1e9c   : > { %v4483_v53 = vsub.f32 %v4468_v45, %v4480_v51  ;;  %v4481_v2 = vmul.f32 0.03125, %v4478_v52  ;;  %v4485_v3 = vmul.f32 %v4482_v58, %v4482_v58  ;;  %v6136_v51 = vld [vmem:[#allocation16 + $0xe] ss:$0 sm:$0xff] }
0x1e9e   : > { %v4484_v37 = vsub.f32 %v4469_v35, %v4481_v2  ;;  %v4488_v49 = vsel %vm1009_vm2, %v4485_v3, 0.0  ;;  %v4486_v59 = vmul.f32 %v4483_v53, %v4483_v53 }
0x1e9f   : > { %4489 = vadd.xlane.f32.xlu1 %v4488_v49 }
0x1ea0   : > { %v4491_v1 = vsel %vm1009_vm2, %v4486_v59, 0.0  ;;  %v4487_v8 = vmul.f32 %v4484_v37, %v4484_v37 }
0x1ea1   : > { %4492 = vadd.xlane.f32.xlu0 %v4491_v1 }
0x1ea2   : > { %v4494_v55 = vsel %vm1016_vm1, %v4487_v8, 0.0 }
0x1ea3   : > { %4495 = vadd.xlane.f32.xlu1 %v4494_v55 }
0x1f2c   : > { %v4490_v43 = vpop.xlane.xlu1 %4489 }
0x1f2d   : > { %v4497_v19 = vmul.f32 0.03125, %v4490_v43 }
0x1f2e   : > { %v4493_v60 = vpop.xlane.xlu0 %4492 }
0x1f2f   : > { %v4500_v61 = vadd.f32 1e-05, %v4497_v19  ;;  %v4498_v54 = vmul.f32 0.03125, %v4493_v60 }
0x1f30   : > { %v4496_v15 = vpop.xlane.xlu1 %4495 }
0x1f31   : > { %7354 = vrsqrt.f32 %v4500_v61  ;;  %v4501_v11 = vadd.f32 1e-05, %v4498_v54  ;;  %v4499_v63 = vmul.f32 0.03125, %v4496_v15 }
0x1f33   : > { %7356 = vrsqrt.f32 %v4501_v11  ;;  %v4502_v57 = vadd.f32 1e-05, %v4499_v63 }
0x1f35   : > { %7358 = vrsqrt.f32 %v4502_v57 }
0x1f3b   : > { %v7355_v12 = vpop.eup %7354 }
0x1f3c   : > { %v4506_v22 = vmul.f32 %v7355_v12, %v4482_v58 }
0x1f3d   : > { %v7357_v23 = vpop.eup %7356 }
0x1f3e   : > { %v4507_v9 = vmul.f32 %v7357_v23, %v4483_v53  ;;  %v4515_v24 = vmul.f32 %v6125_v16, %v4506_v22  ;;  %v6127_v22 = vld [vmem:[#allocation16 + $0xc] ss:$0 sm:$0xff] }
0x1f3f   : > { %v7359_v31 = vpop.eup %7358 }
0x1f40   : > { %v4508_v29 = vmul.f32 %v7359_v31, %v4484_v37  ;;  %v4516_v17 = vmul.f32 %v6125_v16, %v4507_v9  ;;  %v4524_v44 = vadd.f32 %v6126_v28, %v4515_v24 }
0x1f42   : > { %v4525_v34 = vadd.f32 %v6126_v28, %v4516_v17  ;;  %v4517_v56 = vmul.f32 %v6125_v16, %v4508_v29 }
0x1f44   : > { %v9269_v0 = vpack.c.bf16 %v4525_v34, %v4524_v44  ;;  %v4526_v20 = vadd.f32 %v6126_v28, %v4517_v56  ;;  %v4587_v44 = vadd.f32 %v6127_v22, %v9259_v33 }
0x1f46   : > { %6755 = vmatprep.mubr.msk.bf16.mxu0 %vm1009_vm2, %v9269_v0  ;;  %v9273_v36 = vpack.c.bf16 %v4526_v20, %v4526_v20  ;;  %v4752_v56 = vpack.c.bf16 %v4587_v44, %v4587_v44 }
0x1f48   : > { %6756 = vmatmul.mubr.msk.bf16.vlgmr.msra.gmra.mrb[76].mxu0 %vm1009_vm2, %v9273_v36 }
0x1f49   : > { %6760 = vmatpush3.bf16.msra.mxu0 %v7198_v14  ;;  %6763 = vmatprep.mubr.msk.bf16.mxu0 %vm1009_vm2, %v9269_v0 }
0x1f4a   : > { %6761 = vmatprep.subr.bf16.mxu0 %v7199_v50 }
0x1f4d   : > { %6762 = vmatpush3.bf16.msra.mxu0 %v7199_v50 }
0x1f4e   : > { %6767 = vmatprep.subr.bf16.mxu0 %v7994_v42 }
0x1f50   : > { %6764 = vmatmul.mubr.msk.bf16.vlgmr.msra.gmra.mrb[80].mxu0 %vm1009_vm2, %v9273_v36 }
0x1f51   : > { %6771 = vmatprep.mubr.msk.bf16.mxu0 %vm7995_vm3, %v7994_v42 }
0x201b   : > { %v6757_v7 = vpop.f32.mrb[76].mxu0 }
0x201c   : > { %v4659_v30 = vpop.f32.mrb[77].mxu0  ;;  %v9284_v47 = vadd.f32 %v6757_v7, %v6131_v38 }
0x201d   : > { %v4660_v32 = vadd.f32 %v6131_v38, %v4659_v30  ;;  %v6758_v41 = vpop.f32.mrb[78].mxu0 }
0x201e   : > { %v4662_v18 = vpop.f32.mrb[79].mxu0  ;;  %v4748_v59 = vmul.f32 %v8711_v25, %v9284_v47  ;;  %v4820_v1 = vmul.f32 %v8714_v26, %v9284_v47 }
0x201f   : > { %v4663_v46 = vadd.f32 %v6131_v38, %v4662_v18  ;;  %v4746_v45 = vmul.f32 %v8711_v25, %v4660_v32  ;;  %v4818_v35 = vmul.f32 %v8714_v26, %v4660_v32  ;;  %v4978_v10 = vmul.f32 %v8717_v27, %v4660_v32 }
0x2020   : > { %v9290_v39 = vmul.f32 %v8727_v40, %v4660_v32  ;;  %v4754_v19 = vpack.c.bf16 %v4748_v59, %v4748_v59  ;;  %v4825_v60 = vpack.c.bf16 %v4820_v1, %v4820_v1  ;;  %v4980_v38 = vmul.f32 %v8717_v27, %v9284_v47 }
0x2021   : > { %v4747_v5 = vmul.f32 %v8711_v25, %v4663_v46  ;;  %v4819_v48 = vmul.f32 %v8714_v26, %v4663_v46  ;;  %v4979_v62 = vmul.f32 %v8717_v27, %v4663_v46  ;;  %v9296_v58 = vmul.f32 %v8727_v40, %v4663_v46 }
0x2022   : > { %v4762_v29 = vsel %vm1009_vm2, %v4754_v19, 0  ;;  %v4830_v17 = vsel %vm1009_vm2, %v4825_v60, 0  ;;  %v4985_v33 = vpack.c.bf16 %v4980_v38, %v4980_v38  ;;  %v5095_v32 = vmul.f32 %v8727_v40, %v9284_v47 }
0x2023   : > { %v6765_v52 = vpop.f32.mrb[80].mxu0  ;;  %v4753_v53 = vpack.c.bf16 %v4747_v5, %v4746_v45  ;;  %v4824_v2 = vpack.c.bf16 %v4819_v48, %v4818_v35  ;;  %v4984_v3 = vpack.c.bf16 %v4979_v62, %v4978_v10  ;;  %v5099_v37 = vpack.c.bf16 %v9296_v58, %v9290_v39 }
0x2024   : > { %v4732_v49 = vpop.f32.mrb[81].mxu0  ;;  %v9334_v28 = vadd.f32 %v6765_v52, %v6136_v51  ;;  %v4990_v7 = vsel %vm1009_vm2, %v4985_v33, 0  ;;  %v5100_v41 = vpack.c.bf16 %v5095_v32, %v5095_v32 }
0x2025   : > { %v4733_v8 = vadd.f32 %v6136_v51, %v4732_v49  ;;  %v6766_v55 = vpop.f32.mrb[82].mxu0  ;;  %v4759_v4 = vsel %vm1009_vm2, %v4753_v53, 0  ;;  %v4827_v6 = vsel %vm1009_vm2, %v4824_v2, 0  ;;  %v4987_v20 = vsel %vm1009_vm2, %v4984_v3, 0 }
0x2026   : > { %v4735_v14 = vpop.f32.mrb[83].mxu0  ;;  %6768 = vmatpush3.bf16.xpose.msra.mxu0 %v4759_v4  ;;  %6776 = vmatpush3.bf16.xpose.msra.mxu1 %v4827_v6  ;;  %v4823_v34 = vmul.f32 %v8714_v26, %v9334_v28  ;;  %v5102_v30 = vsel %vm1009_vm2, %v5099_v37, 0  ;;  %v5105_v18 = vsel %vm1009_vm2, %v5100_v41, 0 }
0x2027   : > { %6769 = vmatprep.subr.bf16.mxu0 %v7994_v42  ;;  %v4736_v43 = vadd.f32 %v6136_v51, %v4735_v14  ;;  %6777 = vmatprep.subr.bf16.mxu1 %v7994_v42  ;;  %v9309_v61 = vmul.f32 %v8711_v25, %v4733_v8  ;;  %v4821_v54 = vmul.f32 %v8714_v26, %v4733_v8 }
0x2028   : > { %v9313_v15 = vmul.f32 %v8717_v27, %v4733_v8  ;;  %v9316_v11 = vmul.f32 %v8727_v40, %v4733_v8  ;;  %v4885_v50 = vpack.c.bf16 %v4823_v34, %v4823_v34 }
0x2029   : > { %v9319_v63 = vmul.f32 %v8711_v25, %v4736_v43  ;;  %v4822_v57 = vmul.f32 %v8714_v26, %v4736_v43  ;;  %v9323_v12 = vmul.f32 %v8717_v27, %v4736_v43  ;;  %v9326_v16 = vmul.f32 %v8727_v40, %v4736_v43 }
0x202a   : > { %v4890_v26 = vsel %vm1478_vm14, %v4885_v50, 0 }
0x202b   : > { %v4884_v23 = vpack.c.bf16 %v4822_v57, %v4821_v54  ;;  %v4816_v9 = vpack.c.bf16 %v9319_v63, %v9309_v61  ;;  %v5044_v24 = vpack.c.bf16 %v9323_v12, %v9313_v15  ;;  %v5159_v31 = vpack.c.bf16 %v9326_v16, %v9316_v11  ;;  %v7201_v11 = vld [vmem:[#allocation14 + $0xf8] sm:$0xff]  }
0x202e   : > { %6770 = vmatpush3.bf16.xpose.msra.mxu0 %v4762_v29  ;;  %6778 = vmatpush3.bf16.xpose.msra.mxu1 %v4830_v17 }
0x202f   : > { %6783 = vmatprep.subr.bf16.mxu0 %v7994_v42  ;;  %6799 = vmatprep.subr.bf16.mxu1 %v7994_v42 }
0x2035   : > { %6772 = vmatmul.mubr.msk.bf16.vlgmr.msra.gmra.mrb[84].mxu0 %vm1009_vm2, %v4752_v56  ;;  %6780 = vmatmul.mubr.msk.bf16.vlgmr.msra.gmra.mrb[64].mxu1 %vm1009_vm2, %v4752_v56 }
0x2036   : > { %6784 = vmatpush3.bf16.msra.mxu0 %v4884_v23  ;;  %6800 = vmatpush3.bf16.xpose.msra.mxu1 %v4987_v20 }
0x2037   : > { %6785 = vmatprep.subr.bf16.mxu0 %v7994_v42  ;;  %6801 = vmatprep.subr.bf16.mxu1 %v7994_v42 }
0x2038   : > { %6803 = vmatprep.mubr.msk.bf16.mxu1 %vm7995_vm3, %v7994_v42  ;;  %6787 = vmatprep.mubr.msk.bf16.mxu0 %vm7995_vm3, %v7994_v42 }
0x203a   : > { %6786 = vmatpush3.bf16.msra.mxu0 %v4890_v26 }
0x203b   : > { %6791 = vmatprep.subr.bf16.mxu0 %v7994_v42 }
0x203e   : > { %6802 = vmatpush3.bf16.xpose.msra.mxu1 %v4990_v7 }
0x203f   : > { %6815 = vmatprep.subr.bf16.mxu1 %v7994_v42 }
0x2045   : > { %6804 = vmatmul.mubr.msk.bf16.vlgmr.msra.gmra.mrb[68].mxu1 %vm1009_vm2, %v4752_v56 }
0x2046   : > { %6816 = vmatpush3.bf16.xpose.msra.mxu1 %v5102_v30  ;;  %6819 = vmatprep.mubr.msk.bf16.mxu1 %vm7995_vm3, %v7994_v42 }
0x2047   : > { %6817 = vmatprep.subr.bf16.mxu1 %v7994_v42 }
0x204e   : > { %6818 = vmatpush3.bf16.xpose.msra.mxu1 %v5105_v18 }
0x204f   : > { %6839 = vmatprep.subr.bf16.mxu1 %v7994_v42 }
0x2055   : > { %6820 = vmatmul.mubr.msk.bf16.vlgmr.msra.gmra.mrb[72].mxu1 %vm1009_vm2, %v4752_v56 }
0x2056   : > { %6843 = vmatprep.mubr.msk.bf16.mxu1 %vm7995_vm3, %v7994_v42 }
0x2108   : > { %v4798_v46 = vpop.f32.mrb[84].mxu0  ;;  %v4866_v45 = vpop.f32.mrb[64].mxu1 }
0x2109   : > { %v4799_v47 = vadd.f32 %v4798_v46, %v9001_v21  ;;  %v4867_v35 = vadd.f32 %v4866_v45, %v9001_v21  ;;  %v6773_v10 = vpop.f32.mrb[85].mxu0  ;;  %v6781_v39 = vpop.f32.mrb[65].mxu1  ;;  %v4751_v45 = vmul.f32 %v8711_v25, %v9334_v28 }
0x210a   : > { %v4801_v5 = vpop.f32.mrb[86].mxu0  ;;  %v4869_v48 = vpop.f32.mrb[66].mxu1 }
0x210b   : > { %v6774_v62 = vpop.f32.mrb[87].mxu0  ;;  %v6782_v58 = vpop.f32.mrb[67].mxu1  ;;  %v4872_v51 = vsel %vm2578_vm5, %v4867_v35, -inf  ;;  %v4804_v52 = vsel %vm2578_vm5, %v4799_v47, -inf  ;;  %v4983_v48 = vmul.f32 %v8717_v27, %v9334_v28 }
0x210c   : > { %4873 = vmax.xlane.f32.xlu0 %v4872_v51  ;;  %4805 = vmax.xlane.f32.xlu1 %v4804_v52  ;;  %v5098_v51 = vmul.f32 %v8727_v40, %v9334_v28  ;;  %v7200_v40 = vld [vmem:[#allocation14 + $0xf0] sm:$0xff]  }
0x210d   : > { %v5045_v61 = vpack.c.bf16 %v4983_v48, %v4983_v48 }
0x210e   : > { %v5160_v15 = vpack.c.bf16 %v5098_v51, %v5098_v51 }
0x2118   : > { %v5026_v53 = vpop.f32.mrb[68].mxu1 }
0x2119   : > { %v5027_v2 = vadd.f32 %v5026_v53, %v9001_v21  ;;  %v6805_v3 = vpop.f32.mrb[69].mxu1 }
0x211a   : > { %v5029_v37 = vpop.f32.mrb[70].mxu1 }
0x211b   : > { %v6806_v49 = vpop.f32.mrb[71].mxu1  ;;  %v5032_v59 = vsel %vm2578_vm5, %v5027_v2, -inf }
0x211c   : > { %5033 = vmax.xlane.f32.xlu0 %v5032_v59  ;;  %v6149_v49 = vld [vmem:[#allocation16 + $0xf] ss:$0 sm:$0xff] }
0x2128   : > { %v5141_v1 = vpop.f32.mrb[72].mxu1 }
0x2129   : > { %v5142_v8 = vadd.f32 %v5141_v1, %v9001_v21  ;;  %v6821_v55 = vpop.f32.mrb[73].mxu1 }
0x212a   : > { %v5144_v4 = vpop.f32.mrb[74].mxu1 }
0x212b   : > { %v6822_v6 = vpop.f32.mrb[75].mxu1  ;;  %v5147_v14 = vsel %vm2578_vm5, %v5142_v8, -inf }
0x212c   : > { %5148 = vmax.xlane.f32.xlu1 %v5147_v14 }
0x2199   : > { %v4874_v43 = vpop.xlane.xlu0 %4873  ;;  %v4806_v19 = vpop.xlane.xlu1 %4805 }
0x219a   : > { %v4875_v60 = vsub.f32 %v4867_v35, %v4874_v43  ;;  %v4807_v54 = vsub.f32 %v4799_v47, %v4806_v19  ;;  %v4817_v35 = vpack.c.bf16 %v4751_v45, %v4751_v45  ;;  %v7212_v45 = vld [vmem:[#allocation22 + $0xf0] sm:$0xff]  }
0x219c   : > { %v4876_v57 = vmul.f32 1.442695, %v4875_v60  ;;  %v4808_v22 = vmul.f32 1.442695, %v4807_v54  ;;  %v4936_v5 = vsel %vm1478_vm14, %v4817_v35, 0 }
0x219d   : > { %v6155_v35 = vld [vmem:[#allocation20 + $0x3] ss:$0 sm:$0xff] }
0x219e   : > { %7360 = vpow2.f32 %v4876_v57 }
0x219f   : > { %7362 = vpow2.f32 %v4808_v22  ;;  %v7202_v22 = vld [vmem:[#allocation19 + $0x30] sm:$0xff]  }
0x21a0   : > { %6840 = vmatpush3.bf16.msra.mxu1 %v7202_v22 }
0x21a1   : > { %6841 = vmatprep.subr.bf16.mxu1 %v7994_v42 }
0x21a8   : > { %v7361_v23 = vpop.eup %7360 }
0x21a9   : > { %v7363_v29 = vpop.eup %7362  ;;  %v5034_v17 = vpop.xlane.xlu0 %5033  ;;  %v4878_v44 = vsel %vm2578_vm5, %v7361_v23, 0.0 }
0x21aa   : > { %v5035_v21 = vsub.f32 %v5027_v2, %v5034_v17  ;;  %4879 = vadd.xlane.f32.xlu0 %v4878_v44  ;;  %v4810_v34 = vsel %vm2578_vm5, %v7363_v29, 0.0  ;;  %v7207_v17 = vld [vmem:[#allocation22 + $0xc8] sm:$0xff]   ;;  %v7208_v44 = vld [vmem:[#allocation22 + $0xd0] sm:$0xff]  }
0x21ab   : > { %4811 = vadd.xlane.f32.xlu1 %v4810_v34  ;;  %v7210_v34 = vld [vmem:[#allocation22 + $0xe0] sm:$0xff]  }
0x21ac   : > { %v5036_v56 = vmul.f32 1.442695, %v5035_v21  ;;  %v7209_v21 = vld [vmem:[#allocation22 + $0xd8] sm:$0xff]  }
0x21ae   : > { %7364 = vpow2.f32 %v5036_v56  ;;  %v7211_v56 = vld [vmem:[#allocation22 + $0xe8] sm:$0xff]  }
0x21b8   : > { %v7365_v20 = vpop.eup %7364 }
0x21b9   : > { %v5149_v50 = vpop.xlane.xlu1 %5148  ;;  %v5038_v38 = vsel %vm2578_vm5, %v7365_v20, 0.0 }
0x21ba   : > { %v5150_v26 = vsub.f32 %v5142_v8, %v5149_v50  ;;  %5039 = vadd.xlane.f32.xlu0 %v5038_v38 }
0x21bc   : > { %v5151_v33 = vmul.f32 1.442695, %v5150_v26 }
0x21be   : > { %7366 = vpow2.f32 %v5151_v33  ;;  %v6153_v33 = vld [vmem:[#allocation17 + $0xc] ss:$0 sm:$0xff] }
0x21c8   : > { %v7367_v7 = vpop.eup %7366 }
0x21c9   : > { %v5153_v30 = vsel %vm2578_vm5, %v7367_v7, 0.0 }
0x21ca   : > { %5154 = vadd.xlane.f32.xlu1 %v5153_v30  ;;  %v6154_v30 = vld [vmem:[#allocation17 + $0xd] ss:$0 sm:$0xff] }
0x2237   : > { %v4880_v32 = vpop.xlane.xlu0 %4879 }
0x2238   : > { %7368 = vrcp.f32 %v4880_v32  ;;  %v4812_v41 = vpop.xlane.xlu1 %4811 }
0x2239   : > { %7370 = vrcp.f32 %v4812_v41 }
0x2242   : > { %v7369_v18 = vpop.eup %7368 }
0x2243   : > { %v4882_v46 = vmul.f32 %v7369_v18, %v7361_v23  ;;  %v7371_v39 = vpop.eup %7370  ;;  %v7203_v23 = vld [vmem:[#allocation19 + $0x38] sm:$0xff]  }
0x2244   : > { %v4814_v25 = vmul.f32 %v7371_v39, %v7363_v29  ;;  %6842 = vmatpush3.bf16.msra.mxu1 %v7203_v23  ;;  %v7204_v29 = vld [vmem:[#allocation25] sm:$0xff]  }
0x2245   : > { %v4883_v47 = vpack.c.bf16 %v4882_v46, %v4882_v46  ;;  %6867 = vmatprep.subr.bf16.mxu1 %v7204_v29  ;;  %v7205_v46 = vld [vmem:[#allocation25 + $0x8] sm:$0xff]  }
0x2246   : > { %v4815_v62 = vpack.c.bf16 %v4814_v25, %v4814_v25 }
0x2247   : > { %6788 = vmatmul.mubr.msk.bf16.vlgmr.msra.gmra.mrb[88].mxu0 %vm2661_vm6, %v4883_v47  ;;  %v5040_v10 = vpop.xlane.xlu0 %5039  ;;  %v7213_v47 = vld [vmem:[#allocation22 + $0xf8] sm:$0xff]  }
0x2248   : > { %6792 = vmatpush3.bf16.msra.mxu0 %v4816_v9  ;;  %6795 = vmatprep.mubr.msk.bf16.mxu0 %vm7995_vm3, %v7994_v42  ;;  %7372 = vrcp.f32 %v5040_v10  ;;  %v5050_v9 = vsel %vm1478_vm14, %v5045_v61, 0  ;;  %v6170_v61 = vld [vmem:[#allocation26] ss:$0 sm:$0xff] }
0x2249   : > { %6793 = vmatprep.subr.bf16.mxu0 %v7994_v42 }
0x224c   : > { %6794 = vmatpush3.bf16.msra.mxu0 %v4936_v5 }
0x224d   : > { %6807 = vmatprep.subr.bf16.mxu0 %v7994_v42 }
0x2252   : > { %v7373_v63 = vpop.eup %7372 }
0x2253   : > { %6796 = vmatmul.mubr.msk.bf16.vlgmr.msra.gmra.mrb[88].mxu0 %vm2661_vm6, %v4815_v62  ;;  %v5042_v27 = vmul.f32 %v7373_v63, %v7365_v20 }
0x2254   : > { %6808 = vmatpush3.bf16.msra.mxu0 %v5044_v24  ;;  %6811 = vmatprep.mubr.msk.bf16.mxu0 %vm7995_vm3, %v7994_v42  ;;  %v5165_v24 = vsel %vm1478_vm14, %v5160_v15, 0 }
0x2255   : > { %6809 = vmatprep.subr.bf16.mxu0 %v7994_v42  ;;  %v5043_v52 = vpack.c.bf16 %v5042_v27, %v5042_v27 }
0x2257   : > { %v5155_v58 = vpop.xlane.xlu1 %5154 }
0x2258   : > { %6810 = vmatpush3.bf16.msra.mxu0 %v5050_v9  ;;  %7374 = vrcp.f32 %v5155_v58 }
0x2259   : > { %6823 = vmatprep.subr.bf16.mxu0 %v7994_v42 }
0x225f   : > { %6812 = vmatmul.mubr.msk.bf16.vlgmr.msra.gmra.mrb[88].mxu0 %vm2661_vm6, %v5043_v52  ;;  %v6159_v52 = vld [vmem:[#allocation23 + $0x3] ss:$0 sm:$0xff] }
0x2260   : > { %6824 = vmatpush3.bf16.msra.mxu0 %v5159_v31  ;;  %6827 = vmatprep.mubr.msk.bf16.mxu0 %vm7995_vm3, %v7994_v42 }
0x2261   : > { %6825 = vmatprep.subr.bf16.mxu0 %v7994_v42 }
0x2262   : > { %v7375_v12 = vpop.eup %7374 }
0x2263   : > { %v5157_v53 = vmul.f32 %v7375_v12, %v7367_v7 }
0x2264   : > { %6826 = vmatpush3.bf16.msra.mxu0 %v5165_v24 }
0x2265   : > { %6831 = vmatprep.subr.bf16.mxu0 %v7994_v42  ;;  %v5158_v28 = vpack.c.bf16 %v5157_v53, %v5157_v53 }
0x226b   : > { %6828 = vmatmul.mubr.msk.bf16.vlgmr.msra.gmra.mrb[88].mxu0 %vm2661_vm6, %v5158_v28 }
0x226c   : > { %6832 = vmatpush3.bf16.msra.mxu0 %v7200_v40  ;;  %6835 = vmatprep.mubr.msk.bf16.mxu0 %vm7995_vm3, %v7994_v42 }
0x226d   : > { %6833 = vmatprep.subr.bf16.mxu0 %v7994_v42 }
0x2270   : > { %6834 = vmatpush3.bf16.msra.mxu0 %v7201_v11 }
0x2271   : > { %6847 = vmatprep.subr.bf16.mxu0 %v7994_v42 }
0x233e   : > { %v5201_v16 = vpop.f32.mrb[88].mxu0 }
0x233f   : > { %v5213_v31 = vpack.c.bf16 %v5201_v16, %v5201_v16  ;;  %v6829_v2 = vpop.f32.mrb[89].mxu0 }
0x2340   : > { %v5204_v3 = vpop.f32.mrb[90].mxu0 }
0x2341   : > { %v6830_v37 = vpop.f32.mrb[91].mxu0  ;;  %6836 = vmatmul.mubr.msk.bf16.vlgmr.msra.gmra.mrb[92].mxu0 %vm1009_vm2, %v5213_v31 }
0x2342   : > { %6863 = vmatprep.mubr.msk.bf16.mxu0 %vm7995_vm3, %v7994_v42  ;;  %vm5599_vm3 = vcmask 386048  }
0x2414   : > { %v5271_v59 = vpop.f32.mrb[92].mxu0 }
0x2415   : > { %v5272_v1 = vadd.f32 %v6149_v49, %v5271_v59  ;;  %v6837_v8 = vpop.f32.mrb[93].mxu0 }
0x2416   : > { %v5274_v55 = vpop.f32.mrb[94].mxu0 }
0x2417   : > { %v5281_v4 = vadd.f32 %v5272_v1, %v9088_v13  ;;  %v6838_v6 = vpop.f32.mrb[95].mxu0  ;;  %v7206_v13 = vld [vmem:[#allocation22 + $0xc0] sm:$0xff]  }
0x2418   : > { %6848 = vmatpush3.bf16.msra.mxu0 %v7206_v13 }
0x2419   : > { %v5282_v14 = vsel %vm1016_vm1, %v5281_v4, 0.0  ;;  %6849 = vmatprep.subr.bf16.mxu0 %v7994_v42 }
0x241a   : > { %5283 = vadd.xlane.f32.xlu0 %v5282_v14 }
0x241c   : > { %6850 = vmatpush3.bf16.msra.mxu0 %v7207_v17 }
0x241d   : > { %6851 = vmatprep.subr.bf16.mxu0 %v7994_v42 }
0x2420   : > { %6852 = vmatpush3.bf16.msra.mxu0 %v7208_v44 }
0x2421   : > { %6853 = vmatprep.subr.bf16.mxu0 %v7994_v42 }
0x2424   : > { %6854 = vmatpush3.bf16.msra.mxu0 %v7209_v21 }
0x2425   : > { %6855 = vmatprep.subr.bf16.mxu0 %v7994_v42 }
0x2428   : > { %6856 = vmatpush3.bf16.msra.mxu0 %v7210_v34 }
0x2429   : > { %6857 = vmatprep.subr.bf16.mxu0 %v7994_v42 }
0x242c   : > { %6858 = vmatpush3.bf16.msra.mxu0 %v7211_v56 }
0x242d   : > { %6859 = vmatprep.subr.bf16.mxu0 %v7994_v42 }
0x2430   : > { %6860 = vmatpush3.bf16.msra.mxu0 %v7212_v45 }
0x2431   : > { %6861 = vmatprep.subr.bf16.mxu0 %v7994_v42 }
0x2434   : > { %6862 = vmatpush3.bf16.msra.mxu0 %v7213_v47 }
0x24a7   : > { %v5284_v43 = vpop.xlane.xlu0 %5283 }
0x24a8   : > { %v5285_v19 = vmul.f32 0.03125, %v5284_v43 }
0x24aa   : > { %v5286_v60 = vsub.f32 %v5281_v4, %v5285_v19 }
0x24ac   : > { %v5287_v54 = vmul.f32 %v5286_v60, %v5286_v60 }
0x24ae   : > { %v5288_v57 = vsel %vm1016_vm1, %v5287_v54, 0.0 }
0x24af   : > { %5289 = vadd.xlane.f32.xlu1 %v5288_v57 }
0x253c   : > { %v5290_v20 = vpop.xlane.xlu1 %5289 }
0x253d   : > { %v5291_v50 = vmul.f32 0.03125, %v5290_v20 }
0x253f   : > { %v5292_v38 = vadd.f32 1e-05, %v5291_v50 }
0x2541   : > { %7376 = vrsqrt.f32 %v5292_v38 }
0x254b   : > { %v7377_v26 = vpop.eup %7376 }
0x254c   : > { %v5294_v7 = vmul.f32 %v7377_v26, %v5286_v60 }
0x254e   : > { %v5301_v32 = vmul.f32 %v6153_v33, %v5294_v7 }
0x2550   : > { %v5308_v41 = vadd.f32 %v6154_v30, %v5301_v32 }
0x2552   : > { %v5335_v18 = vpack.c.bf16 %v5308_v41, %v5308_v41 }
0x2554   : > { %6844 = vmatmul.mubr.msk.bf16.vlgmr.msra.gmra.mrb[76].mxu1 %vm1009_vm2, %v5335_v18 }
0x2555   : > { %6868 = vmatpush3.bf16.msra.mxu1 %v7204_v29  ;;  %6871 = vmatprep.mubr.msk.bf16.mxu1 %vm1009_vm2, %v9269_v0 }
0x2556   : > { %6869 = vmatprep.subr.bf16.mxu1 %v7205_v46 }
0x2559   : > { %6870 = vmatpush3.bf16.msra.mxu1 %v7205_v46 }
0x255c   : > { %6872 = vmatmul.mubr.msk.bf16.vlgmr.msra.gmra.mrb[80].mxu1 %vm1009_vm2, %v9273_v36 }
0x2627   : > { %v5391_v10 = vpop.f32.mrb[76].mxu1 }
0x2628   : > { %v5392_v39 = vadd.f32 %v6155_v35, %v5391_v10  ;;  %v6845_v5 = vpop.f32.mrb[77].mxu1 }
0x2629   : > { %v5394_v25 = vpop.f32.mrb[78].mxu1 }
0x262a   : > { %v5397_v48 = vmax.f32 %v5392_v39, 0.0  ;;  %v6846_v62 = vpop.f32.mrb[79].mxu1 }
0x262c   : > { %v5398_v0 = vpack.c.bf16 %v5397_v48, %v5397_v48 }
0x262e   : > { %6864 = vmatmul.mubr.bf16.vlgmr.msra.gmra.mrb[96].mxu0 %v5398_v0 }
0x262f   : > { %v6873_v63 = vpop.f32.mrb[80].mxu1 }
0x2630   : > { %v5592_v36 = vadd.f32 %v6873_v63, %v6170_v61  ;;  %v5583_v9 = vpop.f32.mrb[81].mxu1 }
0x2631   : > { %v5584_v58 = vadd.f32 %v6170_v61, %v5583_v9  ;;  %v6874_v27 = vpop.f32.mrb[82].mxu1 }
0x2632   : > { %5600 = vst.msk [vmem:[%s873_s28 + $0x10] sm:$0x3] %vm5599_vm3, %v5592_v36  ;;  %v5586_v42 = vpop.f32.mrb[83].mxu1 }
0x2633   : > { %5597 = vst.msk [vmem:[%s873_s28] sm:$0xff] %vm947_vm0, %v5584_v58  ;;  %v5587_v51 = vadd.f32 %v6170_v61, %v5586_v42 }
0x2635   : > { %5598 = vst.msk [vmem:[%s873_s28 + $0x8] sm:$0xff] %vm947_vm0, %v5587_v51 }
0x2701   : > { %v5487_v15 = vpop.f32.mrb[96].mxu0 }
0x2702   : > { %v5488_v12 = vadd.f32 %v6159_v52, %v5487_v15  ;;  %v6865_v24 = vpop.f32.mrb[97].mxu0 }
0x2703   : > { %v5490_v53 = vpop.f32.mrb[98].mxu0 }
0x2704   : > { %v5497_v40 = vadd.f32 %v5488_v12, %v5308_v41  ;;  %v6866_v28 = vpop.f32.mrb[99].mxu0 }
0x2706   : > { %v5498_v11 = vsel %vm1016_vm1, %v5497_v40, 0.0 }
0x2707   : > { %5499 = vadd.xlane.f32.xlu0 %v5498_v11 }
0x2794   : > { %v5500_v16 = vpop.xlane.xlu0 %5499 }
0x2795   : > { %v5501_v31 = vmul.f32 0.03125, %v5500_v16 }
0x2797   : > { %v5502_v2 = vsub.f32 %v5497_v40, %v5501_v31 }
0x2799   : > { %v5503_v3 = vmul.f32 %v5502_v2, %v5502_v2 }
0x279b   : > { %v5504_v37 = vsel %vm1016_vm1, %v5503_v3, 0.0 }
0x279c   : > { %5505 = vadd.xlane.f32.xlu1 %v5504_v37 }
0x279d   : > { %7853 = shalt.err (!%p7850_p4)
}
0x279e   : > { %s7854_s14 = scalar_lea.hbm %s9450_s1, 384  ;;  %s7858_s11 = scalar_lea.hbm %s9668_s30, 768 }
0x279f   : > { %p7855_p1 = scmp.ne.s32.totalorder %s9450_s1, %s7854_s14  ;;  %p7859_p12 = scmp.lt.u32.totalorder %s9450_s1, %s9668_s30 }
0x27a0   : > { %p7860_p7 = scmp.lt.u32.totalorder %s7858_s11, %s7854_s14  ;;  %p7862_p6 = scmp.lt.u32.totalorder %s7854_s14, %s9450_s1 }
0x27a1   : > { %p7856_p0 = pnand %p7855_p1, %p9669_p3 }
0x27a2   : > { %p7861_p8 = por %p7860_p7, %p7859_p12 }
0x27a3   : > { %p7857_p11 = pneg %p7856_p0 }
0x27a4   : > { %p7863_p2 = por %p7862_p6, %p7861_p8 }
0x27a6   : > { %p7864_p10 = pnand %p7863_p2, %p7857_p11 }
0x27a8   : > { %7867 = shalt.err (!%p7864_p10)
}
0x27a9   : > { %s7997_s20 = smov 128   ;;  %s7998_s5 = smov 8   ;;  %v6168_v55 = vld [vmem:[#allocation17 + $0xe] ss:$0 sm:$0xff]  ;;  %v6169_v6 = vld [vmem:[#allocation17 + $0xf] ss:$0 sm:$0xff] }
0x27aa   : > { %6999 = dma.vmem_to_hbm [thread:$0]  (%p9669_p3), %s9444_s0, 384, %s9450_s1, %s5603_s22, %s7997_s20, %s7997_s20, %s7998_s5  }
0x27ab   : > { %s6177_s4 = sshll.u32 %s9654_s16, 5  ;;  %s880_s26 = scalar_lea.vmem [#allocation29], %s8624_s18  ;;  %v7381_v19 = vld [vmem:[%s752_s15] sm:$0x3] }
0x27ac   : > { %s5637_s17 = sshll.u32 %s880_s26, 4  ;;  %s9670_s1 = sld [smem:[#allocation64_spill]]  ;;  %s9485_s17 = int_to_ptr.vmem [resolvable:$true] %s5637_s17 }
0x27ad   : > { %s5608_s14 = scalar_lea.sflag [#allocation30], %s8602_s29  ;;  %s7868_s16 = scalar_lea.vmem %s9485_s17, 32 }
0x27ae   : > { %p7869_p13 = scmp.ne.s32.totalorder %s9485_s17, %s7868_s16  ;;  %s7999_s18 = smov [#allocation29]  }
0x27af   : > { %s7872_s15 = sshll.u32 %s7999_s18, 4  ;;  %s7873_s15 = int_to_ptr.vmem [resolvable:$false] %s7872_s15 }
0x27b0   : > { %p7870_p5 = pnand %p7869_p13, %p9669_p3  ;;  %s7874_s23 = scalar_lea.vmem %s7873_s15, 64 }
0x27b1   : > { %p7875_p4 = scmp.lt.s32.totalorder %s9485_s17, %s7873_s15  ;;  %p7876_p1 = scmp.lt.s32.totalorder %s7874_s23, %s7868_s16 }
0x27b2   : > { %s9483_s22 = scalar_lea.hbm %s9670_s1, %s6177_s4  ;;  %p7871_p9 = pneg %p7870_p5 }
0x27b3   : > { %p7877_p0 = por %p7876_p1, %p7875_p4 }
0x27b5   : > { %p7878_p11 = pnand %p7877_p0, %p7871_p9 }
0x2829   : > { %v5506_v49 = vpop.xlane.xlu1 %5505 }
0x282a   : > { %v5507_v59 = vmul.f32 0.03125, %v5506_v49 }
0x282c   : > { %v5508_v1 = vadd.f32 1e-05, %v5507_v59 }
0x282e   : > { %7378 = vrsqrt.f32 %v5508_v1 }
0x2838   : > { %v7379_v8 = vpop.eup %7378 }
0x2839   : > { %v5510_v4 = vmul.f32 %v7379_v8, %v5502_v2 }
0x283b   : > { %v5517_v14 = vmul.f32 %v6168_v55, %v5510_v4 }
0x283d   : > { %v5524_v43 = vadd.f32 %v6169_v6, %v5517_v14 }
0x283f   : > { %v5525_v60 = vadd.f32 %v7381_v19, %v5524_v43 }
0x2841   : > { %5601 = vst.msk [vmem:[%s880_s26] sm:$0x3] %vm1016_vm1, %v5525_v60 }
0x2842   : > { %7881 = shalt.err (!%p7878_p11)
}
0x2843   : > { %s7882_s29 = scalar_lea.hbm %s9483_s22, 32  ;;  %s7886_s28 = scalar_lea.hbm %s9670_s1, 64 }
0x2844   : > { %p7883_p12 = scmp.ne.s32.totalorder %s9483_s22, %s7882_s29  ;;  %p7887_p6 = scmp.lt.u32.totalorder %s9483_s22, %s9670_s1 }
0x2845   : > { %p7888_p2 = scmp.lt.u32.totalorder %s7886_s28, %s7882_s29  ;;  %p7890_p13 = scmp.lt.u32.totalorder %s7882_s29, %s9483_s22 }
0x2846   : > { %p7884_p7 = pnand %p7883_p12, %p9669_p3 }
0x2847   : > { %p7889_p10 = por %p7888_p2, %p7887_p6 }
0x2848   : > { %p7885_p8 = pneg %p7884_p7 }
0x2849   : > { %p7891_p5 = por %p7890_p13, %p7889_p10 }
0x284b   : > { %p7892_p9 = pnand %p7891_p5, %p7885_p8 }
0x284d   : > { %7895 = shalt.err (!%p7892_p9)
}
0x284e   : > { %7000 = dma.vmem_to_hbm [thread:$0]  (%p9669_p3), %s9485_s17, 32, %s9483_s22, %s5608_s14  }
0x284f PF: > { %s9671_s5 = sld [smem:[#allocation42_spill]]  ;;  %s9672_s4 = sld [smem:[#allocation49_spill]] }
0x2850   : > { %p9674_p1 = scmp.ge.s32.totalorder %s7970_s27, 2 }
0x2855   : > { %s5649_s26 = sand.u32 1, %s9671_s5   ;;  %p9673_p4 = scmp.ne.s32.totalorder %s9672_s4, 0 }
0x2856   : > { %s5650_s6 = scalar_lea.sflag [#allocation4], %s5649_s26 }
0x2857   : > { %p7054_p0 = pnand %p9674_p1, %p9673_p4 }
0x2859   : > { %7949 = dma.done.wait (!%p7054_p0), %s5650_s6, 384  }
0x285a   : > { %7951 = vsyncadd (!%p7054_p0), %s5650_s6, 4294966912  ;;  %s5659_s0 = scalar_lea.sflag [#allocation30], %s5649_s26 }
0x285b   : > { %7953 = dma.done.wait (!%p7054_p0), %s5659_s0, 32  }
0x285c   : > { %7955 = vsyncadd (!%p7054_p0), %s5659_s0, 4294967264  ;;  %s9675_s27 = sld [smem:[#allocation46_spill]]  ;;  %s9676_s16 = sld [smem:[#allocation43_spill]] }
0x285d   : > { %s9677_s26 = sld [smem:[#allocation47_spill]]  ;;  %s9678_s24 = smov %s7962_s25 }
0x2862   : > { %p46_p3 = scmp.ge.s32.totalorder %s9675_s27, 4   ;;  %s9679_s25 = smov %s9676_s16 }
0x2864   :  { %48 = sbr.rel (!%p46_p3) target bundleno = 33 (0x21), region = 297 }
0x286b   :  { %5664 = vsyncpa [#allocation3], 1 }
0x286c   :  { %5666 = vsyncpa [#allocation3 + $0x1], 1 }
0x286d   :  { %5667 = vsyncpa [#allocation6], 1 }
0x286e   :  { %5669 = vsyncpa [#allocation6 + $0x1], 1 }
0x286f   :  { %5670 = vsyncpa [#allocation9], 1 }
0x2870   :  { %5672 = vsyncpa [#allocation9 + $0x1], 1 }
0x2871   :  { %5673 = vsyncpa [#allocation12], 1 }
0x2872   :  { %5674 = vsyncpa [#allocation15], 1 }
0x2873   :  { %5675 = vsyncpa [#allocation18], 1 }
0x2874   :  { %5676 = vsyncpa [#allocation21], 1 }
0x2875   :  { %5677 = vsyncpa [#allocation24], 1 }
0x2876   :  { %5678 = vsyncpa [#allocation27], 1 }
0x2877   :  { %5679 = vsyncpa [#allocation4], 1 }
0x2878   :  { %5681 = vsyncpa [#allocation4 + $0x1], 1 }
0x2879   :  { %5682 = vsyncpa [#allocation30], 1 }
0x287a   :  { %5684 = vsyncpa [#allocation30 + $0x1], 1 }

</bundles_post_ra>
